<compile_context>
chip_gen: v5e
topology: v5e:2x2
jax: 0.10.0
libtpu: 0.0.40
codegen_flags: <defaults>
</compile_context>

<pallas_src>
import functools

import numpy as np

import jax
import jax.numpy as jnp
from jax.experimental import pallas as pl
from jax.experimental.pallas import tpu as pltpu

D_MODEL = 128
NUM_HEADS = 4
HEAD_DIM = D_MODEL // NUM_HEADS
FFN_HIDDEN = 4 * D_MODEL
EPS_LN = 1e-5
EPS_BN = 1e-5
DTYPE = jnp.float32
BF16 = jnp.bfloat16

# ----------------------- packed operand layouts (static) ---------------------

_W128_LAYOUT = (            # all matmul weights with K = D_MODEL -> one bf16 slab (128, 2048)
    ("ca2_wq", D_MODEL), ("ca2_wkv", 2 * D_MODEL), ("ca2_wo", D_MODEL), ("ffn2_w1", FFN_HIDDEN),
    ("ca1_wq", D_MODEL), ("ca1_wkv", 2 * D_MODEL), ("ca1_wo", D_MODEL), ("ffn1_w1", FFN_HIDDEN),
)
_BIAS_LAYOUT = (            # every bias / BN / LN vector -> one f32 slab (1, 3328)
    ("ca2_bq", D_MODEL), ("ca2_bkv", 2 * D_MODEL), ("ca2_bo", D_MODEL),
    ("bn3_scale", D_MODEL), ("bn3_shift", D_MODEL),
    ("ffn2_b1", FFN_HIDDEN), ("ffn2_b2", D_MODEL),
    ("bn4_scale", D_MODEL), ("bn4_shift", D_MODEL),
    ("ca1_bq", D_MODEL), ("ca1_bkv", 2 * D_MODEL), ("ca1_bo", D_MODEL),
    ("ln1_g", D_MODEL), ("ln1_b", D_MODEL),
    ("ffn1_b1", FFN_HIDDEN), ("ffn1_b2", D_MODEL),
    ("ln2_g", D_MODEL), ("ln2_b", D_MODEL),
)


def _offsets(layout):
    off, table = 0, {}
    for name, width in layout:
        table[name] = (off, width)
        off += width
    return table, off


_W128_OFF, W128_TOTAL = _offsets(_W128_LAYOUT)   # 2048
_BIAS_OFF, BIAS_TOTAL = _offsets(_BIAS_LAYOUT)   # 3328


# ----------------------------- in-kernel helpers ------------------------------

def _mha_ctx(q, k, v, mask_nd, ones_bd):
    """All-heads attention context for ONE batch element using full-width matmuls.

    q: (Sq, D) f32, already scaled by 1/sqrt(head_dim) (folded into Wq/bq).
    k, v: (Sk, D) f32.  mask_nd: (n, D) 0/1, n = H*Sk, block-diagonal head routing.
    ones_bd: (n, n) 0/1, block-ones for per-head softmax denominators.
    Returns (Sq, D) f32 == concat over heads of softmax(qh kh^T) vh.
    """
    # Block-diagonal K/V: row block h carries only head h's feature columns.
    k_rep = (jnp.concatenate([k] * NUM_HEADS, axis=0) * mask_nd).astype(BF16)   # (n, D)
    v_rep = (jnp.concatenate([v] * NUM_HEADS, axis=0) * mask_nd).astype(BF16)   # (n, D)
    # All-head scores in a single K=128 contraction (no per-head 32-lane slices).
    s = jax.lax.dot_general(q.astype(BF16), k_rep, (((1,), (1,)), ((), ())),
                            preferred_element_type=jnp.float32)                  # (Sq, n)
    m = jnp.max(s, axis=-1, keepdims=True)       # global row max: valid shift for every block
    p = jnp.exp(s - m)
    # Per-head denominators broadcast back across each block (f32 matmul for accuracy).
    l = jnp.dot(p, ones_bd, preferred_element_type=jnp.float32)                  # (Sq, n)
    attn = p * pl.reciprocal(jnp.maximum(l, 1e-20), approx=True)
    # Context: block-diagonal V routes each head's probs to its own feature columns.
    return jnp.dot(attn.astype(BF16), v_rep, preferred_element_type=jnp.float32)  # (Sq, D)


def _ffn(x, w1, b1, w2, b2):
    h = jnp.dot(x.astype(BF16), w1, preferred_element_type=jnp.float32) + b1
    h = jnp.maximum(h, 0.0)
    return jnp.dot(h.astype(BF16), w2, preferred_element_type=jnp.float32) + b2


def _layernorm(z, g, b):
    mean = jnp.mean(z, axis=-1, keepdims=True)
    c = z - mean
    var = jnp.mean(c * c, axis=-1, keepdims=True)
    return c * jax.lax.rsqrt(var + EPS_LN) * g + b


# ----------------------------- fused Pallas kernel ----------------------------

def _fused_block_kernel(images_ref, prompts_ref, orig_ref, *rest,
                        bt, s_img, s_prm, add_pos):
    if add_pos:
        (pos_ref, w128_ref, wdn_ref, bias_ref, mask2_ref, mask1_ref,
         images_out_ref, prompts_out_ref) = rest
    else:
        pos_ref = None
        (w128_ref, wdn_ref, bias_ref, mask2_ref, mask1_ref,
         images_out_ref, prompts_out_ref) = rest

    def w(name):                                   # bf16 (128, width) weight slice
        off, width = _W128_OFF[name]
        return w128_ref[:, off:off + width]

    def bvec(name):                                # f32 (1, width) vector slice
        off, width = _BIAS_OFF[name]
        return bias_ref[:, off:off + width]

    mask_nd2, ones2 = mask2_ref[:, :D_MODEL], mask2_ref[:, D_MODEL:]   # n2 = H*s_prm
    mask_nd1, ones1 = mask1_ref[:, :D_MODEL], mask1_ref[:, D_MODEL:]   # n1 = H*s_img

    img = images_ref[...].reshape(bt * s_img, D_MODEL)      # (M_img, D) f32
    prm = prompts_ref[...].reshape(bt * s_prm, D_MODEL)     # (M_prm, D) f32

    # --- res_connection3: images = BN3(images + CrossAttention2(images, prompts)) ---
    q2 = jnp.dot(img.astype(BF16), w("ca2_wq"),
                 preferred_element_type=jnp.float32) + bvec("ca2_bq")
    kv2 = jnp.dot(prm.astype(BF16), w("ca2_wkv"),
                  preferred_element_type=jnp.float32) + bvec("ca2_bkv")
    ctx2 = []
    for b in range(bt):                                      # static unroll over folded batch
        qb = q2[b * s_img:(b + 1) * s_img]
        kb = kv2[b * s_prm:(b + 1) * s_prm, :D_MODEL]
        vb = kv2[b * s_prm:(b + 1) * s_prm, D_MODEL:]
        ctx2.append(_mha_ctx(qb, kb, vb, mask_nd2, ones2))
    ctx2 = ctx2[0] if bt == 1 else jnp.concatenate(ctx2, axis=0)
    attn2 = jnp.dot(ctx2.astype(BF16), w("ca2_wo"),
                    preferred_element_type=jnp.float32) + bvec("ca2_bo")
    img = (img + attn2) * bvec("bn3_scale") + bvec("bn3_shift")

    # --- res_connection4: images = BN4(images + FFN2(images)) (+ pos) ---
    ff2 = _ffn(img, w("ffn2_w1"), bvec("ffn2_b1"),
               wdn_ref[:, :D_MODEL], bvec("ffn2_b2"))
    img = (img + ff2) * bvec("bn4_scale") + bvec("bn4_shift")
    if add_pos:
        img = img + pos_ref[...].reshape(bt * s_img, D_MODEL)

    # --- res_connection1: prompts = LN1(prompts + CrossAttention1(prompts, images)) ---
    q1 = jnp.dot(prm.astype(BF16), w("ca1_wq"),
                 preferred_element_type=jnp.float32) + bvec("ca1_bq")
    kv1 = jnp.dot(img.astype(BF16), w("ca1_wkv"),
                  preferred_element_type=jnp.float32) + bvec("ca1_bkv")
    ctx1 = []
    for b in range(bt):
        qb = q1[b * s_prm:(b + 1) * s_prm]
        kb = kv1[b * s_img:(b + 1) * s_img, :D_MODEL]
        vb = kv1[b * s_img:(b + 1) * s_img, D_MODEL:]
        ctx1.append(_mha_ctx(qb, kb, vb, mask_nd1, ones1))
    ctx1 = ctx1[0] if bt == 1 else jnp.concatenate(ctx1, axis=0)
    attn1 = jnp.dot(ctx1.astype(BF16), w("ca1_wo"),
                    preferred_element_type=jnp.float32) + bvec("ca1_bo")
    prm = _layernorm(prm + attn1, bvec("ln1_g"), bvec("ln1_b"))

    # --- res_connection2: prompts = LN2(prompts + FFN1(prompts)) ---
    ff1 = _ffn(prm, w("ffn1_w1"), bvec("ffn1_b1"),
               wdn_ref[:, D_MODEL:], bvec("ffn1_b2"))
    prm = _layernorm(prm + ff1, bvec("ln2_g"), bvec("ln2_b"))

    prm = prm + orig_ref[...].reshape(bt * s_prm, D_MODEL)

    images_out_ref[...] = img.reshape(bt, s_img, D_MODEL).astype(images_out_ref.dtype)
    prompts_out_ref[...] = prm.reshape(bt, s_prm, D_MODEL).astype(prompts_out_ref.dtype)


# ----------------------------- wrapper / glue --------------------------------

def _prep_attn(p):
    """Collapse w_x @ in_x_w (x @ W convention, weights stored (in, out)); fuse K|V;
    fold the 1/sqrt(head_dim) attention scale into the Q projection."""
    scale = 1.0 / float(HEAD_DIM) ** 0.5
    return {
        "wq": (p["w_q"] @ p["in_q_w"]) * scale,
        "bq": p["in_q_b"] * scale,
        "wkv": jnp.concatenate([p["w_k"] @ p["in_k_w"], p["w_v"] @ p["in_v_w"]], axis=1),
        "bkv": jnp.concatenate([p["in_k_b"], p["in_v_b"]]),
        "wo": p["out_w"], "bo": p["out_b"],
    }


def _prep_bn(bn):
    scale = bn["gamma"] * jax.lax.rsqrt(bn["running_var"] + EPS_BN)
    shift = bn["beta"] - bn["running_mean"] * scale
    return scale, shift


def _pack_operands(params):
    ca2, ca1 = _prep_attn(params["ca2"]), _prep_attn(params["ca1"])
    bn3_scale, bn3_shift = _prep_bn(params["bn3"])
    bn4_scale, bn4_shift = _prep_bn(params["bn4"])

    wmats = {
        "ca2_wq": ca2["wq"], "ca2_wkv": ca2["wkv"], "ca2_wo": ca2["wo"],
        "ffn2_w1": params["ffn2"]["w1"],
        "ca1_wq": ca1["wq"], "ca1_wkv": ca1["wkv"], "ca1_wo": ca1["wo"],
        "ffn1_w1": params["ffn1"]["w1"],
    }
    w128 = jnp.concatenate([wmats[n] for n, _ in _W128_LAYOUT], axis=1).astype(BF16)
    wdn = jnp.concatenate([params["ffn2"]["w2"], params["ffn1"]["w2"]], axis=1).astype(BF16)

    vecs = {
        "ca2_bq": ca2["bq"], "ca2_bkv": ca2["bkv"], "ca2_bo": ca2["bo"],
        "bn3_scale": bn3_scale, "bn3_shift": bn3_shift,
        "ffn2_b1": params["ffn2"]["b1"], "ffn2_b2": params["ffn2"]["b2"],
        "bn4_scale": bn4_scale, "bn4_shift": bn4_shift,
        "ca1_bq": ca1["bq"], "ca1_bkv": ca1["bkv"], "ca1_bo": ca1["bo"],
        "ln1_g": params["ln1"]["gamma"], "ln1_b": params["ln1"]["beta"],
        "ffn1_b1": params["ffn1"]["b1"], "ffn1_b2": params["ffn1"]["b2"],
        "ln2_g": params["ln2"]["gamma"], "ln2_b": params["ln2"]["beta"],
    }
    bias = jnp.concatenate([vecs[n] for n, _ in _BIAS_LAYOUT]).reshape(1, BIAS_TOTAL)
    bias = bias.astype(jnp.float32)

    assert w128.shape == (D_MODEL, W128_TOTAL)
    assert wdn.shape == (FFN_HIDDEN, 2 * D_MODEL)
    assert bias.shape == (1, BIAS_TOTAL)
    return w128, wdn, bias


def _head_mask_slab(sk):
    """Constant (n, D + n) f32 slab: [:, :D] block-diagonal head routing mask,
    [:, D:] block-ones for per-head softmax denominators.  Built on host (numpy)."""
    n = NUM_HEADS * sk
    rows = np.arange(n) // sk                       # head id of each row block
    feat = np.arange(D_MODEL) // HEAD_DIM           # head id of each feature column
    mask_nd = (rows[:, None] == feat[None, :]).astype(np.float32)     # (n, D)
    ones_bd = (rows[:, None] == rows[None, :]).astype(np.float32)     # (n, n)
    return jnp.asarray(np.concatenate([mask_nd, ones_bd], axis=1), dtype=jnp.float32)


def cross_attention_block_batch(params, images, prompts_input, original_prompts,
                                pos_encodings, add_pos=True, batch_block=None):
    B, s_img, D = images.shape
    s_prm = prompts_input.shape[1]
    assert D == D_MODEL and s_img % 8 == 0 and s_prm % 8 == 0

    # Keep >=2 grid steps when possible so v7x's two TensorCores both get work; fold the
    # rest of the batch into each step so projections/FFNs run on (bt*S, D) slabs.
    # On single-TC chips (v5e/v6e), batch_block=B (one grid step) is strictly better.
    if batch_block is None:
        batch_block = B // 2 if (B % 2 == 0 and B >= 2) else 1
    assert B % batch_block == 0
    bt = batch_block
    steps = B // bt

    w128, wdn, bias = _pack_operands(params)
    mask2 = _head_mask_slab(s_prm)    # (H*s_prm, D + H*s_prm)
    mask1 = _head_mask_slab(s_img)    # (H*s_img, D + H*s_img)

    token_args = [images, prompts_input, original_prompts]
    token_specs = [
        pl.BlockSpec((bt, s_img, D), lambda b: (b, 0, 0)),
        pl.BlockSpec((bt, s_prm, D), lambda b: (b, 0, 0)),
        pl.BlockSpec((bt, s_prm, D), lambda b: (b, 0, 0)),
    ]
    if add_pos:
        token_args.append(pos_encodings)
        token_specs.append(pl.BlockSpec((bt, s_img, D), lambda b: (b, 0, 0)))

    const_args = [w128, wdn, bias, mask2, mask1]
    const_specs = [pl.BlockSpec(a.shape, lambda b: (0, 0)) for a in const_args]

    kernel = functools.partial(_fused_block_kernel, bt=bt, s_img=s_img,
                               s_prm=s_prm, add_pos=add_pos)

    # Rough cost hint so XLA can overlap this tiny custom call with surrounding HLO.
    n1, n2 = NUM_HEADS * s_img, NUM_HEADS * s_prm
    flops_per_batch = 2 * (
        s_img * D * D + s_prm * D * 2 * D                                   # attn2 projections
        + s_img * D * n2 + s_img * n2 * n2 + s_img * n2 * D + s_img * D * D  # attn2 core + out
        + 2 * s_img * D * FFN_HIDDEN                                         # FFN2
        + s_prm * D * D + s_img * D * 2 * D                                  # attn1 projections
        + s_prm * D * n1 + s_prm * n1 * n1 + s_prm * n1 * D + s_prm * D * D  # attn1 core + out
        + 2 * s_prm * D * FFN_HIDDEN)                                        # FFN1
    io_bytes = 4 * B * D * (3 * s_img + 3 * s_prm) + (add_pos * 4 * B * s_img * D)
    wt_bytes = 2 * (w128.size + wdn.size) + 4 * (bias.size + mask1.size + mask2.size)
    cost = pl.CostEstimate(flops=int(B * flops_per_batch),
                           transcendentals=int(B * (s_img * n2 + s_prm * n1)),
                           bytes_accessed=int(io_bytes + wt_bytes))

    out_images, out_prompts = pl.pallas_call(
        kernel,
        out_shape=(jax.ShapeDtypeStruct((B, s_img, D), images.dtype),
                   jax.ShapeDtypeStruct((B, s_prm, D), prompts_input.dtype)),
        grid_spec=pltpu.PrefetchScalarGridSpec(
            num_scalar_prefetch=0,
            grid=(steps,),
            in_specs=token_specs + const_specs,
            out_specs=[
                pl.BlockSpec((bt, s_img, D), lambda b: (b, 0, 0)),
                pl.BlockSpec((bt, s_prm, D), lambda b: (b, 0, 0)),
            ],
        ),
        compiler_params=pltpu.CompilerParams(
            dimension_semantics=("parallel",)),
        cost_estimate=cost,
    )(*token_args, *const_args)

    return out_images, out_prompts


# ----------------------------- deterministic init ----------------------------

def _init_params(key):
    def nxt():
        nonlocal key
        key, sub = jax.random.split(key)
        return sub

    def dense(shape):
        return (jax.random.normal(nxt(), shape, DTYPE) * 0.02).astype(DTYPE)

    def attn_params():
        return {
            "w_q": dense((D_MODEL, D_MODEL)),
            "w_k": dense((D_MODEL, D_MODEL)),
            "w_v": dense((D_MODEL, D_MODEL)),
            "in_q_w": dense((D_MODEL, D_MODEL)), "in_q_b": dense((D_MODEL,)),
            "in_k_w": dense((D_MODEL, D_MODEL)), "in_k_b": dense((D_MODEL,)),
            "in_v_w": dense((D_MODEL, D_MODEL)), "in_v_b": dense((D_MODEL,)),
            "out_w": dense((D_MODEL, D_MODEL)), "out_b": dense((D_MODEL,)),
        }

    def ffn_params():
        return {
            "w1": dense((D_MODEL, FFN_HIDDEN)), "b1": dense((FFN_HIDDEN,)),
            "w2": dense((FFN_HIDDEN, D_MODEL)), "b2": dense((D_MODEL,)),
        }

    def bn_params():  # PyTorch BatchNorm1d default init (eval mode)
        return {
            "gamma": jnp.ones((D_MODEL,), DTYPE),
            "beta": jnp.zeros((D_MODEL,), DTYPE),
            "running_mean": jnp.zeros((D_MODEL,), DTYPE),
            "running_var": jnp.ones((D_MODEL,), DTYPE),
        }

    def ln_params():  # PyTorch LayerNorm default init
        return {"gamma": jnp.ones((D_MODEL,), DTYPE),
                "beta": jnp.zeros((D_MODEL,), DTYPE)}

    return {
        "ca1": attn_params(), "ca2": attn_params(),
        "ffn1": ffn_params(), "ffn2": ffn_params(),
        "bn3": bn_params(), "bn4": bn_params(),
        "ln1": ln_params(), "ln2": ln_params(),
    }


# ----------------------------------- main ------------------------------------

if __name__ == "__main__":
    B, S_IMG, S_PROMPT = 2, 64, 8

    key = jax.random.PRNGKey(0)
    k_par, k_img, k_prm, k_org, k_pos = jax.random.split(key, 5)

    params = _init_params(k_par)
    images = jax.random.normal(k_img, (B, S_IMG, D_MODEL), DTYPE)
    prompts_input = jax.random.normal(k_prm, (B, S_PROMPT, D_MODEL), DTYPE)
    original_prompts = jax.random.normal(k_org, (B, S_PROMPT, D_MODEL), DTYPE)
    pos_encodings = jax.random.normal(k_pos, (B, S_IMG, D_MODEL), DTYPE)

    fwd = jax.jit(functools.partial(cross_attention_block_batch, add_pos=True))
    out_images, out_prompts = fwd(params, images, prompts_input,
                                  original_prompts, pos_encodings)
    jax.block_until_ready((out_images, out_prompts))

    assert out_images.shape == (B, S_IMG, D_MODEL)
    assert out_prompts.shape == (B, S_PROMPT, D_MODEL)
    assert bool(jnp.all(jnp.isfinite(out_images)))
    assert bool(jnp.all(jnp.isfinite(out_prompts)))
    print("KERNEL_OK")
</pallas_src>

<mosaic_0001>
module attributes {stable_mosaic.version = 11 : i64} {
  func.func @_fused_block_kernel(%arg0: i32, %arg1: memref<1x64x128xf32, #tpu.memory_space<vmem>>, %arg2: memref<1x8x128xf32, #tpu.memory_space<vmem>>, %arg3: memref<1x8x128xf32, #tpu.memory_space<vmem>>, %arg4: memref<1x64x128xf32, #tpu.memory_space<vmem>>, %arg5: memref<128x2048xbf16, #tpu.memory_space<vmem>>, %arg6: memref<512x256xbf16, #tpu.memory_space<vmem>>, %arg7: memref<1x3328xf32, #tpu.memory_space<vmem>>, %arg8: memref<32x160xf32, #tpu.memory_space<vmem>>, %arg9: memref<256x384xf32, #tpu.memory_space<vmem>>, %arg10: memref<1x64x128xf32, #tpu.memory_space<vmem>>, %arg11: memref<1x8x128xf32, #tpu.memory_space<vmem>>) attributes {dimension_semantics = [#tpu.dimension_semantics<parallel>], iteration_bounds = array<i64: 2>, scalar_prefetch = 0 : i64, scratch_operands = 0 : i64, tpu.core_type = #tpu.core_type<tc>, window_params = [{transform_indices = @transform_0, window_bounds = array<i64: 1, 64, 128>}, {transform_indices = @transform_1, window_bounds = array<i64: 1, 8, 128>}, {transform_indices = @transform_2, window_bounds = array<i64: 1, 8, 128>}, {transform_indices = @transform_3, window_bounds = array<i64: 1, 64, 128>}, {pipeline_mode = #tpu.pipeline_mode<synchronous>, transform_indices = @transform_4, window_bounds = array<i64: 128, 2048>}, {pipeline_mode = #tpu.pipeline_mode<synchronous>, transform_indices = @transform_5, window_bounds = array<i64: 512, 256>}, {pipeline_mode = #tpu.pipeline_mode<synchronous>, transform_indices = @transform_6, window_bounds = array<i64: 1, 3328>}, {pipeline_mode = #tpu.pipeline_mode<synchronous>, transform_indices = @transform_7, window_bounds = array<i64: 32, 160>}, {pipeline_mode = #tpu.pipeline_mode<synchronous>, transform_indices = @transform_8, window_bounds = array<i64: 256, 384>}, {transform_indices = @transform_9, window_bounds = array<i64: 1, 64, 128>}, {transform_indices = @transform_10, window_bounds = array<i64: 1, 8, 128>}]} {
    %c0 = arith.constant 0 : index
    %c0_0 = arith.constant 0 : index
    %0 = vector.load %arg8[%c0, %c0_0] : memref<32x160xf32, #tpu.memory_space<vmem>>, vector<32x128xf32>
    %c0_1 = arith.constant 0 : index
    %c128 = arith.constant 128 : index
    %1 = vector.load %arg8[%c0_1, %c128] : memref<32x160xf32, #tpu.memory_space<vmem>>, vector<32x32xf32>
    %c0_2 = arith.constant 0 : index
    %c0_3 = arith.constant 0 : index
    %2 = vector.load %arg9[%c0_2, %c0_3] : memref<256x384xf32, #tpu.memory_space<vmem>>, vector<256x128xf32>
    %c0_4 = arith.constant 0 : index
    %c128_5 = arith.constant 128 : index
    %3 = vector.load %arg9[%c0_4, %c128_5] : memref<256x384xf32, #tpu.memory_space<vmem>>, vector<256x256xf32>
    %c0_6 = arith.constant 0 : index
    %c0_7 = arith.constant 0 : index
    %c0_8 = arith.constant 0 : index
    %4 = vector.load %arg1[%c0_6, %c0_7, %c0_8] : memref<1x64x128xf32, #tpu.memory_space<vmem>>, vector<1x64x128xf32>
    %5 = vector.shape_cast %4 : vector<1x64x128xf32> to vector<64x128xf32>
    %c0_9 = arith.constant 0 : index
    %c0_10 = arith.constant 0 : index
    %c0_11 = arith.constant 0 : index
    %6 = vector.load %arg2[%c0_9, %c0_10, %c0_11] : memref<1x8x128xf32, #tpu.memory_space<vmem>>, vector<1x8x128xf32>
    %7 = vector.shape_cast %6 : vector<1x8x128xf32> to vector<8x128xf32>
    %8 = arith.truncf %5 : vector<64x128xf32> to vector<64x128xbf16>
    %c0_12 = arith.constant 0 : index
    %c0_13 = arith.constant 0 : index
    %9 = vector.load %arg5[%c0_12, %c0_13] : memref<128x2048xbf16, #tpu.memory_space<vmem>>, vector<128x128xbf16>
    %cst = arith.constant dense<0.000000e+00> : vector<64x128xf32>
    %10 = tpu.matmul %8, %9, %cst {dimension_numbers = #tpu.dot_dimension_numbers<[1], [0], [0], [1], [0, 0, 1, 1], [], []>} : vector<64x128xbf16>, vector<128x128xbf16>, vector<64x128xf32> -> vector<64x128xf32>
    %c0_14 = arith.constant 0 : index
    %c0_15 = arith.constant 0 : index
    %11 = vector.load %arg7[%c0_14, %c0_15] : memref<1x3328xf32, #tpu.memory_space<vmem>>, vector<1x128xf32>
    %12 = vector.broadcast %11 : vector<1x128xf32> to vector<64x128xf32>
    %13 = arith.addf %10, %12 : vector<64x128xf32>
    %14 = arith.truncf %7 : vector<8x128xf32> to vector<8x128xbf16>
    %c0_16 = arith.constant 0 : index
    %c128_17 = arith.constant 128 : index
    %15 = vector.load %arg5[%c0_16, %c128_17] : memref<128x2048xbf16, #tpu.memory_space<vmem>>, vector<128x256xbf16>
    %cst_18 = arith.constant dense<0.000000e+00> : vector<8x256xf32>
    %16 = tpu.matmul %14, %15, %cst_18 {dimension_numbers = #tpu.dot_dimension_numbers<[1], [0], [0], [1], [0, 0, 1, 1], [], []>} : vector<8x128xbf16>, vector<128x256xbf16>, vector<8x256xf32> -> vector<8x256xf32>
    %c0_19 = arith.constant 0 : index
    %c128_20 = arith.constant 128 : index
    %17 = vector.load %arg7[%c0_19, %c128_20] : memref<1x3328xf32, #tpu.memory_space<vmem>>, vector<1x256xf32>
    %18 = vector.broadcast %17 : vector<1x256xf32> to vector<8x256xf32>
    %19 = arith.addf %16, %18 : vector<8x256xf32>
    %20 = vector.extract_strided_slice %19 {offsets = [0, 0], sizes = [8, 128], strides = [1, 1]} : vector<8x256xf32> to vector<8x128xf32>
    %21 = vector.extract_strided_slice %19 {offsets = [0, 128], sizes = [8, 128], strides = [1, 1]} : vector<8x256xf32> to vector<8x128xf32>
    %22 = tpu.concatenate %20, %20, %20, %20 in 0 : vector<8x128xf32>, vector<8x128xf32>, vector<8x128xf32>, vector<8x128xf32> -> vector<32x128xf32>
    %23 = arith.mulf %22, %0 : vector<32x128xf32>
    %24 = arith.truncf %23 : vector<32x128xf32> to vector<32x128xbf16>
    %25 = tpu.concatenate %21, %21, %21, %21 in 0 : vector<8x128xf32>, vector<8x128xf32>, vector<8x128xf32>, vector<8x128xf32> -> vector<32x128xf32>
    %26 = arith.mulf %25, %0 : vector<32x128xf32>
    %27 = arith.truncf %26 : vector<32x128xf32> to vector<32x128xbf16>
    %28 = arith.truncf %13 : vector<64x128xf32> to vector<64x128xbf16>
    %cst_21 = arith.constant dense<0.000000e+00> : vector<64x32xf32>
    %29 = tpu.matmul %28, %24, %cst_21 {dimension_numbers = #tpu.dot_dimension_numbers<[1], [1], [0], [0], [0, 0, 1, 0], [], []>} : vector<64x128xbf16>, vector<32x128xbf16>, vector<64x32xf32> -> vector<64x32xf32>
    %cst_22 = arith.constant dense<0xFF800000> : vector<64xf32>
    %30 = vector.multi_reduction <maximumf>, %29, %cst_22 [1] : vector<64x32xf32> to vector<64xf32>
    %31 = vector.shape_cast %30 : vector<64xf32> to vector<64x1xf32>
    %32 = vector.broadcast %31 : vector<64x1xf32> to vector<64x32xf32>
    %33 = arith.subf %29, %32 : vector<64x32xf32>
    %34 = math.exp %33 : vector<64x32xf32>
    %cst_23 = arith.constant dense<0.000000e+00> : vector<64x32xf32>
    %35 = tpu.matmul %34, %1, %cst_23 {dimension_numbers = #tpu.dot_dimension_numbers<[1], [0], [0], [1], [0, 0, 1, 1], [], []>} : vector<64x32xf32>, vector<32x32xf32>, vector<64x32xf32> -> vector<64x32xf32>
    %cst_24 = arith.constant 9.99999968E-21 : f32
    %36 = vector.broadcast %cst_24 : f32 to vector<64x32xf32>
    %37 = arith.maximumf %35, %36 : vector<64x32xf32>
    %38 = tpu.reciprocal %37 {approx = true} : vector<64x32xf32> -> vector<64x32xf32>
    %39 = arith.mulf %34, %38 : vector<64x32xf32>
    %40 = arith.truncf %39 : vector<64x32xf32> to vector<64x32xbf16>
    %cst_25 = arith.constant dense<0.000000e+00> : vector<64x128xf32>
    %41 = tpu.matmul %40, %27, %cst_25 {dimension_numbers = #tpu.dot_dimension_numbers<[1], [0], [0], [1], [0, 0, 1, 1], [], []>} : vector<64x32xbf16>, vector<32x128xbf16>, vector<64x128xf32> -> vector<64x128xf32>
    %42 = arith.truncf %41 : vector<64x128xf32> to vector<64x128xbf16>
    %c0_26 = arith.constant 0 : index
    %c384 = arith.constant 384 : index
    %43 = vector.load %arg5[%c0_26, %c384] : memref<128x2048xbf16, #tpu.memory_space<vmem>>, vector<128x128xbf16>
    %cst_27 = arith.constant dense<0.000000e+00> : vector<64x128xf32>
    %44 = tpu.matmul %42, %43, %cst_27 {dimension_numbers = #tpu.dot_dimension_numbers<[1], [0], [0], [1], [0, 0, 1, 1], [], []>} : vector<64x128xbf16>, vector<128x128xbf16>, vector<64x128xf32> -> vector<64x128xf32>
    %c0_28 = arith.constant 0 : index
    %c384_29 = arith.constant 384 : index
    %45 = vector.load %arg7[%c0_28, %c384_29] : memref<1x3328xf32, #tpu.memory_space<vmem>>, vector<1x128xf32>
    %46 = vector.broadcast %45 : vector<1x128xf32> to vector<64x128xf32>
    %47 = arith.addf %44, %46 : vector<64x128xf32>
    %48 = arith.addf %5, %47 : vector<64x128xf32>
    %c0_30 = arith.constant 0 : index
    %c512 = arith.constant 512 : index
    %49 = vector.load %arg7[%c0_30, %c512] : memref<1x3328xf32, #tpu.memory_space<vmem>>, vector<1x128xf32>
    %50 = vector.broadcast %49 : vector<1x128xf32> to vector<64x128xf32>
    %51 = arith.mulf %48, %50 : vector<64x128xf32>
    %c0_31 = arith.constant 0 : index
    %c640 = arith.constant 640 : index
    %52 = vector.load %arg7[%c0_31, %c640] : memref<1x3328xf32, #tpu.memory_space<vmem>>, vector<1x128xf32>
    %53 = vector.broadcast %52 : vector<1x128xf32> to vector<64x128xf32>
    %54 = arith.addf %51, %53 : vector<64x128xf32>
    %c0_32 = arith.constant 0 : index
    %c512_33 = arith.constant 512 : index
    %55 = vector.load %arg5[%c0_32, %c512_33] : memref<128x2048xbf16, #tpu.memory_space<vmem>>, vector<128x512xbf16>
    %c0_34 = arith.constant 0 : index
    %c768 = arith.constant 768 : index
    %56 = vector.load %arg7[%c0_34, %c768] : memref<1x3328xf32, #tpu.memory_space<vmem>>, vector<1x512xf32>
    %c0_35 = arith.constant 0 : index
    %c0_36 = arith.constant 0 : index
    %57 = vector.load %arg6[%c0_35, %c0_36] : memref<512x256xbf16, #tpu.memory_space<vmem>>, vector<512x128xbf16>
    %c0_37 = arith.constant 0 : index
    %c1280 = arith.constant 1280 : index
    %58 = vector.load %arg7[%c0_37, %c1280] : memref<1x3328xf32, #tpu.memory_space<vmem>>, vector<1x128xf32>
    %59 = arith.truncf %54 : vector<64x128xf32> to vector<64x128xbf16>
    %cst_38 = arith.constant dense<0.000000e+00> : vector<64x512xf32>
    %60 = tpu.matmul %59, %55, %cst_38 {dimension_numbers = #tpu.dot_dimension_numbers<[1], [0], [0], [1], [0, 0, 1, 1], [], []>} : vector<64x128xbf16>, vector<128x512xbf16>, vector<64x512xf32> -> vector<64x512xf32>
    %61 = vector.broadcast %56 : vector<1x512xf32> to vector<64x512xf32>
    %62 = arith.addf %60, %61 : vector<64x512xf32>
    %cst_39 = arith.constant 0.000000e+00 : f32
    %63 = vector.broadcast %cst_39 : f32 to vector<64x512xf32>
    %64 = arith.maximumf %62, %63 : vector<64x512xf32>
    %65 = arith.truncf %64 : vector<64x512xf32> to vector<64x512xbf16>
    %cst_40 = arith.constant dense<0.000000e+00> : vector<64x128xf32>
    %66 = tpu.matmul %65, %57, %cst_40 {dimension_numbers = #tpu.dot_dimension_numbers<[1], [0], [0], [1], [0, 0, 1, 1], [], []>} : vector<64x512xbf16>, vector<512x128xbf16>, vector<64x128xf32> -> vector<64x128xf32>
    %67 = vector.broadcast %58 : vector<1x128xf32> to vector<64x128xf32>
    %68 = arith.addf %66, %67 : vector<64x128xf32>
    %69 = arith.addf %54, %68 : vector<64x128xf32>
    %c0_41 = arith.constant 0 : index
    %c1408 = arith.constant 1408 : index
    %70 = vector.load %arg7[%c0_41, %c1408] : memref<1x3328xf32, #tpu.memory_space<vmem>>, vector<1x128xf32>
    %71 = vector.broadcast %70 : vector<1x128xf32> to vector<64x128xf32>
    %72 = arith.mulf %69, %71 : vector<64x128xf32>
    %c0_42 = arith.constant 0 : index
    %c1536 = arith.constant 1536 : index
    %73 = vector.load %arg7[%c0_42, %c1536] : memref<1x3328xf32, #tpu.memory_space<vmem>>, vector<1x128xf32>
    %74 = vector.broadcast %73 : vector<1x128xf32> to vector<64x128xf32>
    %75 = arith.addf %72, %74 : vector<64x128xf32>
    %c0_43 = arith.constant 0 : index
    %c0_44 = arith.constant 0 : index
    %c0_45 = arith.constant 0 : index
    %76 = vector.load %arg4[%c0_43, %c0_44, %c0_45] : memref<1x64x128xf32, #tpu.memory_space<vmem>>, vector<1x64x128xf32>
    %77 = vector.shape_cast %76 : vector<1x64x128xf32> to vector<64x128xf32>
    %78 = arith.addf %75, %77 : vector<64x128xf32>
    %79 = arith.truncf %7 : vector<8x128xf32> to vector<8x128xbf16>
    %c0_46 = arith.constant 0 : index
    %c1024 = arith.constant 1024 : index
    %80 = vector.load %arg5[%c0_46, %c1024] : memref<128x2048xbf16, #tpu.memory_space<vmem>>, vector<128x128xbf16>
    %cst_47 = arith.constant dense<0.000000e+00> : vector<8x128xf32>
    %81 = tpu.matmul %79, %80, %cst_47 {dimension_numbers = #tpu.dot_dimension_numbers<[1], [0], [0], [1], [0, 0, 1, 1], [], []>} : vector<8x128xbf16>, vector<128x128xbf16>, vector<8x128xf32> -> vector<8x128xf32>
    %c0_48 = arith.constant 0 : index
    %c1664 = arith.constant 1664 : index
    %82 = vector.load %arg7[%c0_48, %c1664] : memref<1x3328xf32, #tpu.memory_space<vmem>>, vector<1x128xf32>
    %83 = vector.broadcast %82 : vector<1x128xf32> to vector<8x128xf32>
    %84 = arith.addf %81, %83 : vector<8x128xf32>
    %85 = arith.truncf %78 : vector<64x128xf32> to vector<64x128xbf16>
    %c0_49 = arith.constant 0 : index
    %c1152 = arith.constant 1152 : index
    %86 = vector.load %arg5[%c0_49, %c1152] : memref<128x2048xbf16, #tpu.memory_space<vmem>>, vector<128x256xbf16>
    %cst_50 = arith.constant dense<0.000000e+00> : vector<64x256xf32>
    %87 = tpu.matmul %85, %86, %cst_50 {dimension_numbers = #tpu.dot_dimension_numbers<[1], [0], [0], [1], [0, 0, 1, 1], [], []>} : vector<64x128xbf16>, vector<128x256xbf16>, vector<64x256xf32> -> vector<64x256xf32>
    %c0_51 = arith.constant 0 : index
    %c1792 = arith.constant 1792 : index
    %88 = vector.load %arg7[%c0_51, %c1792] : memref<1x3328xf32, #tpu.memory_space<vmem>>, vector<1x256xf32>
    %89 = vector.broadcast %88 : vector<1x256xf32> to vector<64x256xf32>
    %90 = arith.addf %87, %89 : vector<64x256xf32>
    %91 = vector.extract_strided_slice %90 {offsets = [0, 0], sizes = [64, 128], strides = [1, 1]} : vector<64x256xf32> to vector<64x128xf32>
    %92 = vector.extract_strided_slice %90 {offsets = [0, 128], sizes = [64, 128], strides = [1, 1]} : vector<64x256xf32> to vector<64x128xf32>
    %93 = tpu.concatenate %91, %91, %91, %91 in 0 : vector<64x128xf32>, vector<64x128xf32>, vector<64x128xf32>, vector<64x128xf32> -> vector<256x128xf32>
    %94 = arith.mulf %93, %2 : vector<256x128xf32>
    %95 = arith.truncf %94 : vector<256x128xf32> to vector<256x128xbf16>
    %96 = tpu.concatenate %92, %92, %92, %92 in 0 : vector<64x128xf32>, vector<64x128xf32>, vector<64x128xf32>, vector<64x128xf32> -> vector<256x128xf32>
    %97 = arith.mulf %96, %2 : vector<256x128xf32>
    %98 = arith.truncf %97 : vector<256x128xf32> to vector<256x128xbf16>
    %99 = arith.truncf %84 : vector<8x128xf32> to vector<8x128xbf16>
    %cst_52 = arith.constant dense<0.000000e+00> : vector<8x256xf32>
    %100 = tpu.matmul %99, %95, %cst_52 {dimension_numbers = #tpu.dot_dimension_numbers<[1], [1], [0], [0], [0, 0, 1, 0], [], []>} : vector<8x128xbf16>, vector<256x128xbf16>, vector<8x256xf32> -> vector<8x256xf32>
    %cst_53 = arith.constant dense<0xFF800000> : vector<8xf32>
    %101 = vector.multi_reduction <maximumf>, %100, %cst_53 [1] : vector<8x256xf32> to vector<8xf32>
    %102 = vector.shape_cast %101 : vector<8xf32> to vector<8x1xf32>
    %103 = vector.broadcast %102 : vector<8x1xf32> to vector<8x256xf32>
    %104 = arith.subf %100, %103 : vector<8x256xf32>
    %105 = math.exp %104 : vector<8x256xf32>
    %cst_54 = arith.constant dense<0.000000e+00> : vector<8x256xf32>
    %106 = tpu.matmul %105, %3, %cst_54 {dimension_numbers = #tpu.dot_dimension_numbers<[1], [0], [0], [1], [0, 0, 1, 1], [], []>} : vector<8x256xf32>, vector<256x256xf32>, vector<8x256xf32> -> vector<8x256xf32>
    %cst_55 = arith.constant 9.99999968E-21 : f32
    %107 = vector.broadcast %cst_55 : f32 to vector<8x256xf32>
    %108 = arith.maximumf %106, %107 : vector<8x256xf32>
    %109 = tpu.reciprocal %108 {approx = true} : vector<8x256xf32> -> vector<8x256xf32>
    %110 = arith.mulf %105, %109 : vector<8x256xf32>
    %111 = arith.truncf %110 : vector<8x256xf32> to vector<8x256xbf16>
    %cst_56 = arith.constant dense<0.000000e+00> : vector<8x128xf32>
    %112 = tpu.matmul %111, %98, %cst_56 {dimension_numbers = #tpu.dot_dimension_numbers<[1], [0], [0], [1], [0, 0, 1, 1], [], []>} : vector<8x256xbf16>, vector<256x128xbf16>, vector<8x128xf32> -> vector<8x128xf32>
    %113 = arith.truncf %112 : vector<8x128xf32> to vector<8x128xbf16>
    %c0_57 = arith.constant 0 : index
    %c1408_58 = arith.constant 1408 : index
    %114 = vector.load %arg5[%c0_57, %c1408_58] : memref<128x2048xbf16, #tpu.memory_space<vmem>>, vector<128x128xbf16>
    %cst_59 = arith.constant dense<0.000000e+00> : vector<8x128xf32>
    %115 = tpu.matmul %113, %114, %cst_59 {dimension_numbers = #tpu.dot_dimension_numbers<[1], [0], [0], [1], [0, 0, 1, 1], [], []>} : vector<8x128xbf16>, vector<128x128xbf16>, vector<8x128xf32> -> vector<8x128xf32>
    %c0_60 = arith.constant 0 : index
    %c2048 = arith.constant 2048 : index
    %116 = vector.load %arg7[%c0_60, %c2048] : memref<1x3328xf32, #tpu.memory_space<vmem>>, vector<1x128xf32>
    %117 = vector.broadcast %116 : vector<1x128xf32> to vector<8x128xf32>
    %118 = arith.addf %115, %117 : vector<8x128xf32>
    %119 = arith.addf %7, %118 : vector<8x128xf32>
    %c0_61 = arith.constant 0 : index
    %c2176 = arith.constant 2176 : index
    %120 = vector.load %arg7[%c0_61, %c2176] : memref<1x3328xf32, #tpu.memory_space<vmem>>, vector<1x128xf32>
    %c0_62 = arith.constant 0 : index
    %c2304 = arith.constant 2304 : index
    %121 = vector.load %arg7[%c0_62, %c2304] : memref<1x3328xf32, #tpu.memory_space<vmem>>, vector<1x128xf32>
    %cst_63 = arith.constant dense<0.000000e+00> : vector<8xf32>
    %122 = vector.multi_reduction <add>, %119, %cst_63 [1] : vector<8x128xf32> to vector<8xf32>
    %123 = vector.shape_cast %122 : vector<8xf32> to vector<8x1xf32>
    %cst_64 = arith.constant 1.280000e+02 : f32
    %124 = vector.broadcast %cst_64 : f32 to vector<8x1xf32>
    %125 = arith.divf %123, %124 : vector<8x1xf32>
    %126 = vector.broadcast %125 : vector<8x1xf32> to vector<8x128xf32>
    %127 = arith.subf %119, %126 : vector<8x128xf32>
    %128 = arith.mulf %127, %127 : vector<8x128xf32>
    %cst_65 = arith.constant dense<0.000000e+00> : vector<8xf32>
    %129 = vector.multi_reduction <add>, %128, %cst_65 [1] : vector<8x128xf32> to vector<8xf32>
    %130 = vector.shape_cast %129 : vector<8xf32> to vector<8x1xf32>
    %cst_66 = arith.constant 1.280000e+02 : f32
    %131 = vector.broadcast %cst_66 : f32 to vector<8x1xf32>
    %132 = arith.divf %130, %131 : vector<8x1xf32>
    %cst_67 = arith.constant 9.99999974E-6 : f32
    %133 = vector.broadcast %cst_67 : f32 to vector<8x1xf32>
    %134 = arith.addf %132, %133 : vector<8x1xf32>
    %135 = math.rsqrt %134 : vector<8x1xf32>
    %136 = vector.broadcast %135 : vector<8x1xf32> to vector<8x128xf32>
    %137 = arith.mulf %127, %136 : vector<8x128xf32>
    %138 = vector.broadcast %120 : vector<1x128xf32> to vector<8x128xf32>
    %139 = arith.mulf %137, %138 : vector<8x128xf32>
    %140 = vector.broadcast %121 : vector<1x128xf32> to vector<8x128xf32>
    %141 = arith.addf %139, %140 : vector<8x128xf32>
    %c0_68 = arith.constant 0 : index
    %c1536_69 = arith.constant 1536 : index
    %142 = vector.load %arg5[%c0_68, %c1536_69] : memref<128x2048xbf16, #tpu.memory_space<vmem>>, vector<128x512xbf16>
    %c0_70 = arith.constant 0 : index
    %c2432 = arith.constant 2432 : index
    %143 = vector.load %arg7[%c0_70, %c2432] : memref<1x3328xf32, #tpu.memory_space<vmem>>, vector<1x512xf32>
    %c0_71 = arith.constant 0 : index
    %c128_72 = arith.constant 128 : index
    %144 = vector.load %arg6[%c0_71, %c128_72] : memref<512x256xbf16, #tpu.memory_space<vmem>>, vector<512x128xbf16>
    %c0_73 = arith.constant 0 : index
    %c2944 = arith.constant 2944 : index
    %145 = vector.load %arg7[%c0_73, %c2944] : memref<1x3328xf32, #tpu.memory_space<vmem>>, vector<1x128xf32>
    %146 = arith.truncf %141 : vector<8x128xf32> to vector<8x128xbf16>
    %cst_74 = arith.constant dense<0.000000e+00> : vector<8x512xf32>
    %147 = tpu.matmul %146, %142, %cst_74 {dimension_numbers = #tpu.dot_dimension_numbers<[1], [0], [0], [1], [0, 0, 1, 1], [], []>} : vector<8x128xbf16>, vector<128x512xbf16>, vector<8x512xf32> -> vector<8x512xf32>
    %148 = vector.broadcast %143 : vector<1x512xf32> to vector<8x512xf32>
    %149 = arith.addf %147, %148 : vector<8x512xf32>
    %cst_75 = arith.constant 0.000000e+00 : f32
    %150 = vector.broadcast %cst_75 : f32 to vector<8x512xf32>
    %151 = arith.maximumf %149, %150 : vector<8x512xf32>
    %152 = arith.truncf %151 : vector<8x512xf32> to vector<8x512xbf16>
    %cst_76 = arith.constant dense<0.000000e+00> : vector<8x128xf32>
    %153 = tpu.matmul %152, %144, %cst_76 {dimension_numbers = #tpu.dot_dimension_numbers<[1], [0], [0], [1], [0, 0, 1, 1], [], []>} : vector<8x512xbf16>, vector<512x128xbf16>, vector<8x128xf32> -> vector<8x128xf32>
    %154 = vector.broadcast %145 : vector<1x128xf32> to vector<8x128xf32>
    %155 = arith.addf %153, %154 : vector<8x128xf32>
    %156 = arith.addf %141, %155 : vector<8x128xf32>
    %c0_77 = arith.constant 0 : index
    %c3072 = arith.constant 3072 : index
    %157 = vector.load %arg7[%c0_77, %c3072] : memref<1x3328xf32, #tpu.memory_space<vmem>>, vector<1x128xf32>
    %c0_78 = arith.constant 0 : index
    %c3200 = arith.constant 3200 : index
    %158 = vector.load %arg7[%c0_78, %c3200] : memref<1x3328xf32, #tpu.memory_space<vmem>>, vector<1x128xf32>
    %cst_79 = arith.constant dense<0.000000e+00> : vector<8xf32>
    %159 = vector.multi_reduction <add>, %156, %cst_79 [1] : vector<8x128xf32> to vector<8xf32>
    %160 = vector.shape_cast %159 : vector<8xf32> to vector<8x1xf32>
    %cst_80 = arith.constant 1.280000e+02 : f32
    %161 = vector.broadcast %cst_80 : f32 to vector<8x1xf32>
    %162 = arith.divf %160, %161 : vector<8x1xf32>
    %163 = vector.broadcast %162 : vector<8x1xf32> to vector<8x128xf32>
    %164 = arith.subf %156, %163 : vector<8x128xf32>
    %165 = arith.mulf %164, %164 : vector<8x128xf32>
    %cst_81 = arith.constant dense<0.000000e+00> : vector<8xf32>
    %166 = vector.multi_reduction <add>, %165, %cst_81 [1] : vector<8x128xf32> to vector<8xf32>
    %167 = vector.shape_cast %166 : vector<8xf32> to vector<8x1xf32>
    %cst_82 = arith.constant 1.280000e+02 : f32
    %168 = vector.broadcast %cst_82 : f32 to vector<8x1xf32>
    %169 = arith.divf %167, %168 : vector<8x1xf32>
    %cst_83 = arith.constant 9.99999974E-6 : f32
    %170 = vector.broadcast %cst_83 : f32 to vector<8x1xf32>
    %171 = arith.addf %169, %170 : vector<8x1xf32>
    %172 = math.rsqrt %171 : vector<8x1xf32>
    %173 = vector.broadcast %172 : vector<8x1xf32> to vector<8x128xf32>
    %174 = arith.mulf %164, %173 : vector<8x128xf32>
    %175 = vector.broadcast %157 : vector<1x128xf32> to vector<8x128xf32>
    %176 = arith.mulf %174, %175 : vector<8x128xf32>
    %177 = vector.broadcast %158 : vector<1x128xf32> to vector<8x128xf32>
    %178 = arith.addf %176, %177 : vector<8x128xf32>
    %c0_84 = arith.constant 0 : index
    %c0_85 = arith.constant 0 : index
    %c0_86 = arith.constant 0 : index
    %179 = vector.load %arg3[%c0_84, %c0_85, %c0_86] : memref<1x8x128xf32, #tpu.memory_space<vmem>>, vector<1x8x128xf32>
    %180 = vector.shape_cast %179 : vector<1x8x128xf32> to vector<8x128xf32>
    %181 = arith.addf %178, %180 : vector<8x128xf32>
    %182 = vector.shape_cast %78 : vector<64x128xf32> to vector<1x64x128xf32>
    %c0_87 = arith.constant 0 : index
    %c0_88 = arith.constant 0 : index
    %c0_89 = arith.constant 0 : index
    %183 = vector.load %arg10[%c0_87, %c0_88, %c0_89] : memref<1x64x128xf32, #tpu.memory_space<vmem>>, vector<1x64x128xf32>
    tpu.vector_store %arg10[%c0_87, %c0_88, %c0_89], %182 {strides = array<i32>} : memref<1x64x128xf32, #tpu.memory_space<vmem>>, vector<1x64x128xf32>,
    %184 = vector.shape_cast %181 : vector<8x128xf32> to vector<1x8x128xf32>
    %c0_90 = arith.constant 0 : index
    %c0_91 = arith.constant 0 : index
    %c0_92 = arith.constant 0 : index
    %185 = vector.load %arg11[%c0_90, %c0_91, %c0_92] : memref<1x8x128xf32, #tpu.memory_space<vmem>>, vector<1x8x128xf32>
    tpu.vector_store %arg11[%c0_90, %c0_91, %c0_92], %184 {strides = array<i32>} : memref<1x8x128xf32, #tpu.memory_space<vmem>>, vector<1x8x128xf32>,
    return
  }
  func.func @transform_0(%arg0: i32) -> (i32, i32, i32) {
    %c0_i32 = arith.constant 0 : i32
    %c0_i32_0 = arith.constant 0 : i32
    %c0_i32_1 = arith.constant 0 : i32
    return %arg0, %c0_i32, %c0_i32_0 : i32, i32, i32
  }
  func.func @transform_1(%arg0: i32) -> (i32, i32, i32) {
    %c0_i32 = arith.constant 0 : i32
    %c0_i32_0 = arith.constant 0 : i32
    %c0_i32_1 = arith.constant 0 : i32
    return %arg0, %c0_i32, %c0_i32_0 : i32, i32, i32
  }
  func.func @transform_2(%arg0: i32) -> (i32, i32, i32) {
    %c0_i32 = arith.constant 0 : i32
    %c0_i32_0 = arith.constant 0 : i32
    %c0_i32_1 = arith.constant 0 : i32
    return %arg0, %c0_i32, %c0_i32_0 : i32, i32, i32
  }
  func.func @transform_3(%arg0: i32) -> (i32, i32, i32) {
    %c0_i32 = arith.constant 0 : i32
    %c0_i32_0 = arith.constant 0 : i32
    %c0_i32_1 = arith.constant 0 : i32
    return %arg0, %c0_i32, %c0_i32_0 : i32, i32, i32
  }
  func.func @transform_4(%arg0: i32) -> (i32, i32) {
    %c0_i32 = arith.constant 0 : i32
    %c0_i32_0 = arith.constant 0 : i32
    %c0_i32_1 = arith.constant 0 : i32
    return %c0_i32, %c0_i32_0 : i32, i32
  }
  func.func @transform_5(%arg0: i32) -> (i32, i32) {
    %c0_i32 = arith.constant 0 : i32
    %c0_i32_0 = arith.constant 0 : i32
    %c0_i32_1 = arith.constant 0 : i32
    return %c0_i32, %c0_i32_0 : i32, i32
  }
  func.func @transform_6(%arg0: i32) -> (i32, i32) {
    %c0_i32 = arith.constant 0 : i32
    %c0_i32_0 = arith.constant 0 : i32
    %c0_i32_1 = arith.constant 0 : i32
    return %c0_i32, %c0_i32_0 : i32, i32
  }
  func.func @transform_7(%arg0: i32) -> (i32, i32) {
    %c0_i32 = arith.constant 0 : i32
    %c0_i32_0 = arith.constant 0 : i32
    %c0_i32_1 = arith.constant 0 : i32
    return %c0_i32, %c0_i32_0 : i32, i32
  }
  func.func @transform_8(%arg0: i32) -> (i32, i32) {
    %c0_i32 = arith.constant 0 : i32
    %c0_i32_0 = arith.constant 0 : i32
    %c0_i32_1 = arith.constant 0 : i32
    return %c0_i32, %c0_i32_0 : i32, i32
  }
  func.func @transform_9(%arg0: i32) -> (i32, i32, i32) {
    %c0_i32 = arith.constant 0 : i32
    %c0_i32_0 = arith.constant 0 : i32
    %c0_i32_1 = arith.constant 0 : i32
    return %arg0, %c0_i32, %c0_i32_0 : i32, i32, i32
  }
  func.func @transform_10(%arg0: i32) -> (i32, i32, i32) {
    %c0_i32 = arith.constant 0 : i32
    %c0_i32_0 = arith.constant 0 : i32
    %c0_i32_1 = arith.constant 0 : i32
    return %arg0, %c0_i32, %c0_i32_0 : i32, i32, i32
  }
}

</mosaic_0001>

<bundles_post_ra>
// kernel: custom-call
= control target key start
LH: loop header
LB: loop body
LE: loop exit
PB: predicated region body
PF: predicated region fallthrough
CT: control target
= control target key end

     0   :  { %s6_s0 = inlined_call_operand.vmem [shape: f32[3328], index: 0, kind: output, shape index: {}]  }

// kernel: cross_attention_block_batch.1
= control target key start
LH: loop header
LB: loop body
LE: loop exit
PB: predicated region body
PF: predicated region fallthrough
CT: control target
= control target key end

     0   :  { %s6705_s0 = inlined_call_operand.vmem [shape: f32[2,64,128], index: 0, kind: input, shape index: {}]   ;;  %s6706_s1 = inlined_call_operand.vmem [shape: f32[2,8,128], index: 1, kind: input, shape index: {}]   ;;  %s6707_s2 = inlined_call_operand.vmem [shape: f32[2,8,128], index: 2, kind: input, shape index: {}]   ;;  %s6708_s3 = inlined_call_operand.vmem [shape: f32[2,64,128], index: 3, kind: input, shape index: {}]   ;;  %s6709_s4 = inlined_call_operand.vmem [shape: bf16[128,2048], index: 4, kind: input, shape index: {}]   ;;  %s6710_s5 = inlined_call_operand.vmem [shape: bf16[512,256], index: 5, kind: input, shape index: {}]   ;;  %s6711_s6 = inlined_call_operand.vmem [shape: f32[1,3328], index: 6, kind: input, shape index: {}]   ;;  %s6712_s7 = inlined_call_operand.vmem [shape: f32[32,160], index: 7, kind: input, shape index: {}]   ;;  %s6713_s8 = inlined_call_operand.vmem [shape: f32[256,384], index: 8, kind: input, shape index: {}]   ;;  %s6714_s9 = inlined_call_operand.hbm [shape: f32[2,64,128], index: 9, kind: output, shape index: {0}]   ;;  %s6715_s10 = inlined_call_operand.hbm [shape: f32[2,8,128], index: 10, kind: output, shape index: {1}]  }
   0x1   :  { %6720 = sst [smem:[#allocation11_spill]] %s6705_s0 }
   0x2   :  { %6721 = sst [smem:[#allocation12_spill]] %s6706_s1 }
   0x3   :  { %16 = vsyncpa [#allocation3], 0 }
   0x4   :  { %18 = vsyncpa [#allocation3 + $0x1], 0 }
   0x5   :  { %19 = vsyncpa [#allocation5], 0 }
   0x6   :  { %21 = vsyncpa [#allocation5 + $0x1], 0  ;;  %s4574_s13 = smov 0   ;;  %s4576_s14 = smov 0  }
   0x7   :  { %s4578_s15 = smov 0   ;;  %s4580_s16 = smov 0  }
   0x8 LB: > { %6722 = sst [smem:[#allocation8_spill]] %s4510_s15  ;;  %s4595_s17 = sadd.s32 4294967295, %s4514_s16   ;;  %s4514_s16 = sphi %s4580_s16, %s6732_s16   ;;  %s4510_s15 = sphi %s4578_s15, %s6734_s15   ;;  %s4506_s14 = sphi %s4576_s14, %s6736_s14   ;;  %s4502_s13 = sphi %s4574_s13, %s6735_s13  }
   0x9   : > { %s3316_s18 = sadd.s32 4294967294, %s4514_s16   ;;  %s4599_s19 = sadd.s32 1, %s4514_s16  }
   0xa   : > { %6723 = sst [smem:[#allocation9_spill]] %s4599_s19  ;;  %s243_s20 = sadd.s32 1, %s4510_s15 }
   0xb   : > { %s240_s21 = ssub.s32 %s4514_s16, %s4599_s19  ;;  %p253_p0 = scmp.ne.s32.totalorder %s4510_s15, %s4506_s14 }
   0xc   : > { %p241_p1 = scmp.eq.s32.totalorder %s240_s21, 0  ;;  %p254_p2 = scmp.eq.s32.totalorder %s4595_s17, 1 }
   0xd   : > { %p259_p3 = scmp.ne.s32.totalorder %s4506_s14, %s4502_s13  ;;  %p260_p4 = scmp.eq.s32.totalorder %s3316_s18, 1 }
   0xe   : > { %s4610_s22 = scalar_select %p241_p1, %s4510_s15, %s243_s20  }
   0xf   : > { %p4612_p5 = por %p254_p2, %p253_p0  ;;  %p4616_p6 = por %p260_p4, %p259_p3 }
  0x10   : > { %6724 = sst [smem:[#allocation10_spill]] %s4610_s22  ;;  %p3319_p7 = scmp.ge.s32.totalorder %s4514_s16, 1 }
  0x11   : > { %p349_p8 = scmp.lt.s32.totalorder %s4514_s16, 3 }
  0x13   : > { %p350_p9 = pnand %p3319_p7, %p349_p8 }
  0x14   : > { %p405_p10 = scmp.lt.s32.totalorder (!%p350_p9), %s4595_s17, 1  ;;  %s6727_s1 = sld [smem:[#allocation12_spill]] (!%p350_p9) }
  0x15   : > { %353 = sbr.rel (%p350_p9) target bundleno = 2955 (0xb8b), region = 56  ;;  %s6729_s0 = sld [smem:[#allocation11_spill]] (!%p350_p9) }
  0x16   : > { %s5586_s20 = sand.u32 (!%p350_p9), 1, %s4506_s14  }
  0x17   : > { %s3320_s30 = sshll.u32 (!%p350_p9), %s5586_s20, 6 }
  0x1a   : > { %v3418_v0 = vld [vmem:[%s6709_s4 + $0x384] sm:$0xf]  ;;  %v3358_v2 = vld [vmem:[%s6709_s4 + $0x380] sm:$0xf]  ;;  %s4696_s27 = scalar_select %p405_p10, %s4595_s17, 1  ;;  %vm812_vm0 = vcmask 261120  }
  0x1b   : > { %v4140_v1 = vld [vmem:[%s6709_s4 + $0x3c0] sm:$0xf0]  ;;  %v4124_v4 = vld [vmem:[%s6709_s4 + $0x3bc] sm:$0xf0] }
  0x1c   : > { %v3419_v3 = vor.u32 %v4140_v1, %v3418_v0  ;;  %v3410_v5 = vld [vmem:[%s6709_s4 + $0x304] sm:$0xf]  ;;  %v3359_v7 = vor.u32 %v4124_v4, %v3358_v2  ;;  %v3354_v8 = vld [vmem:[%s6709_s4 + $0x300] sm:$0xf]  ;;  %s6719_s21 = sshll.u32 %s4696_s27, 3  ;;  %s6728_s26 = sshll.u32 %s4696_s27, 6 }
  0x1d   : > { %v4138_v6 = vld [vmem:[%s6709_s4 + $0x340] sm:$0xf0]  ;;  %v4123_v9 = vld [vmem:[%s6709_s4 + $0x33c] sm:$0xf0]  ;;  %s4723_s12 = scalar_lea.vmem %s6727_s1, %s6719_s21  ;;  %s4736_s29 = scalar_lea.vmem %s6729_s0, %s6728_s26  ;;  %v4782_v2 = vld [vmem:[%s6712_s7 + $0x30] sm:$0xff] }
  0x1e   : > { %741 = vmatpush.bf16.msra.mxu1 %v3419_v3  ;;  %v3411_v10 = vor.u32 %v4138_v6, %v3410_v5  ;;  %609 = vmatpush.bf16.msra.mxu0 %v3359_v7  ;;  %v3355_v11 = vor.u32 %v4123_v9, %v3354_v8  ;;  %v3402_v12 = vld [vmem:[%s6709_s4 + $0x284] sm:$0xf]  ;;  %v3350_v14 = vld [vmem:[%s6709_s4 + $0x280] sm:$0xf]  ;;  %v4743_v50 = vld [vmem:[%s4736_s29 + $0x8] sm:$0xff]  ;;  %s6730_s26 = sshll.u32 %s4696_s27, 6 }
  0x1f   : > { %v4136_v13 = vld [vmem:[%s6709_s4 + $0x2c0] sm:$0xf0]  ;;  %v4122_v15 = vld [vmem:[%s6709_s4 + $0x2bc] sm:$0xf0]  ;;  %v4751_v53 = vld [vmem:[%s4736_s29 + $0x10] sm:$0xff]  ;;  %s5593_s19 = scalar_lea.vmem %s6708_s3, %s6730_s26  ;;  %s4309_s21 = sshll.u32 %s4595_s17, 6 }
  0x20   : > { %v3403_v16 = vor.u32 %v4136_v13, %v3402_v12  ;;  %v3351_v17 = vor.u32 %v4122_v15, %v3350_v14  ;;  %v3394_v18 = vld [vmem:[%s6709_s4 + $0x204] sm:$0xf]  ;;  %v3346_v20 = vld [vmem:[%s6709_s4 + $0x200] sm:$0xf]  ;;  %v4754_v54 = vld [vmem:[%s4736_s29 + $0x18] sm:$0xff]  ;;  %s3151_s26 = scalar_lea.sflag [#allocation3], %s5586_s20 }
  0x21   : > { %v4134_v19 = vld [vmem:[%s6709_s4 + $0x240] sm:$0xf0]  ;;  %v4121_v21 = vld [vmem:[%s6709_s4 + $0x23c] sm:$0xf0]  ;;  %v538_v55 = vpack.c.bf16 %v4754_v54, %v4751_v53  ;;  %v4762_v57 = vld [vmem:[%s4736_s29 + $0x28] sm:$0xff] }
  0x22   : > { %742 = vmatpush.bf16.msra.mxu1 %v3411_v10  ;;  %610 = vmatpush.bf16.msra.mxu0 %v3355_v11  ;;  %v3386_v22 = vld [vmem:[%s6709_s4 + $0x184] sm:$0xf]  ;;  %v3395_v24 = vor.u32 %v4134_v19, %v3394_v18  ;;  %v3342_v25 = vld [vmem:[%s6709_s4 + $0x180] sm:$0xf]  ;;  %v3347_v27 = vor.u32 %v4121_v21, %v3346_v20  ;;  %v534_v59 = vld [vmem:[%s4736_s29 + $0x30] sm:$0xff] }
  0x23   : > { %v4132_v23 = vld [vmem:[%s6709_s4 + $0x1c0] sm:$0xf0]  ;;  %v4120_v26 = vld [vmem:[%s6709_s4 + $0x1bc] sm:$0xf0]  ;;  %v535_v60 = vld [vmem:[%s4736_s29 + $0x38] sm:$0xff] }
  0x24   : > { %v3387_v28 = vor.u32 %v4132_v23, %v3386_v22  ;;  %v3343_v29 = vor.u32 %v4120_v26, %v3342_v25  ;;  %v3378_v30 = vld [vmem:[%s6709_s4 + $0x104] sm:$0xf]  ;;  %v3338_v32 = vld [vmem:[%s6709_s4 + $0x100] sm:$0xf]  ;;  %v540_v61 = vpack.c.bf16 %v535_v60, %v534_v59  ;;  %v4794_v9 = vld [vmem:[%s6712_s7 + $0x10] sm:$0xff] }
  0x25   : > { %v4130_v31 = vld [vmem:[%s6709_s4 + $0x140] sm:$0xf0]  ;;  %v4119_v33 = vld [vmem:[%s6709_s4 + $0x13c] sm:$0xf0] }
  0x26   : > { %743 = vmatpush.bf16.msra.mxu1 %v3403_v16  ;;  %611 = vmatpush.bf16.msra.mxu0 %v3351_v17  ;;  %v3379_v34 = vor.u32 %v4130_v31, %v3378_v30  ;;  %v3339_v35 = vor.u32 %v4119_v33, %v3338_v32  ;;  %v3370_v36 = vld [vmem:[%s6709_s4 + $0x84] sm:$0xf]  ;;  %v3334_v38 = vld [vmem:[%s6709_s4 + $0x80] sm:$0xf] }
  0x27   : > { %v4128_v37 = vld [vmem:[%s6709_s4 + $0xc0] sm:$0xf0]  ;;  %v4118_v39 = vld [vmem:[%s6709_s4 + $0xbc] sm:$0xf0] }
  0x28   : > { %v3371_v40 = vor.u32 %v4128_v37, %v3370_v36  ;;  %v3335_v41 = vor.u32 %v4118_v39, %v3334_v38  ;;  %v3362_v42 = vld [vmem:[%s6709_s4 + $0x4] sm:$0xf]  ;;  %v3330_v44 = vld [vmem:[%s6709_s4] sm:$0xf] }
  0x29   : > { %v4126_v43 = vld [vmem:[%s6709_s4 + $0x40] sm:$0xf0]  ;;  %v4117_v45 = vld [vmem:[%s6709_s4 + $0x3c] sm:$0xf0] }
  0x2a   : > { %744 = vmatpush.bf16.msra.mxu1 %v3395_v24  ;;  %612 = vmatpush.bf16.msra.mxu0 %v3347_v27  ;;  %v3363_v46 = vor.u32 %v4126_v43, %v3362_v42  ;;  %v536_v47 = vld [vmem:[%s4723_s12] sm:$0xff]  ;;  %v3331_v48 = vor.u32 %v4117_v45, %v3330_v44  ;;  %v4139_v42 = vld [vmem:[%s6709_s4 + $0x388] sm:$0xf] }
  0x2b   : > { %v4740_v49 = vld [vmem:[%s4736_s29] sm:$0xff]  ;;  %v4745_v51 = vpack.c.bf16 %v536_v47, %v536_v47  ;;  %v3420_v43 = vld [vmem:[%s6709_s4 + $0x3c4] sm:$0xf0] }
  0x2c   : > { %v537_v52 = vpack.c.bf16 %v4743_v50, %v4740_v49  ;;  %v4759_v56 = vld [vmem:[%s4736_s29 + $0x20] sm:$0xff]  ;;  %v4137_v44 = vld [vmem:[%s6709_s4 + $0x308] sm:$0xf]  ;;  %v3423_v45 = vor.u32 %v4139_v42, %v3420_v43 }
  0x2d   : > { %v539_v58 = vpack.c.bf16 %v4762_v57, %v4759_v56  ;;  %v4771_v62 = vld [vmem:[%s6711_s6 + $0x1] sm:$0x3]  ;;  %v4357_v14 = vld [vmem:[%s6711_s6] ss:$0 sm:$0xff] }
  0x2e   : > { %745 = vmatpush.bf16.msra.mxu1 %v3387_v28  ;;  %613 = vmatpush.bf16.msra.mxu0 %v3343_v29  ;;  %v657_v63 = vperm.slane %v4771_v62, 0  ;;  %v4777_v1 = vld [vmem:[%s6712_s7 + $0x20] sm:$0xff] }
  0x2f   : > { %v4789_v8 = vld [vmem:[%s6712_s7] sm:$0xff]  ;;  %754 = vmatpush.bf16.msra.mxu2 %v3423_v45 }
  0x32   : > { %746 = vmatpush.bf16.msra.mxu1 %v3379_v34  ;;  %614 = vmatpush.bf16.msra.mxu0 %v3339_v35 }
  0x36   : > { %747 = vmatpush.bf16.msra.mxu1 %v3371_v40  ;;  %615 = vmatpush.bf16.msra.mxu0 %v3335_v41 }
  0x3a   : > { %748 = vmatpush.bf16.msra.mxu1 %v3363_v46  ;;  %616 = vmatpush.bf16.msra.mxu0 %v3331_v48  ;;  %v3412_v46 = vld [vmem:[%s6709_s4 + $0x344] sm:$0xf0] }
  0x3b   : > { %v3415_v47 = vor.u32 %v4137_v44, %v3412_v46  ;;  %v4135_v48 = vld [vmem:[%s6709_s4 + $0x288] sm:$0xf] }
  0x3d   : > { %749 = vmatmul.bf16.vlgmr.msra.gmra.mxu1 %v4745_v51  ;;  %617 = vmatmul.bf16.vlgmr.msra.gmra.mxu0 %v537_v52  ;;  %v3404_v52 = vld [vmem:[%s6709_s4 + $0x2c4] sm:$0xf0] }
  0x3e   : > { %755 = vmatpush.bf16.msra.mxu2 %v3415_v47  ;;  %v3407_v60 = vor.u32 %v4135_v48, %v3404_v52 }
  0x42   : > { %756 = vmatpush.bf16.msra.mxu2 %v3407_v60 }
  0x4d   : > { %622 = vmatmul.bf16.gmra.mxu0 %v538_v55  ;;  %v431_v55 = vld [vmem:[%s6712_s7 + $0x38] sm:$0xff] }
  0x4e   : > { %897 = vmatpush.msrb.mxu1 %v431_v55 }
  0x5d   : > { %627 = vmatmul.bf16.gmra.mxu0 %v539_v58 }
  0x6d   : > { %632 = vmatmul.bf16.gmra.mxu0 %v540_v61  ;;  %v4133_v61 = vld [vmem:[%s6709_s4 + $0x208] sm:$0xf] }
  0xba   : > { %v750_v0 = vpop.f32.mrf.mxu1  ;;  %v618_v4 = vpop.f32.mrf.mxu0 }
  0xbb   : > { %v751_v3 = vadd.f32 %v750_v0, %v657_v63  ;;  %v619_v16 = vadd.f32 %v4357_v14, %v618_v4  ;;  %v3396_v63 = vld [vmem:[%s6709_s4 + $0x244] sm:$0xf0] }
  0xbc   : > { %v3399_v0 = vor.u32 %v4133_v61, %v3396_v63  ;;  %v3388_v4 = vld [vmem:[%s6709_s4 + $0x1c4] sm:$0xf0] }
  0xbd   : > { %v769_v5 = vmul.f32 %v751_v3, %v4777_v1  ;;  %v770_v6 = vmul.f32 %v751_v3, %v4782_v2  ;;  %v767_v12 = vmul.f32 %v751_v3, %v4789_v8  ;;  %v768_v13 = vmul.f32 %v751_v3, %v4794_v9  ;;  %v4131_v3 = vld [vmem:[%s6709_s4 + $0x188] sm:$0xf] }
  0xbe   : > { %757 = vmatpush.bf16.msra.mxu2 %v3399_v0 }
  0xbf   : > { %v772_v7 = vpack.c.bf16 %v770_v6, %v769_v5  ;;  %v771_v15 = vpack.c.bf16 %v768_v13, %v767_v12  ;;  %v4127_v13 = vld [vmem:[%s6709_s4 + $0x88] sm:$0xf] }
  0xc1   : > { %789 = vmatpush.bf16.xpose.msra.mxu3 %v772_v7  ;;  %v3391_v7 = vor.u32 %v4131_v3, %v3388_v4 }
  0xc2   : > { %v752_v10 = vpop.f32.mrf.mxu1  ;;  %v620_v11 = vpop.f32.mrf.mxu0 }
  0xc3   : > { %v621_v17 = vadd.f32 %v4357_v14, %v620_v11  ;;  %v4129_v10 = vld [vmem:[%s6709_s4 + $0x108] sm:$0xf]  ;;  %758 = vmatpush.bf16.msra.mxu2 %v3391_v7 }
  0xc4   : > { %v3380_v11 = vld [vmem:[%s6709_s4 + $0x144] sm:$0xf0] }
  0xc5   : > { %v779_v19 = vpack.c.bf16 %v621_v17, %v619_v16  ;;  %v3383_v12 = vor.u32 %v4129_v10, %v3380_v11 }
  0xc7   : > { %759 = vmatpush.bf16.msra.mxu2 %v3383_v12 }
  0xc9   : > { %790 = vmatpush.bf16.xpose.msra.mxu3 %v771_v15 }
  0xca   : > { %v623_v18 = vpop.f32.mrf.mxu0 }
  0xcb   : > { %v624_v21 = vadd.f32 %v4357_v14, %v623_v18  ;;  %v4125_v18 = vld [vmem:[%s6709_s4 + $0x8] sm:$0xf] }
  0xd0   : > { %791 = vmatmul.bf16.vlgmr.msra.gmra.mxu3 %v779_v19  ;;  %v3364_v19 = vld [vmem:[%s6709_s4 + $0x44] sm:$0xf0] }
  0xd2   : > { %v625_v20 = vpop.f32.mrf.mxu0 }
  0xd3   : > { %v626_v22 = vadd.f32 %v4357_v14, %v625_v20  ;;  %v3367_v20 = vor.u32 %v4125_v18, %v3364_v19 }
  0xd5   : > { %v780_v24 = vpack.c.bf16 %v626_v22, %v624_v21 }
  0xda   : > { %v628_v23 = vpop.f32.mrf.mxu0 }
  0xdb   : > { %v629_v26 = vadd.f32 %v4357_v14, %v628_v23  ;;  %v430_v23 = vld [vmem:[%s6712_s7 + $0x28] sm:$0xff] }
  0xdc   : > { %898 = vmatpush.msrb.mxu1 %v430_v23 }
  0xe0   : > { %796 = vmatmul.bf16.gmra.mxu3 %v780_v24  ;;  %v429_v24 = vld [vmem:[%s6712_s7 + $0x18] sm:$0xff] }
  0xe1   : > { %899 = vmatpush.msrb.mxu1 %v429_v24 }
  0xe2   : > { %v630_v25 = vpop.f32.mrf.mxu0 }
  0xe3   : > { %v631_v27 = vadd.f32 %v4357_v14, %v630_v25  ;;  %v428_v25 = vld [vmem:[%s6712_s7 + $0x8] sm:$0xff] }
  0xe4   : > { %900 = vmatpush.msrb.mxu1 %v428_v25 }
  0xe5   : > { %v781_v29 = vpack.c.bf16 %v631_v27, %v629_v26 }
  0xea   : > { %v633_v28 = vpop.f32.mrf.mxu0 }
  0xeb   : > { %v634_v31 = vadd.f32 %v4357_v14, %v633_v28 }
  0xf0   : > { %801 = vmatmul.bf16.gmra.mxu3 %v781_v29 }
  0xf2   : > { %v635_v30 = vpop.f32.mrf.mxu0 }
  0xf3   : > { %v636_v32 = vadd.f32 %v4357_v14, %v635_v30  ;;  %v3372_v14 = vld [vmem:[%s6709_s4 + $0xc4] sm:$0xf0] }
  0xf4   : > { %v3375_v17 = vor.u32 %v4127_v13, %v3372_v14 }
  0xf5   : > { %v782_v33 = vpack.c.bf16 %v636_v32, %v634_v31 }
  0xf6   : > { %760 = vmatpush.bf16.msra.mxu2 %v3375_v17 }
  0xfa   : > { %761 = vmatpush.bf16.msra.mxu2 %v3367_v20 }
  0xfd   : > { %762 = vmatmul.bf16.vlgmr.msra.gmra.mxu2 %v4745_v51 }
 0x100   : > { %806 = vmatmul.bf16.gmra.mxu3 %v782_v33 }
 0x153   : > { %v4801_v34 = vpop.f32.mrf.mxu3 }
 0x154   : > { %v813_v35 = vsel %vm812_vm0, %v4801_v34, -inf }
 0x155   : > { %814 = vmax.xlane.f32.xlu0 %v813_v35 }
 0x15b   : > { %v4805_v36 = vpop.f32.mrf.mxu3 }
 0x15c   : > { %v816_v37 = vsel %vm812_vm0, %v4805_v36, -inf }
 0x15d   : > { %817 = vmax.xlane.f32.xlu0 %v816_v37 }
 0x163   : > { %v4809_v38 = vpop.f32.mrf.mxu3 }
 0x164   : > { %v819_v39 = vsel %vm812_vm0, %v4809_v38, -inf }
 0x165   : > { %820 = vmax.xlane.f32.xlu1 %v819_v39 }
 0x16b   : > { %v4813_v40 = vpop.f32.mrf.mxu3 }
 0x16c   : > { %v822_v41 = vsel %vm812_vm0, %v4813_v40, -inf }
 0x16d   : > { %823 = vmax.xlane.f32.xlu1 %v822_v41 }
 0x173   : > { %v4838_v58 = vpop.f32.mrf.mxu3 }
 0x174   : > { %v825_v59 = vsel %vm812_vm0, %v4838_v58, -inf }
 0x175   : > { %826 = vmax.xlane.f32.xlu2 %v825_v59 }
 0x17b   : > { %v804_v5 = vpop.f32.mrf.mxu3 }
 0x17c   : > { %v828_v6 = vsel %vm812_vm0, %v804_v5, -inf }
 0x17d   : > { %829 = vmax.xlane.f32.xlu2 %v828_v6  ;;  %v658_v6 = vperm.slane %v4771_v62, 1 }
 0x180   : > { %v763_v4 = vpop.f32.mrf.mxu2 }
 0x181   : > { %v764_v7 = vadd.f32 %v763_v4, %v658_v6 }
 0x183   : > { %v807_v15 = vpop.f32.mrf.mxu3  ;;  %v775_v10 = vmul.f32 %v764_v7, %v4777_v1  ;;  %v776_v11 = vmul.f32 %v764_v7, %v4782_v2  ;;  %v773_v13 = vmul.f32 %v764_v7, %v4789_v8  ;;  %v774_v14 = vmul.f32 %v764_v7, %v4794_v9 }
 0x184   : > { %v831_v16 = vsel %vm812_vm0, %v807_v15, -inf }
 0x185   : > { %832 = vmax.xlane.f32.xlu0 %v831_v16  ;;  %v778_v12 = vpack.c.bf16 %v776_v11, %v775_v10  ;;  %v3442_v10 = vld [vmem:[%s6709_s4 + $0x8c] sm:$0xf] }
 0x186   : > { %v4142_v11 = vld [vmem:[%s6709_s4 + $0xc8] sm:$0xf0] }
 0x187   : > { %972 = vmatpush.bf16.msrb.mxu2 %v778_v12  ;;  %v3443_v12 = vor.u32 %v4142_v11, %v3442_v10  ;;  %v4166_v11 = vld [vmem:[%s6709_s4 + $0x21c] sm:$0xf] }
 0x18b   : > { %v809_v21 = vpop.f32.mrf.mxu3 }
 0x18c   : > { %v834_v22 = vsel %vm812_vm0, %v809_v21, -inf }
 0x18d   : > { %835 = vmax.xlane.f32.xlu1 %v834_v22 }
 0x1c8   : > { %v815_v26 = vpop.xlane.xlu0 %814 }
 0x1c9   : > { %v837_v27 = vsub.f32 %v4801_v34, %v815_v26 }
 0x1cb   : > { %v845_v28 = vmul.f32 1.442695, %v837_v27 }
 0x1cd   : > { %4371 = vpow2.f32 %v845_v28 }
 0x1d0   : > { %v818_v29 = vpop.xlane.xlu0 %817 }
 0x1d1   : > { %v838_v30 = vsub.f32 %v4805_v36, %v818_v29 }
 0x1d3   : > { %v4887_v31 = vpop.eup %4371  ;;  %v847_v32 = vmul.f32 1.442695, %v838_v30 }
 0x1d4   : > { %3424 = vmatmul.msk.f32.vlgmr.msrb.gmra.mxu1 %vm812_vm0, %v4887_v31 }
 0x1d5   : > { %4373 = vpow2.f32 %v847_v32  ;;  %v4148_v32 = vld [vmem:[%s6709_s4 + $0x3c8] sm:$0xf0] }
 0x1d8   : > { %v821_v33 = vpop.xlane.xlu1 %820 }
 0x1d9   : > { %v839_v35 = vsub.f32 %v4809_v38, %v821_v33  ;;  %v3462_v33 = vld [vmem:[%s6709_s4 + $0x30c] sm:$0xf] }
 0x1db   : > { %v4374_v37 = vpop.eup %4373  ;;  %v849_v39 = vmul.f32 1.442695, %v839_v35 }
 0x1dc   : > { %3425 = vmatmul.msk.f32.gmra.mxu1 %vm812_vm0, %v4374_v37 }
 0x1dd   : > { %4375 = vpow2.f32 %v849_v39 }
 0x1e0   : > { %v824_v34 = vpop.xlane.xlu1 %823 }
 0x1e1   : > { %v840_v41 = vsub.f32 %v4813_v40, %v824_v34 }
 0x1e3   : > { %v4894_v42 = vpop.eup %4375  ;;  %v851_v36 = vmul.f32 1.442695, %v840_v41 }
 0x1e4   : > { %3426 = vmatmul.msk.f32.gmra.mxu1 %vm812_vm0, %v4894_v42 }
 0x1e5   : > { %4377 = vpow2.f32 %v851_v36  ;;  %v4146_v36 = vld [vmem:[%s6709_s4 + $0x2c8] sm:$0xf0] }
 0x1e8   : > { %v827_v43 = vpop.xlane.xlu2 %826 }
 0x1e9   : > { %v841_v44 = vsub.f32 %v4838_v58, %v827_v43 }
 0x1eb   : > { %v4378_v45 = vpop.eup %4377  ;;  %v853_v38 = vmul.f32 1.442695, %v841_v44  ;;  %v3454_v44 = vld [vmem:[%s6709_s4 + $0x20c] sm:$0xf] }
 0x1ec   : > { %3427 = vmatmul.msk.f32.gmra.mxu1 %vm812_vm0, %v4378_v45 }
 0x1ed   : > { %4379 = vpow2.f32 %v853_v38 }
 0x1f0   : > { %v830_v46 = vpop.xlane.xlu2 %829 }
 0x1f1   : > { %v842_v47 = vsub.f32 %v804_v5, %v830_v46  ;;  %v765_v5 = vpop.f32.mrf.mxu2 }
 0x1f3   : > { %v4900_v48 = vpop.eup %4379  ;;  %v855_v40 = vmul.f32 1.442695, %v842_v47 }
 0x1f4   : > { %3428 = vmatmul.msk.f32.gmra.mxu1 %vm812_vm0, %v4900_v48 }
 0x1f5   : > { %4381 = vpow2.f32 %v855_v40 }
 0x1f8   : > { %v833_v52 = vpop.xlane.xlu0 %832 }
 0x1f9   : > { %v843_v55 = vsub.f32 %v807_v15, %v833_v52  ;;  %v777_v15 = vpack.c.bf16 %v774_v14, %v773_v13 }
 0x1fb   : > { %v4904_v59 = vpop.eup %4381  ;;  %v857_v60 = vmul.f32 1.442695, %v843_v55  ;;  %973 = vmatpush.bf16.msrb.mxu2 %v777_v15 }
 0x1fc   : > { %3429 = vmatmul.msk.f32.gmra.mxu1 %vm812_vm0, %v4904_v59 }
 0x1fd   : > { %4383 = vpow2.f32 %v857_v60  ;;  %v3450_v60 = vld [vmem:[%s6709_s4 + $0x18c] sm:$0xf] }
 0x200   : > { %v836_v58 = vpop.xlane.xlu1 %835 }
 0x201   : > { %v844_v61 = vsub.f32 %v809_v21, %v836_v58  ;;  %v4144_v58 = vld [vmem:[%s6709_s4 + $0x1c8] sm:$0xf0] }
 0x202   : > { %v3451_v4 = vor.u32 %v4144_v58, %v3450_v60  ;;  %v4171_v58 = vld [vmem:[%s6709_s4 + $0x2cc] sm:$0xf0] }
 0x203   : > { %v4908_v63 = vpop.eup %4383  ;;  %v859_v0 = vmul.f32 1.442695, %v844_v61 }
 0x204   : > { %3430 = vmatmul.msk.f32.gmra.mxu1 %vm812_vm0, %v4908_v63 }
 0x205   : > { %4385 = vpow2.f32 %v859_v0 }
 0x20b   : > { %v4912_v3 = vpop.eup %4385 }
 0x20c   : > { %3431 = vmatmul.msk.f32.gmra.mxu1 %vm812_vm0, %v4912_v3 }
 0x251   : > { %v902_v16 = vpop.f32.mrf.mxu1 }
 0x252   : > { %v926_v17 = vmax.f32 %v902_v16, 1e-20 }
 0x254   : > { %4387 = vrcp.f32 %v926_v17 }
 0x259   : > { %v905_v18 = vpop.f32.mrf.mxu1 }
 0x25a   : > { %v927_v19 = vmax.f32 %v905_v18, 1e-20  ;;  %v4388_v62 = vpop.eup %4387  ;;  %v3438_v18 = vld [vmem:[%s6709_s4 + $0xc] sm:$0xf] }
 0x25b   : > { %v942_v1 = vmul.f32 %v4388_v62, %v4887_v31  ;;  %v3466_v31 = vld [vmem:[%s6709_s4 + $0x38c] sm:$0xf] }
 0x25c   : > { %4389 = vrcp.f32 %v927_v19  ;;  %v3467_v35 = vor.u32 %v4148_v32, %v3466_v31  ;;  %v4141_v19 = vld [vmem:[%s6709_s4 + $0x48] sm:$0xf0]  ;;  %v4177_v31 = vld [vmem:[%s6709_s4 + $0x394] sm:$0xf] }
 0x25d   : > { %v3439_v62 = vor.u32 %v4141_v19, %v3438_v18  ;;  %v4164_v18 = vld [vmem:[%s6709_s4 + $0x1d4] sm:$0xf0] }
 0x25e   : > { %1067 = vmatpush.bf16.msrb.mxu3 %v3467_v35  ;;  %v4174_v35 = vld [vmem:[%s6709_s4 + $0x31c] sm:$0xf] }
 0x261   : > { %v908_v20 = vpop.f32.mrf.mxu1 }
 0x262   : > { %v4390_v21 = vpop.eup %4389  ;;  %v928_v23 = vmax.f32 %v908_v20, 1e-20 }
 0x263   : > { %v943_v2 = vmul.f32 %v4390_v21, %v4374_v37  ;;  %v4147_v37 = vld [vmem:[%s6709_s4 + $0x348] sm:$0xf0] }
 0x264   : > { %4391 = vrcp.f32 %v928_v23  ;;  %v3463_v41 = vor.u32 %v4147_v37, %v3462_v33  ;;  %v4180_v23 = vld [vmem:[%s6709_s4 + $0x3d4] sm:$0xf0]  ;;  %v3584_v33 = vld [vmem:[%s6709_s4 + $0x3d0] sm:$0xf0]  ;;  %v3576_v37 = vld [vmem:[%s6709_s4 + $0x358] sm:$0xf0] }
 0x265   : > { %v950_v22 = vpack.c.bf16 %v943_v2, %v942_v1 }
 0x266   : > { %1068 = vmatpush.bf16.msrb.mxu3 %v3463_v41  ;;  %v3566_v41 = vld [vmem:[%s6709_s4 + $0x310] sm:$0xf] }
 0x267   : > { %3432 = vmatmul.msk.bf16.vlgmr.msrb.gmra.mxu2 %vm812_vm0, %v950_v22  ;;  %v3590_v22 = vld [vmem:[%s6709_s4 + $0x398] sm:$0xf] }
 0x269   : > { %v911_v8 = vpop.f32.mrf.mxu1 }
 0x26a   : > { %v929_v9 = vmax.f32 %v911_v8, 1e-20  ;;  %v4392_v24 = vpop.eup %4391  ;;  %v4178_v8 = vld [vmem:[%s6709_s4 + $0x39c] sm:$0xf] }
 0x26b   : > { %v944_v27 = vmul.f32 %v4392_v24, %v4894_v42  ;;  %v3458_v42 = vld [vmem:[%s6709_s4 + $0x28c] sm:$0xf]  ;;  %v3592_v24 = vld [vmem:[%s6709_s4 + $0x3d8] sm:$0xf0] }
 0x26c   : > { %4393 = vrcp.f32 %v929_v9  ;;  %v3459_v43 = vor.u32 %v4146_v36, %v3458_v42  ;;  %v3591_v9 = vor.u32 %v4180_v23, %v3590_v22  ;;  %v4175_v42 = vld [vmem:[%s6709_s4 + $0x34c] sm:$0xf0]  ;;  %v3558_v36 = vld [vmem:[%s6709_s4 + $0x298] sm:$0xf]  ;;  %v4161_v23 = vld [vmem:[%s6709_s4 + $0x194] sm:$0xf] }
 0x26e   : > { %1069 = vmatpush.bf16.msrb.mxu3 %v3459_v43  ;;  %1457 = vmatpush.bf16.msra.mxu2 %v3591_v9 }
 0x271   : > { %v914_v25 = vpop.f32.mrf.mxu1 }
 0x272   : > { %v4394_v26 = vpop.eup %4393  ;;  %v930_v30 = vmax.f32 %v914_v25, 1e-20  ;;  %v3582_v25 = vld [vmem:[%s6709_s4 + $0x390] sm:$0xf] }
 0x273   : > { %v945_v28 = vmul.f32 %v4394_v26, %v4378_v45  ;;  %v4145_v45 = vld [vmem:[%s6709_s4 + $0x248] sm:$0xf0]  ;;  %v4179_v26 = vld [vmem:[%s6709_s4 + $0x3cc] sm:$0xf0] }
 0x274   : > { %4395 = vrcp.f32 %v930_v30  ;;  %v3455_v40 = vor.u32 %v4145_v45, %v3454_v44  ;;  %v4176_v30 = vld [vmem:[%s6709_s4 + $0x354] sm:$0xf0]  ;;  %v3567_v44 = vor.u32 %v4175_v42, %v3566_v41  ;;  %v4157_v41 = vld [vmem:[%s6709_s4 + $0x114] sm:$0xf] }
 0x275   : > { %v951_v29 = vpack.c.bf16 %v945_v28, %v944_v27  ;;  %v3595_v27 = vor.u32 %v4178_v8, %v3592_v24  ;;  %v3583_v28 = vor.u32 %v4179_v26, %v3582_v25  ;;  %v4172_v45 = vld [vmem:[%s6709_s4 + $0x2d4] sm:$0xf0]  ;;  %v3520_v8 = vld [vmem:[%s6709_s4 + $0x1d0] sm:$0xf0] }
 0x276   : > { %1070 = vmatpush.bf16.msrb.mxu3 %v3455_v40  ;;  %v4170_v40 = vld [vmem:[%s6709_s4 + $0x29c] sm:$0xf]  ;;  %v3559_v60 = vor.u32 %v4172_v45, %v3558_v36  ;;  %v3510_v24 = vld [vmem:[%s6709_s4 + $0x118] sm:$0xf]  ;;  %v3504_v42 = vld [vmem:[%s6709_s4 + $0x150] sm:$0xf0] }
 0x277   : > { %3433 = vmatmul.msk.bf16.gmra.mxu2 %vm812_vm0, %v951_v29  ;;  %v3574_v29 = vld [vmem:[%s6709_s4 + $0x318] sm:$0xf]  ;;  %1399 = vmatpush.bf16.msrb.mxu0 %v3583_v28  ;;  %v4158_v28 = vld [vmem:[%s6709_s4 + $0x11c] sm:$0xf] }
 0x278   : > { %v3575_v32 = vor.u32 %v4176_v30, %v3574_v29  ;;  %v4160_v25 = vld [vmem:[%s6709_s4 + $0x154] sm:$0xf0]  ;;  %v3512_v29 = vld [vmem:[%s6709_s4 + $0x158] sm:$0xf0] }
 0x279   : > { %v917_v39 = vpop.f32.mrf.mxu1  ;;  %v3511_v30 = vor.u32 %v4160_v25, %v3510_v24  ;;  %v3494_v36 = vld [vmem:[%s6709_s4 + $0x98] sm:$0xf]  ;;  %v4154_v45 = vld [vmem:[%s6709_s4 + $0x9c] sm:$0xf] }
 0x27a   : > { %v931_v34 = vmax.f32 %v917_v39, 1e-20  ;;  %v4396_v38 = vpop.eup %4395  ;;  %1071 = vmatpush.bf16.msrb.mxu3 %v3451_v4  ;;  %v3587_v39 = vor.u32 %v4177_v31, %v3584_v33  ;;  %1458 = vmatpush.bf16.msra.mxu2 %v3575_v32  ;;  %v3515_v32 = vor.u32 %v4158_v28, %v3512_v29 }
 0x27b   : > { %v946_v52 = vmul.f32 %v4396_v38, %v4900_v48  ;;  %v3446_v48 = vld [vmem:[%s6709_s4 + $0x10c] sm:$0xf]  ;;  %v4173_v38 = vld [vmem:[%s6709_s4 + $0x314] sm:$0xf]  ;;  %1400 = vmatpush.bf16.msrb.mxu0 %v3567_v44  ;;  %v3507_v44 = vor.u32 %v4157_v41, %v3504_v42 }
 0x27c   : > { %4397 = vrcp.f32 %v931_v34  ;;  %v3579_v34 = vor.u32 %v4174_v35, %v3576_v37  ;;  %1428 = vmatpush.bf16.msra.mxu1 %v3587_v39  ;;  %v3502_v37 = vld [vmem:[%s6709_s4 + $0x110] sm:$0xf] }
 0x27d   : > { %v4159_v39 = vld [vmem:[%s6709_s4 + $0x14c] sm:$0xf0] }
 0x27e   : > { %1459 = vmatpush.bf16.msra.mxu2 %v3559_v60 }
 0x281   : > { %v920_v46 = vpop.f32.mrf.mxu1 }
 0x282   : > { %v4398_v47 = vpop.eup %4397  ;;  %v932_v0 = vmax.f32 %v920_v46, 1e-20  ;;  %v3568_v46 = vld [vmem:[%s6709_s4 + $0x350] sm:$0xf0] }
 0x283   : > { %v947_v55 = vmul.f32 %v4398_v47, %v4904_v59  ;;  %v4143_v59 = vld [vmem:[%s6709_s4 + $0x148] sm:$0xf0]  ;;  %v3571_v47 = vor.u32 %v4173_v38, %v3568_v46  ;;  %v3496_v46 = vld [vmem:[%s6709_s4 + $0xd8] sm:$0xf0] }
 0x284   : > { %4399 = vrcp.f32 %v932_v0  ;;  %v3447_v7 = vor.u32 %v4143_v59, %v3446_v48  ;;  %v4168_v48 = vld [vmem:[%s6709_s4 + $0x254] sm:$0xf0]  ;;  %v4169_v59 = vld [vmem:[%s6709_s4 + $0x294] sm:$0xf] }
 0x285   : > { %v952_v61 = vpack.c.bf16 %v947_v55, %v946_v52  ;;  %v3560_v52 = vld [vmem:[%s6709_s4 + $0x2d8] sm:$0xf0]  ;;  %v3550_v55 = vld [vmem:[%s6709_s4 + $0x290] sm:$0xf]  ;;  %1429 = vmatpush.bf16.msra.mxu1 %v3571_v47  ;;  %v3499_v47 = vor.u32 %v4154_v45, %v3496_v46  ;;  %v4203_v46 = vld [vmem:[%s6710_s5 + $0x164] sm:$0xf0] }
 0x286   : > { %1072 = vmatpush.bf16.msrb.mxu3 %v3447_v7  ;;  %v3563_v0 = vor.u32 %v4170_v40, %v3560_v52  ;;  %v3551_v4 = vor.u32 %v4171_v58, %v3550_v55  ;;  %v4167_v7 = vld [vmem:[%s6709_s4 + $0x24c] sm:$0xf0]  ;;  %v4153_v55 = vld [vmem:[%s6709_s4 + $0x94] sm:$0xf] }
 0x287   : > { %3434 = vmatmul.msk.bf16.gmra.mxu2 %vm812_vm0, %v952_v61  ;;  %v3542_v61 = vld [vmem:[%s6709_s4 + $0x218] sm:$0xf]  ;;  %v3486_v40 = vld [vmem:[%s6709_s4 + $0x90] sm:$0xf]  ;;  %v3488_v58 = vld [vmem:[%s6709_s4 + $0xd0] sm:$0xf0] }
 0x288   : > { %1401 = vmatpush.bf16.msrb.mxu0 %v3551_v4  ;;  %v4155_v52 = vld [vmem:[%s6709_s4 + $0xcc] sm:$0xf0]  ;;  %v4152_v4 = vld [vmem:[%s6709_s4 + $0x54] sm:$0xf0] }
 0x289   : > { %v923_v5 = vpop.f32.mrf.mxu1  ;;  %v3487_v60 = vor.u32 %v4155_v52, %v3486_v40  ;;  %v4187_v40 = vld [vmem:[%s6710_s5 + $0x64] sm:$0xf0] }
 0x28a   : > { %v933_v6 = vmax.f32 %v923_v5, 1e-20  ;;  %v4400_v13 = vpop.eup %4399  ;;  %1073 = vmatpush.bf16.msrb.mxu3 %v3443_v12  ;;  %v3552_v5 = vld [vmem:[%s6709_s4 + $0x2d0] sm:$0xf0]  ;;  %v3544_v12 = vld [vmem:[%s6709_s4 + $0x258] sm:$0xf0] }
 0x28b   : > { %v948_v15 = vmul.f32 %v4400_v13, %v4908_v63  ;;  %v3555_v10 = vor.u32 %v4169_v59, %v3552_v5  ;;  %v3543_v13 = vor.u32 %v4168_v48, %v3542_v61  ;;  %v3491_v61 = vor.u32 %v4153_v55, %v3488_v58  ;;  %v4150_v48 = vld [vmem:[%s6709_s4 + $0x1c] sm:$0xf]  ;;  %v4211_v58 = vld [vmem:[%s6710_s5 + $0x1e4] sm:$0xf0] }
 0x28c   : > { %4401 = vrcp.f32 %v933_v6  ;;  %v3534_v6 = vld [vmem:[%s6709_s4 + $0x210] sm:$0xf]  ;;  %v3480_v5 = vld [vmem:[%s6709_s4 + $0x58] sm:$0xf0] }
 0x28d   : > { %1430 = vmatpush.bf16.msra.mxu1 %v3555_v10  ;;  %1460 = vmatpush.bf16.msra.mxu2 %v3543_v13  ;;  %v3483_v10 = vor.u32 %v4150_v48, %v3480_v5  ;;  %v3472_v13 = vld [vmem:[%s6709_s4 + $0x50] sm:$0xf0]  ;;  %v4195_v48 = vld [vmem:[%s6710_s5 + $0xe4] sm:$0xf0]  ;;  %v4202_v5 = vld [vmem:[%s6710_s5 + $0x154] sm:$0xf0] }
 0x28e   : > { %1074 = vmatpush.bf16.msrb.mxu3 %v3439_v62  ;;  %v3547_v62 = vor.u32 %v4166_v11, %v3544_v12  ;;  %v4149_v12 = vld [vmem:[%s6709_s4 + $0x14] sm:$0xf] }
 0x292   : > { %v4402_v14 = vpop.eup %4401  ;;  %1486 = vmatpush.bf16.msra.mxu3 %v3595_v27  ;;  %v3523_v27 = vor.u32 %v4161_v23, %v3520_v8 }
 0x293   : > { %v949_v16 = vmul.f32 %v4402_v14, %v4912_v3  ;;  %v4165_v14 = vld [vmem:[%s6709_s4 + $0x214] sm:$0xf] }
 0x295   : > { %v953_v17 = vpack.c.bf16 %v949_v16, %v948_v15  ;;  %v3536_v15 = vld [vmem:[%s6709_s4 + $0x250] sm:$0xf0]  ;;  %v3535_v16 = vor.u32 %v4167_v7, %v3534_v6  ;;  %v3470_v6 = vld [vmem:[%s6709_s4 + $0x10] sm:$0xf] }
 0x296   : > { %1487 = vmatpush.bf16.msra.mxu3 %v3579_v34  ;;  %v3503_v34 = vor.u32 %v4159_v39, %v3502_v37  ;;  %v4151_v7 = vld [vmem:[%s6709_s4 + $0x4c] sm:$0xf0]  ;;  %v4188_v37 = vld [vmem:[%s6710_s5 + $0x74] sm:$0xf0] }
 0x297   : > { %3435 = vmatmul.msk.bf16.gmra.mxu2 %vm812_vm0, %v953_v17  ;;  %v3526_v17 = vld [vmem:[%s6709_s4 + $0x198] sm:$0xf]  ;;  %1402 = vmatpush.bf16.msrb.mxu0 %v3535_v16  ;;  %v3471_v11 = vor.u32 %v4151_v7, %v3470_v6  ;;  %v3722_v39 = vld [vmem:[%s6710_s5 + $0x1f0] sm:$0xf] }
 0x298   : > { %v3527_v22 = vor.u32 %v4164_v18, %v3526_v17  ;;  %v3618_v7 = vld [vmem:[%s6710_s5 + $0x50] sm:$0xf] }
 0x29a   : > { %1488 = vmatpush.bf16.msra.mxu3 %v3563_v0  ;;  %1461 = vmatpush.bf16.msra.mxu2 %v3527_v22  ;;  %v3478_v0 = vld [vmem:[%s6709_s4 + $0x18] sm:$0xf] }
 0x29b   : > { %v3479_v59 = vor.u32 %v4152_v4, %v3478_v0 }
 0x29e   : > { %1489 = vmatpush.bf16.msra.mxu3 %v3547_v62  ;;  %1462 = vmatpush.bf16.msra.mxu2 %v3511_v30 }
 0x2ea   : > { %v975_v20 = vpop.f32.mrf.mxu2 }
 0x2f2   : > { %v977_v21 = vpop.f32.mrf.mxu2 }
 0x2f3   : > { %v995_v1 = vpack.c.bf16 %v977_v21, %v975_v20  ;;  %v3518_v20 = vld [vmem:[%s6709_s4 + $0x190] sm:$0xf] }
 0x2f4   : > { %v4163_v21 = vld [vmem:[%s6709_s4 + $0x1cc] sm:$0xf0] }
 0x2f5   : > { %1075 = vmatmul.bf16.vlgmr.msrb.gmra.mxu3 %v995_v1  ;;  %v3519_v9 = vor.u32 %v4163_v21, %v3518_v20 }
 0x2f7   : > { %1403 = vmatpush.bf16.msrb.mxu0 %v3519_v9 }
 0x2fa   : > { %v980_v63 = vpop.f32.mrf.mxu2 }
 0x2fb   : > { %1404 = vmatpush.bf16.msrb.mxu0 %v3503_v34  ;;  %v4212_v34 = vld [vmem:[%s6710_s5 + $0x1f4] sm:$0xf0] }
 0x2fc   : > { %v3723_v42 = vor.u32 %v4212_v34, %v3722_v39  ;;  %v4184_v39 = vld [vmem:[%s6710_s5 + $0x34] sm:$0xf0]  ;;  %v3706_v34 = vld [vmem:[%s6710_s5 + $0x1b0] sm:$0xf] }
 0x2ff   : > { %1405 = vmatpush.bf16.msrb.mxu0 %v3487_v60 }
 0x302   : > { %v982_v2 = vpop.f32.mrf.mxu2 }
 0x303   : > { %v996_v3 = vpack.c.bf16 %v982_v2, %v980_v63  ;;  %v3539_v63 = vor.u32 %v4165_v14, %v3536_v15  ;;  %v4162_v2 = vld [vmem:[%s6709_s4 + $0x19c] sm:$0xf]  ;;  %v3475_v14 = vor.u32 %v4149_v12, %v3472_v13  ;;  %1406 = vmatpush.bf16.msrb.mxu0 %v3471_v11  ;;  %v5174_v15 = vld [vmem:[%s6711_s6 + $0x3] ss:$0 sm:$0xff]  ;;  %v3714_v11 = vld [vmem:[%s6710_s5 + $0x1d0] sm:$0xf] }
 0x305   : > { %1080 = vmatmul.bf16.gmra.mxu3 %v996_v3  ;;  %v3528_v3 = vld [vmem:[%s6709_s4 + $0x1d8] sm:$0xf0]  ;;  %1431 = vmatpush.bf16.msra.mxu1 %v3539_v63 }
 0x306   : > { %v3531_v26 = vor.u32 %v4162_v2, %v3528_v3 }
 0x308   : > { %1490 = vmatpush.bf16.msra.mxu3 %v3531_v26 }
 0x309   : > { %1432 = vmatpush.bf16.msra.mxu1 %v3523_v27 }
 0x30a   : > { %v985_v43 = vpop.f32.mrf.mxu2 }
 0x30c   : > { %1491 = vmatpush.bf16.msra.mxu3 %v3515_v32  ;;  %v4204_v32 = vld [vmem:[%s6710_s5 + $0x174] sm:$0xf0] }
 0x30d   : > { %1433 = vmatpush.bf16.msra.mxu1 %v3507_v44  ;;  %v3686_v44 = vld [vmem:[%s6710_s5 + $0x160] sm:$0xf] }
 0x30e   : > { %v3687_v55 = vor.u32 %v4203_v46, %v3686_v44 }
 0x310   : > { %1492 = vmatpush.bf16.msra.mxu3 %v3499_v47  ;;  %v3622_v47 = vld [vmem:[%s6710_s5 + $0x60] sm:$0xf] }
 0x311   : > { %1434 = vmatpush.bf16.msra.mxu1 %v3491_v61  ;;  %v3623_v60 = vor.u32 %v4187_v40, %v3622_v47  ;;  %v3654_v61 = vld [vmem:[%s6710_s5 + $0xe0] sm:$0xf]  ;;  %v4199_v40 = vld [vmem:[%s6710_s5 + $0x124] sm:$0xf0] }
 0x312   : > { %v987_v19 = vpop.f32.mrf.mxu2  ;;  %v3655_v6 = vor.u32 %v4195_v48, %v3654_v61  ;;  %v3670_v47 = vld [vmem:[%s6710_s5 + $0x120] sm:$0xf] }
 0x313   : > { %v997_v1 = vpack.c.bf16 %v987_v19, %v985_v43  ;;  %v4156_v43 = vld [vmem:[%s6709_s4 + $0xd4] sm:$0xf0]  ;;  %v5181_v19 = vld [vmem:[%s6711_s6 + $0x4] ss:$0 sm:$0xff] }
 0x314   : > { %v3495_v38 = vor.u32 %v4156_v43, %v3494_v36  ;;  %1493 = vmatpush.bf16.msra.mxu3 %v3483_v10  ;;  %v3658_v36 = vld [vmem:[%s6710_s5 + $0xf0] sm:$0xf]  ;;  %v4196_v43 = vld [vmem:[%s6710_s5 + $0xf4] sm:$0xf0] }
 0x315   : > { %1085 = vmatmul.bf16.gmra.mxu3 %v997_v1  ;;  %1435 = vmatpush.bf16.msra.mxu1 %v3475_v14  ;;  %v5188_v1 = vld [vmem:[%s6711_s6 + $0x5] ss:$0 sm:$0xff]  ;;  %v4186_v10 = vld [vmem:[%s6710_s5 + $0x54] sm:$0xf0] }
 0x316   : > { %1463 = vmatpush.bf16.msra.mxu2 %v3495_v38  ;;  %v3659_v38 = vor.u32 %v4196_v43, %v3658_v36  ;;  %v3642_v36 = vld [vmem:[%s6710_s5 + $0xb0] sm:$0xf]  ;;  %v4192_v43 = vld [vmem:[%s6710_s5 + $0xb4] sm:$0xf0] }
 0x317   : > { %v3643_v46 = vor.u32 %v4192_v43, %v3642_v36 }
 0x318   : > { %1845 = vmatpush.bf16.msrb.mxu3 %v3723_v42  ;;  %v4208_v42 = vld [vmem:[%s6710_s5 + $0x1b4] sm:$0xf0] }
 0x319   : > { %1787 = vmatpush.bf16.msrb.mxu1 %v3659_v38  ;;  %v3707_v38 = vor.u32 %v4208_v42, %v3706_v34 }
 0x31a   : > { %v990_v31 = vpop.f32.mrf.mxu2  ;;  %1464 = vmatpush.bf16.msra.mxu2 %v3479_v59  ;;  %v3682_v59 = vld [vmem:[%s6710_s5 + $0x150] sm:$0xf] }
 0x31b   : > { %v3683_v14 = vor.u32 %v4202_v5, %v3682_v59 }
 0x31d   : > { %1788 = vmatpush.bf16.msrb.mxu1 %v3655_v6  ;;  %v3606_v6 = vld [vmem:[%s6710_s5 + $0x20] sm:$0xf] }
 0x322   : > { %v992_v33 = vpop.f32.mrf.mxu2 }
 0x323   : > { %v998_v35 = vpack.c.bf16 %v992_v33, %v990_v31  ;;  %v3626_v33 = vld [vmem:[%s6710_s5 + $0x70] sm:$0xf] }
 0x324   : > { %v3627_v41 = vor.u32 %v4188_v37, %v3626_v33  ;;  %v3610_v37 = vld [vmem:[%s6710_s5 + $0x30] sm:$0xf] }
 0x325   : > { %1090 = vmatmul.bf16.gmra.mxu3 %v998_v35 }
 0x326   : > { %1758 = vmatpush.bf16.msra.mxu0 %v3627_v41 }
 0x32a   : > { %1759 = vmatpush.bf16.msra.mxu0 %v3623_v60 }
 0x378   : > { %v1076_v16 = vpop.f32.mrf.mxu3 }
 0x379   : > { %v1077_v17 = vadd.f32 %v5174_v15, %v1076_v16  ;;  %v4210_v16 = vld [vmem:[%s6710_s5 + $0x1d4] sm:$0xf0] }
 0x37b   : > { %v1096_v18 = vadd.f32 %v1077_v17, %v4740_v49  ;;  %v3650_v17 = vld [vmem:[%s6710_s5 + $0xd0] sm:$0xf] }
 0x37d   : > { %v1108_v21 = vmul.f32 %v5181_v19, %v1096_v18  ;;  %v4194_v18 = vld [vmem:[%s6710_s5 + $0xd4] sm:$0xf0] }
 0x37f   : > { %v5193_v49 = vadd.f32 %v5188_v1, %v1108_v21  ;;  %v3651_v21 = vor.u32 %v4194_v18, %v3650_v17  ;;  %v4182_v17 = vld [vmem:[%s6710_s5 + $0x14] sm:$0xf0] }
 0x380   : > { %v1078_v62 = vpop.f32.mrf.mxu3 }
 0x381   : > { %v1079_v20 = vadd.f32 %v5174_v15, %v1078_v62  ;;  %v3619_v62 = vor.u32 %v4186_v10, %v3618_v7  ;;  %1789 = vmatpush.bf16.msrb.mxu1 %v3651_v21  ;;  %v3702_v10 = vld [vmem:[%s6710_s5 + $0x1a0] sm:$0xf]  ;;  %v3666_v21 = vld [vmem:[%s6710_s5 + $0x110] sm:$0xf] }
 0x383   : > { %v1097_v63 = vadd.f32 %v1079_v20, %v4743_v50  ;;  %v3715_v20 = vor.u32 %v4210_v16, %v3714_v11  ;;  %1760 = vmatpush.bf16.msra.mxu0 %v3619_v62  ;;  %v4207_v11 = vld [vmem:[%s6710_s5 + $0x1a4] sm:$0xf0]  ;;  %v3602_v16 = vld [vmem:[%s6710_s5 + $0x10] sm:$0xf] }
 0x384   : > { %v3603_v18 = vor.u32 %v4182_v17, %v3602_v16  ;;  %v3634_v62 = vld [vmem:[%s6710_s5 + $0x90] sm:$0xf] }
 0x385   : > { %v1109_v2 = vmul.f32 %v5181_v19, %v1097_v63  ;;  %v3678_v63 = vld [vmem:[%s6710_s5 + $0x140] sm:$0xf] }
 0x387   : > { %v5196_v3 = vadd.f32 %v5188_v1, %v1109_v2  ;;  %v4201_v2 = vld [vmem:[%s6710_s5 + $0x144] sm:$0xf0] }
 0x388   : > { %v1081_v22 = vpop.f32.mrf.mxu3 }
 0x389   : > { %v1226_v23 = vpack.c.bf16 %v5196_v3, %v5193_v49  ;;  %v1082_v8 = vadd.f32 %v5174_v15, %v1081_v22  ;;  %v3614_v22 = vld [vmem:[%s6710_s5 + $0x40] sm:$0xf] }
 0x38b   : > { %1407 = vmatmul.bf16.vlgmr.msrb.gmra.mxu0 %v1226_v23  ;;  %1436 = vmatmul.bf16.vlgmr.msra.gmra.mxu1 %v1226_v23  ;;  %v1098_v50 = vadd.f32 %v1082_v8, %v4751_v53  ;;  %v3710_v8 = vld [vmem:[%s6710_s5 + $0x1c0] sm:$0xf] }
 0x38c   : > { %1465 = vmatmul.bf16.vlgmr.msra.gmra.mxu2 %v1226_v23  ;;  %1494 = vmatmul.bf16.vlgmr.msra.gmra.mxu3 %v1226_v23  ;;  %v4185_v23 = vld [vmem:[%s6710_s5 + $0x44] sm:$0xf0] }
 0x38d   : > { %v1110_v25 = vmul.f32 %v5181_v19, %v1098_v50 }
 0x38f   : > { %v5207_v28 = vadd.f32 %v5188_v1, %v1110_v25  ;;  %v3646_v25 = vld [vmem:[%s6710_s5 + $0xc0] sm:$0xf] }
 0x390   : > { %v1083_v9 = vpop.f32.mrf.mxu3 }
 0x391   : > { %v1084_v24 = vadd.f32 %v5174_v15, %v1083_v9 }
 0x393   : > { %v1099_v26 = vadd.f32 %v1084_v24, %v4754_v54  ;;  %v3690_v54 = vld [vmem:[%s6710_s5 + $0x170] sm:$0xf]  ;;  %v4209_v24 = vld [vmem:[%s6710_s5 + $0x1c4] sm:$0xf0] }
 0x394   : > { %v3691_v35 = vor.u32 %v4204_v32, %v3690_v54  ;;  %v3674_v54 = vld [vmem:[%s6710_s5 + $0x130] sm:$0xf]  ;;  %v4200_v32 = vld [vmem:[%s6710_s5 + $0x134] sm:$0xf0]  ;;  %v3711_v33 = vor.u32 %v4209_v24, %v3710_v8  ;;  %v3630_v8 = vld [vmem:[%s6710_s5 + $0x80] sm:$0xf] }
 0x395   : > { %v1111_v27 = vmul.f32 %v5181_v19, %v1099_v26  ;;  %v4193_v26 = vld [vmem:[%s6710_s5 + $0xc4] sm:$0xf0]  ;;  %v3675_v44 = vor.u32 %v4200_v32, %v3674_v54  ;;  %v3694_v32 = vld [vmem:[%s6710_s5 + $0x180] sm:$0xf] }
 0x396   : > { %1816 = vmatpush.bf16.msrb.mxu2 %v3691_v35  ;;  %v3647_v35 = vor.u32 %v4193_v26, %v3646_v25  ;;  %v4189_v24 = vld [vmem:[%s6710_s5 + $0x84] sm:$0xf0]  ;;  %v3698_v25 = vld [vmem:[%s6710_s5 + $0x190] sm:$0xf]  ;;  %v4206_v26 = vld [vmem:[%s6710_s5 + $0x194] sm:$0xf0] }
 0x397   : > { %v5210_v29 = vadd.f32 %v5188_v1, %v1111_v27  ;;  %v4197_v54 = vld [vmem:[%s6710_s5 + $0x104] sm:$0xf0] }
 0x398   : > { %v1086_v30 = vpop.f32.mrf.mxu3  ;;  %1790 = vmatpush.bf16.msrb.mxu1 %v3647_v35  ;;  %v4205_v35 = vld [vmem:[%s6710_s5 + $0x184] sm:$0xf0] }
 0x399   : > { %v1227_v31 = vpack.c.bf16 %v5210_v29, %v5207_v28  ;;  %v1087_v53 = vadd.f32 %v5174_v15, %v1086_v30 }
 0x39a   : > { %1817 = vmatpush.bf16.msrb.mxu2 %v3687_v55 }
 0x39b   : > { %1412 = vmatmul.bf16.gmra.mxu0 %v1227_v31  ;;  %1441 = vmatmul.bf16.gmra.mxu1 %v1227_v31  ;;  %v1100_v45 = vadd.f32 %v1087_v53, %v4759_v56  ;;  %v3718_v56 = vld [vmem:[%s6710_s5 + $0x1e0] sm:$0xf]  ;;  %v3615_v53 = vor.u32 %v4185_v23, %v3614_v22  ;;  %v4181_v23 = vld [vmem:[%s6710_s5 + $0x4] sm:$0xf0] }
 0x39c   : > { %1470 = vmatmul.bf16.gmra.mxu2 %v1227_v31  ;;  %1499 = vmatmul.bf16.gmra.mxu3 %v1227_v31  ;;  %v3719_v4 = vor.u32 %v4211_v58, %v3718_v56  ;;  %v3679_v31 = vor.u32 %v4201_v2, %v3678_v63  ;;  %v3671_v58 = vor.u32 %v4199_v40, %v3670_v47  ;;  %v4198_v63 = vld [vmem:[%s6710_s5 + $0x114] sm:$0xf0]  ;;  %v3598_v2 = vld [vmem:[%s6710_s5] sm:$0xf] }
 0x39d   : > { %v1112_v12 = vmul.f32 %v5181_v19, %v1100_v45  ;;  %1761 = vmatpush.bf16.msra.mxu0 %v3615_v53  ;;  %v3611_v45 = vor.u32 %v4184_v39, %v3610_v37  ;;  %1791 = vmatpush.bf16.msrb.mxu1 %v3643_v46  ;;  %v3667_v22 = vor.u32 %v4198_v63, %v3666_v21  ;;  %v3662_v53 = vld [vmem:[%s6710_s5 + $0x100] sm:$0xf]  ;;  %v1160_v39 = vld [vmem:[%s6711_s6 + $0x6] sm:$0xf] }
 0x39e   : > { %1846 = vmatpush.bf16.msrb.mxu3 %v3719_v4  ;;  %1818 = vmatpush.bf16.msrb.mxu2 %v3683_v14  ;;  %v3695_v37 = vor.u32 %v4205_v35, %v3694_v32  ;;  %v5437_v42 = vperm.slane %v1160_v39, 0  ;;  %v5439_v36 = vperm.slane %v1160_v39, 1 }
 0x39f   : > { %v5308_v50 = vadd.f32 %v5188_v1, %v1112_v12  ;;  %v4191_v12 = vld [vmem:[%s6710_s5 + $0xa4] sm:$0xf0] }
 0x3a0   : > { %v1088_v52 = vpop.f32.mrf.mxu3 }
 0x3a1   : > { %v1089_v0 = vadd.f32 %v5174_v15, %v1088_v52  ;;  %v4417_v52 = vld [vmem:[%s4736_s29 + $0x30] sm:$0xff]  ;;  %1762 = vmatpush.bf16.msra.mxu0 %v3611_v45 }
 0x3a2   : > { %1847 = vmatpush.bf16.msrb.mxu3 %v3715_v20  ;;  %1819 = vmatpush.bf16.msrb.mxu2 %v3679_v31  ;;  %v4190_v20 = vld [vmem:[%s6710_s5 + $0x94] sm:$0xf0]  ;;  %v3699_v31 = vor.u32 %v4206_v26, %v3698_v25 }
 0x3a3   : > { %v1101_v13 = vadd.f32 %v1089_v0, %v4762_v57  ;;  %v4418_v0 = vld [vmem:[%s4736_s29 + $0x38] sm:$0xff]  ;;  %s5606_s29 = scalar_lea.vmem [#allocation2], %s3320_s30 }
 0x3a4   : > { %s3168_s30 = sshll.u32 %s5606_s29, 4  ;;  %s3169_s30 = int_to_ptr.vmem [resolvable:$true] %s3168_s30 }
 0x3a5   : > { %v1113_v57 = vmul.f32 %v5181_v19, %v1101_v13  ;;  %v3703_v13 = vor.u32 %v4207_v11, %v3702_v10 }
 0x3a6   : > { %1848 = vmatpush.bf16.msrb.mxu3 %v3711_v33  ;;  %1820 = vmatpush.bf16.msrb.mxu2 %v3675_v44  ;;  %v3663_v33 = vor.u32 %v4197_v54, %v3662_v53 }
 0x3a7   : > { %v5311_v9 = vadd.f32 %v5188_v1, %v1113_v57  ;;  %v3635_v57 = vor.u32 %v4190_v20, %v3634_v62 }
 0x3a8   : > { %v1091_v27 = vpop.f32.mrf.mxu3 }
 0x3a9   : > { %v1228_v30 = vpack.c.bf16 %v5311_v9, %v5308_v50  ;;  %v1092_v41 = vadd.f32 %v5174_v15, %v1091_v27  ;;  %v3599_v27 = vor.u32 %v4181_v23, %v3598_v2 }
 0x3aa   : > { %1849 = vmatpush.bf16.msrb.mxu3 %v3707_v38  ;;  %1821 = vmatpush.bf16.msrb.mxu2 %v3671_v58 }
 0x3ab   : > { %1417 = vmatmul.bf16.gmra.mxu0 %v1228_v30  ;;  %1446 = vmatmul.bf16.gmra.mxu1 %v1228_v30  ;;  %v1102_v55 = vadd.f32 %v4417_v52, %v1092_v41 }
 0x3ac   : > { %1475 = vmatmul.bf16.gmra.mxu2 %v1228_v30  ;;  %1504 = vmatmul.bf16.gmra.mxu3 %v1228_v30  ;;  %v3631_v30 = vor.u32 %v4189_v24, %v3630_v8 }
 0x3ad   : > { %v1114_v61 = vmul.f32 %v5181_v19, %v1102_v55  ;;  %v5445_v55 = vperm.slane %v1160_v39, 2 }
 0x3ae   : > { %1850 = vmatpush.bf16.msrb.mxu3 %v3703_v13  ;;  %1822 = vmatpush.bf16.msrb.mxu2 %v3667_v22 }
 0x3af   : > { %v5361_v59 = vadd.f32 %v5188_v1, %v1114_v61 }
 0x3b0   : > { %v1093_v60 = vpop.f32.mrf.mxu3 }
 0x3b1   : > { %v1094_v56 = vadd.f32 %v5174_v15, %v1093_v60  ;;  %v5447_v60 = vperm.slane %v1160_v39, 3 }
 0x3b2   : > { %1851 = vmatpush.bf16.msrb.mxu3 %v3699_v31  ;;  %1823 = vmatpush.bf16.msrb.mxu2 %v3663_v33 }
 0x3b3   : > { %v1103_v4 = vadd.f32 %v4418_v0, %v1094_v56 }
 0x3b5   : > { %v1115_v48 = vmul.f32 %v5181_v19, %v1103_v4  ;;  %v4183_v19 = vld [vmem:[%s6710_s5 + $0x24] sm:$0xf0] }
 0x3b6   : > { %v3607_v7 = vor.u32 %v4183_v19, %v3606_v6  ;;  %1852 = vmatpush.bf16.msrb.mxu3 %v3695_v37 }
 0x3b7   : > { %v5364_v5 = vadd.f32 %v5188_v1, %v1115_v48  ;;  %v3638_v1 = vld [vmem:[%s6710_s5 + $0xa0] sm:$0xf] }
 0x3b8   : > { %v3639_v14 = vor.u32 %v4191_v12, %v3638_v1  ;;  %1763 = vmatpush.bf16.msra.mxu0 %v3607_v7 }
 0x3b9   : > { %v1229_v15 = vpack.c.bf16 %v5364_v5, %v5361_v59 }
 0x3ba   : > { %1792 = vmatpush.bf16.msrb.mxu1 %v3639_v14 }
 0x3bb   : > { %1422 = vmatmul.bf16.gmra.mxu0 %v1229_v15  ;;  %1451 = vmatmul.bf16.gmra.mxu1 %v1229_v15 }
 0x3bc   : > { %1480 = vmatmul.bf16.gmra.mxu2 %v1229_v15  ;;  %1509 = vmatmul.bf16.gmra.mxu3 %v1229_v15 }
 0x3bd   : > { %1764 = vmatpush.bf16.msra.mxu0 %v3603_v18 }
 0x3be   : > { %1793 = vmatpush.bf16.msrb.mxu1 %v3635_v57 }
 0x3c1   : > { %1765 = vmatpush.bf16.msra.mxu0 %v3599_v27 }
 0x3c2   : > { %1794 = vmatpush.bf16.msrb.mxu1 %v3631_v30 }
 0x408   : > { %v1408_v34 = vpop.f32.mrf.mxu0  ;;  %v1437_v41 = vpop.f32.mrf.mxu1 }
 0x409   : > { %v1409_v43 = vadd.f32 %v1408_v34, %v5437_v42  ;;  %v1438_v44 = vadd.f32 %v1437_v41, %v5439_v36 }
 0x40b   : > { %v1515_v56 = vmax.f32 %v1409_v43, 0.0  ;;  %v1516_v58 = vmax.f32 %v1438_v44, 0.0 }
 0x40f   : > { %v1466_v45 = vpop.f32.mrf.mxu2  ;;  %v1495_v38 = vpop.f32.mrf.mxu3 }
 0x410   : > { %v1410_v46 = vpop.f32.mrf.mxu0  ;;  %v1439_v47 = vpop.f32.mrf.mxu1  ;;  %v1467_v15 = vadd.f32 %v1466_v45, %v5445_v55  ;;  %v1496_v6 = vadd.f32 %v1495_v38, %v5447_v60 }
 0x411   : > { %v1411_v40 = vadd.f32 %v1410_v46, %v5437_v42  ;;  %v1440_v52 = vadd.f32 %v1439_v47, %v5439_v36  ;;  %v3814_v47 = vld [vmem:[%s6709_s4 + $0x3a4] sm:$0xf] }
 0x412   : > { %v1517_v13 = vmax.f32 %v1467_v15, 0.0  ;;  %v1518_v14 = vmax.f32 %v1496_v6, 0.0 }
 0x413   : > { %v1519_v61 = vmax.f32 %v1411_v40, 0.0  ;;  %v1520_v0 = vmax.f32 %v1440_v52, 0.0  ;;  %v4236_v40 = vld [vmem:[%s6709_s4 + $0x3e0] sm:$0xf0] }
 0x414   : > { %v3806_v52 = vld [vmem:[%s6709_s4 + $0x324] sm:$0xf] }
 0x415   : > { %v1547_v4 = vpack.c.bf16 %v1519_v61, %v1515_v56  ;;  %v1548_v48 = vpack.c.bf16 %v1520_v0, %v1516_v58 }
 0x417   : > { %v1468_v19 = vpop.f32.mrf.mxu2  ;;  %v1497_v1 = vpop.f32.mrf.mxu3  ;;  %1766 = vmatmul.bf16.vlgmr.msra.gmra.mxu0 %v1547_v4  ;;  %1795 = vmatmul.bf16.vlgmr.msrb.gmra.mxu1 %v1548_v48  ;;  %v3815_v4 = vor.u32 %v4236_v40, %v3814_v47  ;;  %v4234_v48 = vld [vmem:[%s6709_s4 + $0x360] sm:$0xf0] }
 0x418   : > { %v1469_v7 = vadd.f32 %v1468_v19, %v5445_v55  ;;  %v1498_v10 = vadd.f32 %v1497_v1, %v5447_v60  ;;  %v1413_v11 = vpop.f32.mrf.mxu0  ;;  %v1442_v12 = vpop.f32.mrf.mxu1 }
 0x419   : > { %v1414_v20 = vadd.f32 %v1413_v11, %v5437_v42  ;;  %v1443_v57 = vadd.f32 %v1442_v12, %v5439_v36  ;;  %2109 = vmatpush.bf16.msra.mxu1 %v3815_v4  ;;  %v4232_v11 = vld [vmem:[%s6709_s4 + $0x2e0] sm:$0xf0] }
 0x41a   : > { %v1521_v16 = vmax.f32 %v1469_v7, 0.0  ;;  %v1522_v17 = vmax.f32 %v1498_v10, 0.0  ;;  %v3807_v7 = vor.u32 %v4234_v48, %v3806_v52  ;;  %v3798_v10 = vld [vmem:[%s6709_s4 + $0x2a4] sm:$0xf] }
 0x41b   : > { %v1523_v24 = vmax.f32 %v1414_v20, 0.0  ;;  %v1524_v25 = vmax.f32 %v1443_v57, 0.0 }
 0x41c   : > { %v1549_v18 = vpack.c.bf16 %v1521_v16, %v1517_v13  ;;  %v1550_v62 = vpack.c.bf16 %v1522_v17, %v1518_v14 }
 0x41d   : > { %2110 = vmatpush.bf16.msra.mxu1 %v3807_v7  ;;  %v4235_v7 = vld [vmem:[%s6709_s4 + $0x3a8] sm:$0xf] }
 0x41e   : > { %1824 = vmatmul.bf16.vlgmr.msrb.gmra.mxu2 %v1549_v18  ;;  %1853 = vmatmul.bf16.vlgmr.msrb.gmra.mxu3 %v1550_v62  ;;  %v3799_v62 = vor.u32 %v4232_v11, %v3798_v10  ;;  %v3816_v10 = vld [vmem:[%s6709_s4 + $0x3e4] sm:$0xf0] }
 0x41f   : > { %v1471_v21 = vpop.f32.mrf.mxu2  ;;  %v1500_v63 = vpop.f32.mrf.mxu3  ;;  %v3819_v11 = vor.u32 %v4235_v7, %v3816_v10  ;;  %v1906_v7 = vld [vmem:[%s5593_s19] sm:$0xff] }
 0x420   : > { %v1415_v2 = vpop.f32.mrf.mxu0  ;;  %v1444_v22 = vpop.f32.mrf.mxu1  ;;  %v1472_v53 = vadd.f32 %v1471_v21, %v5445_v55  ;;  %v1501_v54 = vadd.f32 %v1500_v63, %v5447_v60  ;;  %v3790_v21 = vld [vmem:[%s6709_s4 + $0x224] sm:$0xf] }
 0x421   : > { %v1416_v23 = vadd.f32 %v1415_v2, %v5437_v42  ;;  %v1445_v8 = vadd.f32 %v1444_v22, %v5439_v36  ;;  %v4230_v63 = vld [vmem:[%s6709_s4 + $0x260] sm:$0xf0]  ;;  %2111 = vmatpush.bf16.msra.mxu1 %v3799_v62  ;;  %2138 = vmatpush.bf16.msra.mxu2 %v3819_v11 }
 0x422   : > { %v1525_v41 = vmax.f32 %v1472_v53, 0.0  ;;  %v1526_v43 = vmax.f32 %v1501_v54, 0.0 }
 0x423   : > { %v1527_v26 = vmax.f32 %v1416_v23, 0.0  ;;  %v1528_v27 = vmax.f32 %v1445_v8, 0.0 }
 0x425   : > { %v1551_v30 = vpack.c.bf16 %v1527_v26, %v1523_v24  ;;  %v1552_v31 = vpack.c.bf16 %v1528_v27, %v1524_v25  ;;  %v3791_v26 = vor.u32 %v4230_v63, %v3790_v21  ;;  %v4227_v63 = vld [vmem:[%s6709_s4 + $0x1a8] sm:$0xf] }
 0x427   : > { %v1473_v32 = vpop.f32.mrf.mxu2  ;;  %v1502_v33 = vpop.f32.mrf.mxu3  ;;  %1771 = vmatmul.bf16.gmra.mxu0 %v1551_v30  ;;  %1800 = vmatmul.bf16.gmra.mxu1 %v1552_v31 }
 0x428   : > { %v1474_v35 = vadd.f32 %v1473_v32, %v5445_v55  ;;  %v1503_v37 = vadd.f32 %v1502_v33, %v5447_v60  ;;  %v1418_v39 = vpop.f32.mrf.mxu0  ;;  %v1447_v34 = vpop.f32.mrf.mxu1  ;;  %2112 = vmatpush.bf16.msra.mxu1 %v3791_v26  ;;  %v3776_v26 = vld [vmem:[%s6709_s4 + $0x164] sm:$0xf0] }
 0x429   : > { %v1419_v56 = vadd.f32 %v1418_v39, %v5437_v42  ;;  %v1448_v58 = vadd.f32 %v1447_v34, %v5439_v36 }
 0x42a   : > { %v1529_v44 = vmax.f32 %v1474_v35, 0.0  ;;  %v1530_v45 = vmax.f32 %v1503_v37, 0.0 }
 0x42b   : > { %v1531_v12 = vmax.f32 %v1419_v56, 0.0  ;;  %v1532_v13 = vmax.f32 %v1448_v58, 0.0 }
 0x42c   : > { %v1554_v38 = vpack.c.bf16 %v1530_v45, %v1526_v43  ;;  %v1553_v46 = vpack.c.bf16 %v1529_v44, %v1525_v41 }
 0x42e   : > { %1829 = vmatmul.bf16.gmra.mxu2 %v1553_v46  ;;  %1858 = vmatmul.bf16.gmra.mxu3 %v1554_v38 }
 0x42f   : > { %v1476_v61 = vpop.f32.mrf.mxu2  ;;  %v1505_v0 = vpop.f32.mrf.mxu3 }
 0x430   : > { %v1420_v15 = vpop.f32.mrf.mxu0  ;;  %v1449_v6 = vpop.f32.mrf.mxu1  ;;  %v1477_v20 = vadd.f32 %v1476_v61, %v5445_v55  ;;  %v1506_v57 = vadd.f32 %v1505_v0, %v5447_v60 }
 0x431   : > { %v1421_v19 = vadd.f32 %v1420_v15, %v5437_v42  ;;  %v1450_v1 = vadd.f32 %v1449_v6, %v5439_v36 }
 0x432   : > { %v1533_v27 = vmax.f32 %v1477_v20, 0.0  ;;  %v1534_v30 = vmax.f32 %v1506_v57, 0.0  ;;  %v4229_v20 = vld [vmem:[%s6709_s4 + $0x228] sm:$0xf] }
 0x433   : > { %v1535_v14 = vmax.f32 %v1421_v19, 0.0  ;;  %v1536_v16 = vmax.f32 %v1450_v1, 0.0  ;;  %v3792_v57 = vld [vmem:[%s6709_s4 + $0x264] sm:$0xf0] }
 0x434   : > { %v3795_v21 = vor.u32 %v4229_v20, %v3792_v57  ;;  %v1907_v20 = vld [vmem:[%s5593_s19 + $0x8] sm:$0xff] }
 0x435   : > { %v1555_v17 = vpack.c.bf16 %v1535_v14, %v1531_v12  ;;  %v1556_v18 = vpack.c.bf16 %v1536_v16, %v1532_v13  ;;  %v4233_v13 = vld [vmem:[%s6709_s4 + $0x328] sm:$0xf] }
 0x436   : > { %v3808_v14 = vld [vmem:[%s6709_s4 + $0x364] sm:$0xf0] }
 0x437   : > { %v1478_v2 = vpop.f32.mrf.mxu2  ;;  %v1507_v22 = vpop.f32.mrf.mxu3  ;;  %1776 = vmatmul.bf16.gmra.mxu0 %v1555_v17  ;;  %1805 = vmatmul.bf16.gmra.mxu1 %v1556_v18  ;;  %v3811_v16 = vor.u32 %v4233_v13, %v3808_v14  ;;  %v4231_v17 = vld [vmem:[%s6709_s4 + $0x2a8] sm:$0xf] }
 0x438   : > { %v1479_v23 = vadd.f32 %v1478_v2, %v5445_v55  ;;  %v1508_v8 = vadd.f32 %v1507_v22, %v5447_v60  ;;  %v1423_v24 = vpop.f32.mrf.mxu0  ;;  %v1452_v25 = vpop.f32.mrf.mxu1  ;;  %v3800_v18 = vld [vmem:[%s6709_s4 + $0x2e4] sm:$0xf0] }
 0x439   : > { %v1424_v33 = vadd.f32 %v1423_v24, %v5437_v42  ;;  %v1453_v35 = vadd.f32 %v1452_v25, %v5439_v36  ;;  %2139 = vmatpush.bf16.msra.mxu2 %v3811_v16  ;;  %v3803_v62 = vor.u32 %v4231_v17, %v3800_v18  ;;  %v3784_v2 = vld [vmem:[%s6709_s4 + $0x1e4] sm:$0xf0] }
 0x43a   : > { %v1537_v31 = vmax.f32 %v1479_v23, 0.0  ;;  %v1538_v53 = vmax.f32 %v1508_v8, 0.0  ;;  %v3787_v22 = vor.u32 %v4227_v63, %v3784_v2  ;;  %v3774_v23 = vld [vmem:[%s6709_s4 + $0x124] sm:$0xf]  ;;  %v4225_v25 = vld [vmem:[%s6709_s4 + $0x128] sm:$0xf] }
 0x43b   : > { %v1539_v45 = vmax.f32 %v1424_v33, 0.0  ;;  %v1540_v38 = vmax.f32 %v1453_v35, 0.0  ;;  %v4226_v8 = vld [vmem:[%s6709_s4 + $0x160] sm:$0xf0] }
 0x43c   : > { %v1558_v54 = vpack.c.bf16 %v1538_v53, %v1534_v30  ;;  %v1557_v32 = vpack.c.bf16 %v1537_v31, %v1533_v27  ;;  %v3775_v24 = vor.u32 %v4226_v8, %v3774_v23  ;;  %v3779_v27 = vor.u32 %v4225_v25, %v3776_v26  ;;  %v3766_v30 = vld [vmem:[%s6709_s4 + $0xa4] sm:$0xf]  ;;  %v4223_v53 = vld [vmem:[%s6709_s4 + $0xa8] sm:$0xf] }
 0x43d   : > { %2140 = vmatpush.bf16.msra.mxu2 %v3803_v62  ;;  %v4224_v31 = vld [vmem:[%s6709_s4 + $0xe0] sm:$0xf0] }
 0x43e   : > { %1834 = vmatmul.bf16.gmra.mxu2 %v1557_v32  ;;  %1863 = vmatmul.bf16.gmra.mxu3 %v1558_v54  ;;  %v3767_v54 = vor.u32 %v4224_v31, %v3766_v30  ;;  %v3768_v32 = vld [vmem:[%s6709_s4 + $0xe4] sm:$0xf0]  ;;  %v3758_v35 = vld [vmem:[%s6709_s4 + $0x24] sm:$0xf] }
 0x43f   : > { %v1481_v37 = vpop.f32.mrf.mxu2  ;;  %v1510_v39 = vpop.f32.mrf.mxu3  ;;  %v3771_v33 = vor.u32 %v4223_v53, %v3768_v32 }
 0x440   : > { %v1425_v34 = vpop.f32.mrf.mxu0  ;;  %v1454_v41 = vpop.f32.mrf.mxu1  ;;  %v1482_v56 = vadd.f32 %v1481_v37, %v5445_v55  ;;  %v1511_v58 = vadd.f32 %v1510_v39, %v5447_v60  ;;  %v4222_v37 = vld [vmem:[%s6709_s4 + $0x60] sm:$0xf0] }
 0x441   : > { %v1426_v43 = vadd.f32 %v1425_v34, %v5437_v42  ;;  %v1455_v44 = vadd.f32 %v1454_v41, %v5439_v36  ;;  %2141 = vmatpush.bf16.msra.mxu2 %v3795_v21  ;;  %v3759_v39 = vor.u32 %v4222_v37, %v3758_v35  ;;  %v4221_v34 = vld [vmem:[%s6709_s4 + $0x28] sm:$0xf] }
 0x442   : > { %v1541_v48 = vmax.f32 %v1482_v56, 0.0  ;;  %v1542_v36 = vmax.f32 %v1511_v58, 0.0  ;;  %v3760_v41 = vld [vmem:[%s6709_s4 + $0x64] sm:$0xf0] }
 0x443   : > { %v1543_v46 = vmax.f32 %v1426_v43, 0.0  ;;  %v1544_v47 = vmax.f32 %v1455_v44, 0.0 }
 0x445   : > { %v1560_v40 = vpack.c.bf16 %v1544_v47, %v1540_v38  ;;  %v1559_v52 = vpack.c.bf16 %v1543_v46, %v1539_v45  ;;  %2142 = vmatpush.bf16.msra.mxu2 %v3787_v22  ;;  %v3763_v45 = vor.u32 %v4221_v34, %v3760_v41  ;;  %v5576_v38 = vld [vmem:[%s6711_s6 + $0xa] ss:$0 sm:$0xff] }
 0x447   : > { %v1483_v61 = vpop.f32.mrf.mxu2  ;;  %v1512_v0 = vpop.f32.mrf.mxu3  ;;  %1781 = vmatmul.bf16.gmra.mxu0 %v1559_v52  ;;  %1810 = vmatmul.bf16.gmra.mxu1 %v1560_v40 }
 0x448   : > { %v1484_v4 = vadd.f32 %v1483_v61, %v5445_v55  ;;  %v1513_v42 = vadd.f32 %v1512_v0, %v5447_v60  ;;  %v3782_v55 = vld [vmem:[%s6709_s4 + $0x1a4] sm:$0xf] }
 0x449   : > { %v4228_v60 = vld [vmem:[%s6709_s4 + $0x1e0] sm:$0xf0]  ;;  %2143 = vmatpush.bf16.msra.mxu2 %v3779_v27 }
 0x44a   : > { %v1545_v15 = vmax.f32 %v1484_v4, 0.0  ;;  %v1546_v6 = vmax.f32 %v1513_v42, 0.0  ;;  %v3783_v12 = vor.u32 %v4228_v60, %v3782_v55  ;;  %v5583_v42 = vld [vmem:[%s6711_s6 + $0xb] ss:$0 sm:$0xff] }
 0x44c   : > { %v1561_v19 = vpack.c.bf16 %v1545_v15, %v1541_v48  ;;  %v1562_v1 = vpack.c.bf16 %v1546_v6, %v1542_v36  ;;  %2113 = vmatpush.bf16.msra.mxu1 %v3783_v12  ;;  %v5599_v6 = vld [vmem:[%s6711_s6 + $0xc] ss:$0 sm:$0xff] }
 0x44d   : > { %2144 = vmatpush.bf16.msra.mxu2 %v3771_v33 }
 0x44e   : > { %1839 = vmatmul.bf16.gmra.mxu2 %v1561_v19  ;;  %1868 = vmatmul.bf16.gmra.mxu3 %v1562_v1 }
 0x450   : > { %2114 = vmatpush.bf16.msra.mxu1 %v3775_v24 }
 0x451   : > { %2145 = vmatpush.bf16.msra.mxu2 %v3763_v45 }
 0x454   : > { %2115 = vmatpush.bf16.msra.mxu1 %v3767_v54  ;;  %v1908_v54 = vld [vmem:[%s5593_s19 + $0x10] sm:$0xff] }
 0x458   : > { %2116 = vmatpush.bf16.msra.mxu1 %v3759_v39 }
 0x494   : > { %v1767_v43 = vpop.f32.mrf.mxu0  ;;  %v1796_v44 = vpop.f32.mrf.mxu1 }
 0x495   : > { %v1768_v46 = vadd.f32 %v5576_v38, %v1767_v43 }
 0x497   : > { %v1797_v52 = vadd.f32 %v1796_v44, %v1768_v46  ;;  %v1909_v46 = vld [vmem:[%s5593_s19 + $0x18] sm:$0xff] }
 0x49c   : > { %v1769_v47 = vpop.f32.mrf.mxu0  ;;  %v1798_v40 = vpop.f32.mrf.mxu1 }
 0x49d   : > { %v1770_v0 = vadd.f32 %v5576_v38, %v1769_v47 }
 0x49f   : > { %v1799_v19 = vadd.f32 %v1798_v40, %v1770_v0 }
 0x4a1   : > { %v1825_v56 = vpop.f32.mrf.mxu2  ;;  %v1854_v58 = vpop.f32.mrf.mxu3 }
 0x4a2   : > { %v1826_v61 = vadd.f32 %v1825_v56, %v1797_v52 }
 0x4a4   : > { %v1855_v4 = vadd.f32 %v1854_v58, %v1826_v61  ;;  %v1772_v48 = vpop.f32.mrf.mxu0  ;;  %v1801_v36 = vpop.f32.mrf.mxu1 }
 0x4a5   : > { %v1773_v13 = vadd.f32 %v5576_v38, %v1772_v48 }
 0x4a6   : > { %v1874_v15 = vadd.f32 %v1855_v4, %v5193_v49 }
 0x4a7   : > { %v1802_v18 = vadd.f32 %v1801_v36, %v1773_v13 }
 0x4a8   : > { %v1886_v1 = vmul.f32 %v5583_v42, %v1874_v15  ;;  %v3754_v15 = vld [vmem:[%s6709_s4 + $0x3a0] sm:$0xf] }
 0x4a9   : > { %v1827_v10 = vpop.f32.mrf.mxu2  ;;  %v1856_v55 = vpop.f32.mrf.mxu3 }
 0x4aa   : > { %v1898_v60 = vadd.f32 %v5599_v6, %v1886_v1  ;;  %v1828_v11 = vadd.f32 %v1827_v10, %v1799_v19  ;;  %v4220_v19 = vld [vmem:[%s6709_s4 + $0x3dc] sm:$0xf0] }
 0x4ab   : > { %v1910_v10 = vld [vmem:[%s5593_s19 + $0x20] sm:$0xff] }
 0x4ac   : > { %v1914_v12 = vadd.f32 %v1906_v7, %v1898_v60  ;;  %v1857_v49 = vadd.f32 %v1856_v55, %v1828_v11  ;;  %v1774_v14 = vpop.f32.mrf.mxu0  ;;  %v1803_v17 = vpop.f32.mrf.mxu1  ;;  %v3755_v55 = vor.u32 %v4220_v19, %v3754_v15  ;;  %v4219_v60 = vld [vmem:[%s6709_s4 + $0x35c] sm:$0xf0] }
 0x4ad   : > { %v1775_v23 = vadd.f32 %v5576_v38, %v1774_v14 }
 0x4ae   : > { %3141 = vst [vmem:[%s5606_s29] sm:$0xff] %v1914_v12  ;;  %v1875_v16 = vadd.f32 %v1857_v49, %v5196_v3  ;;  %1990 = vmatpush.bf16.msrb.mxu0 %v3755_v55 }
 0x4af   : > { %v1804_v26 = vadd.f32 %v1803_v17, %v1775_v23  ;;  %v3746_v17 = vld [vmem:[%s6709_s4 + $0x2a0] sm:$0xf] }
 0x4b0   : > { %v1887_v62 = vmul.f32 %v5583_v42, %v1875_v16  ;;  %v4217_v23 = vld [vmem:[%s6709_s4 + $0x25c] sm:$0xf0] }
 0x4b1   : > { %v1830_v57 = vpop.f32.mrf.mxu2  ;;  %v1859_v21 = vpop.f32.mrf.mxu3 }
 0x4b2   : > { %v1899_v63 = vadd.f32 %v5599_v6, %v1887_v62  ;;  %v1831_v2 = vadd.f32 %v1830_v57, %v1802_v18  ;;  %v4218_v18 = vld [vmem:[%s6709_s4 + $0x2dc] sm:$0xf0] }
 0x4b3   : > { %v3747_v57 = vor.u32 %v4218_v18, %v3746_v17  ;;  %v5749_v17 = vld [vmem:[%s6713_s8 + $0x258] sm:$0xff] }
 0x4b4   : > { %v1915_v22 = vadd.f32 %v1907_v20, %v1899_v63  ;;  %v1860_v8 = vadd.f32 %v1859_v21, %v1831_v2  ;;  %v1777_v24 = vpop.f32.mrf.mxu0  ;;  %v1806_v30 = vpop.f32.mrf.mxu1  ;;  %v5754_v18 = vld [vmem:[%s6713_s8 + $0x18] sm:$0xff] }
 0x4b5   : > { %v1778_v35 = vadd.f32 %v5576_v38, %v1777_v24 }
 0x4b6   : > { %v2003_v25 = vpack.c.bf16 %v1915_v22, %v1914_v12  ;;  %3142 = vst [vmem:[%s5606_s29 + $0x8] sm:$0xff] %v1915_v22  ;;  %v1876_v3 = vadd.f32 %v1860_v8, %v5207_v28  ;;  %v3742_v22 = vld [vmem:[%s6709_s4 + $0x220] sm:$0xf] }
 0x4b7   : > { %v1807_v41 = vadd.f32 %v1806_v30, %v1778_v35 }
 0x4b8   : > { %v1888_v27 = vmul.f32 %v5583_v42, %v1876_v3  ;;  %2117 = vmatmul.bf16.vlgmr.msra.gmra.mxu1 %v2003_v25  ;;  %2146 = vmatmul.bf16.vlgmr.msra.gmra.mxu2 %v2003_v25  ;;  %v1911_v25 = vld [vmem:[%s5593_s19 + $0x28] sm:$0xff] }
 0x4b9   : > { %v1832_v31 = vpop.f32.mrf.mxu2  ;;  %v1861_v53 = vpop.f32.mrf.mxu3 }
 0x4ba   : > { %v1900_v32 = vadd.f32 %v5599_v6, %v1888_v27  ;;  %v1833_v33 = vadd.f32 %v1832_v31, %v1804_v26  ;;  %v3743_v26 = vor.u32 %v4217_v23, %v3742_v22  ;;  %v520_v22 = vld [vmem:[%s6713_s8 + $0x2a8] sm:$0xff] }
 0x4bc   : > { %v1862_v37 = vadd.f32 %v1861_v53, %v1833_v33  ;;  %v1779_v39 = vpop.f32.mrf.mxu0  ;;  %v1916_v34 = vadd.f32 %v1908_v54, %v1900_v32  ;;  %v1808_v52 = vpop.f32.mrf.mxu1  ;;  %v3738_v53 = vld [vmem:[%s6709_s4 + $0x1a0] sm:$0xf] }
 0x4bd   : > { %v1780_v56 = vadd.f32 %v5576_v38, %v1779_v39  ;;  %v4216_v54 = vld [vmem:[%s6709_s4 + $0x1dc] sm:$0xf0] }
 0x4be   : > { %v1877_v28 = vadd.f32 %v1862_v37, %v5210_v29  ;;  %3143 = vst [vmem:[%s5606_s29 + $0x10] sm:$0xff] %v1916_v34  ;;  %v3739_v37 = vor.u32 %v4216_v54, %v3738_v53 }
 0x4bf   : > { %v1809_v48 = vadd.f32 %v1808_v52, %v1780_v56  ;;  %v3730_v52 = vld [vmem:[%s6709_s4 + $0xa0] sm:$0xf] }
 0x4c0   : > { %v1889_v43 = vmul.f32 %v5583_v42, %v1877_v28  ;;  %v4215_v28 = vld [vmem:[%s6709_s4 + $0x15c] sm:$0xf0] }
 0x4c1   : > { %v1835_v44 = vpop.f32.mrf.mxu2  ;;  %v1864_v45 = vpop.f32.mrf.mxu3  ;;  %v4214_v56 = vld [vmem:[%s6709_s4 + $0xdc] sm:$0xf0] }
 0x4c2   : > { %v1901_v47 = vadd.f32 %v5599_v6, %v1889_v43  ;;  %v1836_v40 = vadd.f32 %v1835_v44, %v1807_v41  ;;  %v1912_v41 = vld [vmem:[%s5593_s19 + $0x30] sm:$0xff] }
 0x4c4   : > { %v1865_v58 = vadd.f32 %v1864_v45, %v1836_v40  ;;  %v1917_v61 = vadd.f32 %v1909_v46, %v1901_v47  ;;  %v1782_v29 = vpop.f32.mrf.mxu0  ;;  %v1811_v62 = vpop.f32.mrf.mxu1 }
 0x4c5   : > { %v1783_v49 = vadd.f32 %v5576_v38, %v1782_v29  ;;  %v3726_v29 = vld [vmem:[%s6709_s4 + $0x20] sm:$0xf] }
 0x4c6   : > { %v1878_v0 = vadd.f32 %v1865_v58, %v5308_v50  ;;  %v2004_v4 = vpack.c.bf16 %v1917_v61, %v1916_v34  ;;  %3144 = vst [vmem:[%s5606_s29 + $0x18] sm:$0xff] %v1917_v61  ;;  %v3750_v50 = vld [vmem:[%s6709_s4 + $0x320] sm:$0xf]  ;;  %v3731_v61 = vor.u32 %v4214_v56, %v3730_v52  ;;  %v472_v56 = vld [vmem:[%s6713_s8 + $0x68] sm:$0xff] }
 0x4c7   : > { %v3751_v13 = vor.u32 %v4219_v60, %v3750_v50  ;;  %v1812_v21 = vadd.f32 %v1811_v62, %v1783_v49  ;;  %v3734_v34 = vld [vmem:[%s6709_s4 + $0x120] sm:$0xf]  ;;  %v524_v49 = vld [vmem:[%s6713_s8 + $0x2d8] sm:$0xff] }
 0x4c8   : > { %v1890_v36 = vmul.f32 %v5583_v42, %v1878_v0  ;;  %2122 = vmatmul.bf16.gmra.mxu1 %v2004_v4  ;;  %2151 = vmatmul.bf16.gmra.mxu2 %v2004_v4  ;;  %v3735_v46 = vor.u32 %v4215_v28, %v3734_v34  ;;  %v4213_v4 = vld [vmem:[%s6709_s4 + $0x5c] sm:$0xf0]  ;;  %v5759_v62 = vld [vmem:[%s6713_s8 + $0x198] sm:$0xff]  ;;  %v480_v28 = vld [vmem:[%s6713_s8 + $0xc8] sm:$0xff] }
 0x4c9   : > { %v1837_v1 = vpop.f32.mrf.mxu2  ;;  %v1866_v7 = vpop.f32.mrf.mxu3  ;;  %1991 = vmatpush.bf16.msrb.mxu0 %v3751_v13  ;;  %v3727_v15 = vor.u32 %v4213_v4, %v3726_v29  ;;  %v5723_v60 = vld [vmem:[%s6713_s8 + $0x240] sm:$0xff]  ;;  %v492_v13 = vld [vmem:[%s6713_s8 + $0x158] sm:$0xff] }
 0x4ca   : > { %v1902_v11 = vadd.f32 %v5599_v6, %v1890_v36  ;;  %v1838_v12 = vadd.f32 %v1837_v1, %v1809_v48  ;;  %v1913_v48 = vld [vmem:[%s5593_s19 + $0x38] sm:$0xff]  ;;  %v514_v34 = vld [vmem:[%s6713_s8 + $0x260] sm:$0xff]  ;;  %s4440_s19 = scalar_lea.hbm %s6714_s9, 128 }
 0x4cb   : > { %v506_v52 = vld [vmem:[%s6713_s8 + $0x200] sm:$0xff]  ;;  %v468_v4 = vld [vmem:[%s6713_s8 + $0x38] sm:$0xff] }
 0x4cc   : > { %v1867_v14 = vadd.f32 %v1866_v7, %v1838_v12  ;;  %v1918_v16 = vadd.f32 %v1910_v10, %v1902_v11  ;;  %v1784_v2 = vpop.f32.mrf.mxu0  ;;  %v1813_v35 = vpop.f32.mrf.mxu1  ;;  %v494_v7 = vld [vmem:[%s6713_s8 + $0x170] sm:$0xff]  ;;  %v5728_v11 = vld [vmem:[%s6713_s8] sm:$0xff] }
 0x4cd   : > { %1992 = vmatpush.bf16.msrb.mxu0 %v3747_v57  ;;  %v1785_v27 = vadd.f32 %v5576_v38, %v1784_v2  ;;  %v526_v10 = vld [vmem:[%s6713_s8 + $0x2f0] sm:$0xff]  ;;  %2299 = vmatpush.msrb.mxu1 %v494_v7  ;;  %v5733_v12 = vld [vmem:[%s6713_s8 + $0x180] sm:$0xff] }
 0x4ce   : > { %v1879_v20 = vadd.f32 %v1867_v14, %v5311_v9  ;;  %3145 = vst [vmem:[%s5606_s29 + $0x20] sm:$0xff] %v1918_v16  ;;  %2319 = vmatpush.msrb.mxu2 %v526_v10  ;;  %v5744_v14 = vld [vmem:[%s6713_s8 + $0xd8] sm:$0xff]  ;;  %v490_v57 = vld [vmem:[%s6713_s8 + $0x140] sm:$0xff] }
 0x4cf   : > { %v1814_v39 = vadd.f32 %v1813_v35, %v1785_v27  ;;  %2300 = vmatpush.msrb.mxu1 %v492_v13  ;;  %v486_v27 = vld [vmem:[%s6713_s8 + $0x110] sm:$0xff]  ;;  %v484_v35 = vld [vmem:[%s6713_s8 + $0xf8] sm:$0xff] }
 0x4d0   : > { %v1891_v63 = vmul.f32 %v5583_v42, %v1879_v20  ;;  %2320 = vmatpush.msrb.mxu2 %v524_v49 }
 0x4d1   : > { %v1840_v8 = vpop.f32.mrf.mxu2  ;;  %v1869_v24 = vpop.f32.mrf.mxu3  ;;  %1993 = vmatpush.bf16.msrb.mxu0 %v3743_v26  ;;  %2301 = vmatpush.msrb.mxu1 %v490_v57  ;;  %v462_v57 = vld [vmem:[%s6713_s8 + $0x2d0] sm:$0xff] }
 0x4d2   : > { %v1903_v9 = vadd.f32 %v5599_v6, %v1891_v63  ;;  %v1841_v3 = vadd.f32 %v1840_v8, %v1812_v21  ;;  %v522_v21 = vld [vmem:[%s6713_s8 + $0x2c0] sm:$0xff]  ;;  %v488_v63 = vld [vmem:[%s6713_s8 + $0x128] sm:$0xff] }
 0x4d3   : > { %2321 = vmatpush.msrb.mxu2 %v522_v21  ;;  %2302 = vmatpush.msrb.mxu1 %v488_v63  ;;  %v447_v21 = vld [vmem:[%s6713_s8 + $0x168] sm:$0xff] }
 0x4d4   : > { %v1870_v30 = vadd.f32 %v1869_v24, %v1841_v3  ;;  %v1919_v31 = vadd.f32 %v1911_v25, %v1903_v9  ;;  %v463_v63 = vld [vmem:[%s6713_s8 + $0x2e8] sm:$0xff] }
 0x4d5   : > { %1994 = vmatpush.bf16.msrb.mxu0 %v3739_v37  ;;  %2322 = vmatpush.msrb.mxu2 %v520_v22 }
 0x4d6   : > { %v1880_v32 = vadd.f32 %v1870_v30, %v5361_v59  ;;  %v2005_v33 = vpack.c.bf16 %v1919_v31, %v1918_v16  ;;  %3146 = vst [vmem:[%s5606_s29 + $0x28] sm:$0xff] %v1919_v31  ;;  %v518_v30 = vld [vmem:[%s6713_s8 + $0x290] sm:$0xff]  ;;  %2303 = vmatpush.msrb.mxu1 %v486_v27 }
 0x4d7   : > { %2323 = vmatpush.msrb.mxu2 %v518_v30 }
 0x4d8   : > { %v1892_v38 = vmul.f32 %v5583_v42, %v1880_v32  ;;  %2127 = vmatmul.bf16.gmra.mxu1 %v2005_v33  ;;  %2156 = vmatmul.bf16.gmra.mxu2 %v2005_v33 }
 0x4d9   : > { %v1842_v59 = vpop.f32.mrf.mxu2  ;;  %v1871_v45 = vpop.f32.mrf.mxu3  ;;  %1995 = vmatpush.bf16.msrb.mxu0 %v3735_v46  ;;  %2304 = vmatpush.msrb.mxu1 %v484_v35  ;;  %v508_v46 = vld [vmem:[%s6713_s8 + $0x218] sm:$0xff] }
 0x4da   : > { %v1904_v43 = vadd.f32 %v5599_v6, %v1892_v38  ;;  %v1843_v44 = vadd.f32 %v1842_v59, %v1814_v39  ;;  %v516_v39 = vld [vmem:[%s6713_s8 + $0x278] sm:$0xff]  ;;  %v482_v38 = vld [vmem:[%s6713_s8 + $0xe0] sm:$0xff]  ;;  %v512_v59 = vld [vmem:[%s6713_s8 + $0x248] sm:$0xff] }
 0x4db   : > { %2324 = vmatpush.msrb.mxu2 %v516_v39  ;;  %2305 = vmatpush.msrb.mxu1 %v482_v38 }
 0x4dc   : > { %v1872_v47 = vadd.f32 %v1871_v45, %v1843_v44  ;;  %v1920_v40 = vadd.f32 %v1912_v41, %v1904_v43  ;;  %v478_v41 = vld [vmem:[%s6713_s8 + $0xb0] sm:$0xff]  ;;  %v476_v45 = vld [vmem:[%s6713_s8 + $0x98] sm:$0xff] }
 0x4dd   : > { %1996 = vmatpush.bf16.msrb.mxu0 %v3731_v61  ;;  %2325 = vmatpush.msrb.mxu2 %v514_v34  ;;  %v510_v43 = vld [vmem:[%s6713_s8 + $0x230] sm:$0xff] }
 0x4de   : > { %v1881_v58 = vadd.f32 %v1872_v47, %v5364_v5  ;;  %3147 = vst [vmem:[%s5606_s29 + $0x30] sm:$0xff] %v1920_v40  ;;  %2306 = vmatpush.msrb.mxu1 %v480_v28  ;;  %v470_v61 = vld [vmem:[%s6713_s8 + $0x50] sm:$0xff] }
 0x4df   : > { %2326 = vmatpush.msrb.mxu2 %v512_v59 }
 0x4e0   : > { %v1893_v0 = vmul.f32 %v5583_v42, %v1881_v58  ;;  %v5701_v42 = vld [vmem:[%s6711_s6 + $0xe] sm:$0x3]  ;;  %2307 = vmatpush.msrb.mxu1 %v478_v41 }
 0x4e1   : > { %1997 = vmatpush.bf16.msrb.mxu0 %v3727_v15  ;;  %v5704_v1 = vperm.slane %v5701_v42, 0  ;;  %2327 = vmatpush.msrb.mxu2 %v510_v43  ;;  %v504_v58 = vld [vmem:[%s6713_s8 + $0x1e8] sm:$0xff]  ;;  %v466_v15 = vld [vmem:[%s6713_s8 + $0x20] sm:$0xff]  ;;  %v2026_v30 = vperm.slane %v5701_v42, 1  ;;  %v461_v42 = vld [vmem:[%s6713_s8 + $0x2b8] sm:$0xff] }
 0x4e2   : > { %v1905_v36 = vadd.f32 %v5599_v6, %v1893_v0  ;;  %2308 = vmatpush.msrb.mxu1 %v476_v45  ;;  %v502_v0 = vld [vmem:[%s6713_s8 + $0x1d0] sm:$0xff]  ;;  %v445_v45 = vld [vmem:[%s6713_s8 + $0x138] sm:$0xff] }
 0x4e3   : > { %2328 = vmatpush.msrb.mxu2 %v508_v46 }
 0x4e4   : > { %v1921_v19 = vadd.f32 %v1913_v48, %v1905_v36  ;;  %1998 = vmatmul.bf16.vlgmr.msrb.gmra.mxu0 %v4745_v51  ;;  %v5716_v51 = vld [vmem:[%s6713_s8 + $0xc0] sm:$0xff]  ;;  %v500_v48 = vld [vmem:[%s6713_s8 + $0x1b8] sm:$0xff] }
 0x4e5   : > { %2329 = vmatpush.msrb.mxu2 %v506_v52 }
 0x4e6   : > { %v2006_v5 = vpack.c.bf16 %v1921_v19, %v1920_v40  ;;  %3148 = vst [vmem:[%s5606_s29 + $0x38] sm:$0xff] %v1921_v19  ;;  %v474_v40 = vld [vmem:[%s6713_s8 + $0x80] sm:$0xff] }
 0x4e7   : > { %2309 = vmatpush.msrb.mxu1 %v474_v40  ;;  %2330 = vmatpush.msrb.mxu2 %v504_v58  ;;  %v498_v19 = vld [vmem:[%s6713_s8 + $0x1a0] sm:$0xff] }
 0x4e8   : > { %2132 = vmatmul.bf16.gmra.mxu1 %v2006_v5  ;;  %2161 = vmatmul.bf16.gmra.mxu2 %v2006_v5  ;;  %v464_v5 = vld [vmem:[%s6713_s8 + $0x8] sm:$0xff]  ;;  %v444_v58 = vld [vmem:[%s6713_s8 + $0x120] sm:$0xff] }
 0x4e9   : > { %2310 = vmatpush.msrb.mxu1 %v472_v56  ;;  %2331 = vmatpush.msrb.mxu2 %v502_v0 }
 0x4eb   : > { %2311 = vmatpush.msrb.mxu1 %v470_v61  ;;  %2332 = vmatpush.msrb.mxu2 %v500_v48  ;;  %v460_v61 = vld [vmem:[%s6713_s8 + $0x2a0] sm:$0xff] }
 0x4ed   : > { %2312 = vmatpush.msrb.mxu1 %v468_v4  ;;  %2333 = vmatpush.msrb.mxu2 %v498_v19 }
 0x4ef   : > { %2313 = vmatpush.msrb.mxu1 %v466_v15 }
 0x4f1   : > { %2314 = vmatpush.msrb.mxu1 %v464_v5 }
 0x535   : > { %v2118_v50 = vpop.f32.mrf.mxu1 }
 0x536   : > { %v2119_v6 = vadd.f32 %v2118_v50, %v5704_v1  ;;  %v496_v50 = vld [vmem:[%s6713_s8 + $0x188] sm:$0xff] }
 0x537   : > { %2334 = vmatpush.msrb.mxu2 %v496_v50 }
 0x538   : > { %v5772_v2 = vmul.f32 %v2119_v6, %v5716_v51  ;;  %v5778_v23 = vmul.f32 %v2119_v6, %v5723_v60  ;;  %v5781_v8 = vmul.f32 %v2119_v6, %v5728_v11  ;;  %v5784_v24 = vmul.f32 %v2119_v6, %v5733_v12 }
 0x53b   : > { %v5718_v55 = vpop.f32.mrf.mxu2 }
 0x53d   : > { %v2120_v16 = vpop.f32.mrf.mxu1 }
 0x53e   : > { %v2121_v20 = vadd.f32 %v2120_v16, %v5704_v1  ;;  %v446_v16 = vld [vmem:[%s6713_s8 + $0x150] sm:$0xff] }
 0x540   : > { %v5787_v25 = vmul.f32 %v2121_v20, %v5744_v14  ;;  %v5790_v9 = vmul.f32 %v2121_v20, %v5749_v17  ;;  %v5793_v3 = vmul.f32 %v2121_v20, %v5754_v18  ;;  %v5796_v26 = vmul.f32 %v2121_v20, %v5759_v62 }
 0x542   : > { %v2203_v31 = vpack.c.bf16 %v5787_v25, %v5772_v2  ;;  %v2211_v53 = vpack.c.bf16 %v5790_v9, %v5778_v23  ;;  %v2199_v54 = vpack.c.bf16 %v5793_v3, %v5781_v8  ;;  %v2207_v32 = vpack.c.bf16 %v5796_v26, %v5784_v24  ;;  %v450_v2 = vld [vmem:[%s6713_s8 + $0x1b0] sm:$0xff]  ;;  %v493_v8 = vld [vmem:[%s6713_s8 + $0x160] sm:$0xff]  ;;  %v491_v3 = vld [vmem:[%s6713_s8 + $0x148] sm:$0xff] }
 0x543   : > { %v5812_v33 = vpop.f32.mrf.mxu2  ;;  %v525_v24 = vld [vmem:[%s6713_s8 + $0x2e0] sm:$0xff]  ;;  %v523_v26 = vld [vmem:[%s6713_s8 + $0x2c8] sm:$0xff] }
 0x545   : > { %v5817_v37 = vpop.f32.mrf.mxu1 }
 0x54b   : > { %v5840_v44 = vpop.f32.mrf.mxu2 }
 0x54d   : > { %v5848_v47 = vpop.f32.mrf.mxu1 }
 0x553   : > { %v2154_v29 = vpop.f32.mrf.mxu2 }
 0x554   : > { %v5941_v50 = vadd.f32 %v2154_v29, %v2026_v30 }
 0x555   : > { %v2128_v36 = vpop.f32.mrf.mxu1 }
 0x556   : > { %v5921_v46 = vadd.f32 %v2128_v36, %v5704_v1 }
 0x55b   : > { %v2157_v6 = vpop.f32.mrf.mxu2 }
 0x55c   : > { %v5933_v0 = vadd.f32 %v2157_v6, %v2026_v30 }
 0x55d   : > { %v2130_v7 = vpop.f32.mrf.mxu1 }
 0x55e   : > { %v5910_v28 = vadd.f32 %v2130_v7, %v5704_v1  ;;  %v2179_v7 = vmul.f32 %v5921_v46, %v444_v58  ;;  %v2227_v29 = vmul.f32 %v5933_v0, %v444_v58 }
 0x560   : > { %v2180_v4 = vmul.f32 %v5910_v28, %v445_v45  ;;  %v2196_v48 = vmul.f32 %v5910_v28, %v461_v42 }
 0x563   : > { %v2159_v10 = vpop.f32.mrf.mxu2 }
 0x564   : > { %v5923_v52 = vadd.f32 %v2159_v10, %v2026_v30  ;;  %v2195_v10 = vmul.f32 %v5921_v46, %v460_v61 }
 0x565   : > { %v2133_v13 = vpop.f32.mrf.mxu1 }
 0x566   : > { %v5890_v20 = vadd.f32 %v2133_v13, %v5704_v1 }
 0x568   : > { %v2181_v35 = vmul.f32 %v5890_v20, %v446_v16  ;;  %v2197_v39 = vmul.f32 %v5890_v20, %v462_v57 }
 0x56b   : > { %v2162_v49 = vpop.f32.mrf.mxu2 }
 0x56c   : > { %v5912_v59 = vadd.f32 %v2162_v49, %v2026_v30  ;;  %v2228_v49 = vmul.f32 %v5923_v52, %v445_v45  ;;  %v442_v45 = vld [vmem:[%s6713_s8 + $0xf0] sm:$0xff] }
 0x56d   : > { %v2135_v22 = vpop.f32.mrf.mxu1 }
 0x56e   : > { %v5902_v27 = vadd.f32 %v2135_v22, %v5704_v1  ;;  %v2229_v36 = vmul.f32 %v5912_v59, %v446_v16  ;;  %v2245_v15 = vmul.f32 %v5912_v59, %v462_v57  ;;  %v2244_v22 = vmul.f32 %v5923_v52, %v461_v42 }
 0x56f   : > { %v5948_v16 = vadd.f32 %v5840_v44, %v2026_v30  ;;  %v5952_v57 = vadd.f32 %v5848_v47, %v5704_v1  ;;  %v5964_v44 = vadd.f32 %v5817_v37, %v5704_v1  ;;  %v5975_v42 = vadd.f32 %v5718_v55, %v2026_v30  ;;  %v458_v37 = vld [vmem:[%s6713_s8 + $0x270] sm:$0xff] }
 0x570   : > { %v2182_v38 = vmul.f32 %v5902_v27, %v447_v21  ;;  %v2198_v34 = vmul.f32 %v5902_v27, %v463_v63 }
 0x571   : > { %v2225_v1 = vmul.f32 %v5948_v16, %v442_v45  ;;  %v2233_v23 = vmul.f32 %v5948_v16, %v450_v2 }
 0x572   : > { %v2206_v41 = vpack.c.bf16 %v2182_v38, %v2181_v35  ;;  %v2214_v43 = vpack.c.bf16 %v2198_v34, %v2197_v39  ;;  %v2243_v35 = vmul.f32 %v5933_v0, %v460_v61  ;;  %v443_v39 = vld [vmem:[%s6713_s8 + $0x108] sm:$0xff]  ;;  %v5960_v38 = vadd.f32 %v5812_v33, %v2026_v30 }
 0x573   : > { %v2164_v40 = vpop.f32.mrf.mxu2  ;;  %v2226_v47 = vmul.f32 %v5941_v50, %v443_v39  ;;  %v459_v34 = vld [vmem:[%s6713_s8 + $0x288] sm:$0xff]  ;;  %v2178_v58 = vmul.f32 %v5952_v57, %v443_v39 }
 0x574   : > { %v5925_v56 = vadd.f32 %v2164_v40, %v2026_v30  ;;  %2264 = vmatpush.bf16.xpose.msra.mxu3 %v2206_v41  ;;  %2277 = vmatpush.bf16.xpose.msra.mxu0 %v2214_v43  ;;  %v2253_v41 = vpack.c.bf16 %v2228_v49, %v2227_v29  ;;  %v2261_v43 = vpack.c.bf16 %v2244_v22, %v2243_v35  ;;  %v6002_v22 = vpop.f32.mrf.mxu0  ;;  %v454_v29 = vld [vmem:[%s6713_s8 + $0x210] sm:$0xff]  ;;  %v453_v35 = vld [vmem:[%s6713_s8 + $0x1f8] sm:$0xff] }
 0x575   : > { %v2242_v33 = vmul.f32 %v5941_v50, %v459_v34  ;;  %v2241_v40 = vmul.f32 %v5948_v16, %v458_v37  ;;  %v2194_v61 = vmul.f32 %v5952_v57, %v459_v34  ;;  %v2240_v55 = vmul.f32 %v5960_v38, %v5749_v17  ;;  %v439_v17 = vld [vmem:[%s6713_s8 + $0xa8] sm:$0xff] }
 0x576   : > { %v2230_v19 = vmul.f32 %v5925_v56, %v447_v21  ;;  %v2246_v5 = vmul.f32 %v5925_v56, %v463_v63  ;;  %v2205_v21 = vpack.c.bf16 %v2180_v4, %v2179_v7  ;;  %v2213_v63 = vpack.c.bf16 %v2196_v48, %v2195_v10 }
 0x577   : > { %v2224_v4 = vmul.f32 %v5960_v38, %v5744_v14  ;;  %v2252_v30 = vpack.c.bf16 %v2226_v47, %v2225_v1  ;;  %v2260_v48 = vpack.c.bf16 %v2242_v33, %v2241_v40  ;;  %v2239_v10 = vmul.f32 %v5975_v42, %v5723_v60  ;;  %v438_v60 = vld [vmem:[%s6713_s8 + $0x90] sm:$0xff]  ;;  %v435_v1 = vld [vmem:[%s6713_s8 + $0x48] sm:$0xff] }
 0x578   : > { %v2254_v6 = vpack.c.bf16 %v2230_v19, %v2229_v36  ;;  %v2262_v13 = vpack.c.bf16 %v2246_v5, %v2245_v15  ;;  %v2177_v36 = vmul.f32 %v5964_v44, %v442_v45  ;;  %v2193_v15 = vmul.f32 %v5964_v44, %v458_v37  ;;  %v451_v37 = vld [vmem:[%s6713_s8 + $0x1c8] sm:$0xff] }
 0x579   : > { %v2223_v19 = vmul.f32 %v5975_v42, %v5716_v51  ;;  %v2222_v51 = vmul.f32 %v5925_v56, %v439_v17  ;;  %v2174_v25 = vmul.f32 %v5902_v27, %v439_v17  ;;  %v2185_v17 = vmul.f32 %v5964_v44, %v450_v2  ;;  %v467_v2 = vld [vmem:[%s6713_s8 + $0x28] sm:$0xff] }
 0x57a   : > { %2387 = vmatpush.bf16.msra.mxu1 %v2254_v6  ;;  %2400 = vmatpush.bf16.msra.mxu2 %v2262_v13  ;;  %v2204_v5 = vpack.c.bf16 %v2178_v58, %v2177_v36  ;;  %v2212_v7 = vpack.c.bf16 %v2194_v61, %v2193_v15  ;;  %v455_v6 = vld [vmem:[%s6713_s8 + $0x228] sm:$0xff]  ;;  %v2259_v13 = vpack.c.bf16 %v2240_v55, %v2239_v10  ;;  %v434_v58 = vld [vmem:[%s6713_s8 + $0x30] sm:$0xff] }
 0x57b   : > { %v2251_v14 = vpack.c.bf16 %v2224_v4, %v2223_v19  ;;  %v2238_v49 = vmul.f32 %v5925_v56, %v455_v6  ;;  %v437_v56 = vld [vmem:[%s6713_s8 + $0x78] sm:$0xff]  ;;  %v2234_v61 = vmul.f32 %v5941_v50, %v451_v37  ;;  %v2217_v55 = vmul.f32 %v5948_v16, %v434_v58 }
 0x57c   : > { %2265 = vmatpush.bf16.xpose.msra.mxu3 %v2205_v21  ;;  %2278 = vmatpush.bf16.xpose.msra.mxu0 %v2213_v63  ;;  %v2221_v21 = vmul.f32 %v5912_v59, %v438_v60  ;;  %v2237_v63 = vmul.f32 %v5912_v59, %v454_v29  ;;  %v2220_v34 = vmul.f32 %v5923_v52, %v437_v56  ;;  %v452_v59 = vld [vmem:[%s6713_s8 + $0x1e0] sm:$0xff]  ;;  %v2001_v4 = vpop.f32.mrf.mxu0 }
 0x57d   : > { %v2235_v33 = vmul.f32 %v5933_v0, %v452_v59  ;;  %v2190_v9 = vmul.f32 %v5902_v27, %v455_v6  ;;  %v2189_v36 = vmul.f32 %v5890_v20, %v454_v29  ;;  %v2215_v15 = vmul.f32 %v5975_v42, %v5728_v11  ;;  %v517_v29 = vld [vmem:[%s6713_s8 + $0x280] sm:$0xff] }
 0x57e   : > { %2388 = vmatpush.bf16.msra.mxu1 %v2253_v41  ;;  %2401 = vmatpush.bf16.msra.mxu2 %v2261_v43  ;;  %v2250_v39 = vpack.c.bf16 %v2222_v51, %v2221_v21  ;;  %v2258_v47 = vpack.c.bf16 %v2238_v49, %v2237_v63  ;;  %v2236_v41 = vmul.f32 %v5923_v52, %v453_v35  ;;  %v436_v43 = vld [vmem:[%s6713_s8 + $0x60] sm:$0xff]  ;;  %v527_v51 = vld [vmem:[%s6713_s8 + $0x2f8] sm:$0xff]  ;;  %v483_v21 = vld [vmem:[%s6713_s8 + $0xe8] sm:$0xff] }
 0x57f   : > { %v2219_v45 = vmul.f32 %v5933_v0, %v436_v43  ;;  %v2218_v52 = vmul.f32 %v5941_v50, %v435_v1  ;;  %v2210_v19 = vpack.c.bf16 %v2190_v9, %v2189_v36  ;;  %v2231_v27 = vmul.f32 %v5975_v42, %v5733_v12  ;;  %v487_v49 = vld [vmem:[%s6713_s8 + $0x118] sm:$0xff]  ;;  %v515_v63 = vld [vmem:[%s6713_s8 + $0x268] sm:$0xff]  ;;  %v469_v4 = vld [vmem:[%s6713_s8 + $0x40] sm:$0xff] }
 0x580   : > { %v2257_v0 = vpack.c.bf16 %v2236_v41, %v2235_v33  ;;  %v2187_v11 = vmul.f32 %v5921_v46, %v452_v59  ;;  %v2170_v12 = vmul.f32 %v5952_v57, %v435_v1  ;;  %v2186_v42 = vmul.f32 %v5952_v57, %v451_v37  ;;  %v509_v41 = vld [vmem:[%s6713_s8 + $0x220] sm:$0xff]  ;;  %v507_v37 = vld [vmem:[%s6713_s8 + $0x208] sm:$0xff]  ;;  %v497_v9 = vld [vmem:[%s6713_s8 + $0x190] sm:$0xff] }
 0x581   : > { %v2249_v40 = vpack.c.bf16 %v2220_v34, %v2219_v45  ;;  %v2248_v50 = vpack.c.bf16 %v2218_v52, %v2217_v55  ;;  %v477_v34 = vld [vmem:[%s6713_s8 + $0xa0] sm:$0xff]  ;;  %v475_v52 = vld [vmem:[%s6713_s8 + $0x88] sm:$0xff] }
 0x582   : > { %2389 = vmatpush.bf16.msra.mxu1 %v2252_v30  ;;  %2402 = vmatpush.bf16.msra.mxu2 %v2260_v48  ;;  %v2256_v30 = vpack.c.bf16 %v2234_v61, %v2233_v23  ;;  %v2173_v48 = vmul.f32 %v5890_v20, %v438_v60  ;;  %v2188_v20 = vmul.f32 %v5910_v28, %v453_v35  ;;  %v485_v60 = vld [vmem:[%s6713_s8 + $0x100] sm:$0xff]  ;;  %v513_v35 = vld [vmem:[%s6713_s8 + $0x250] sm:$0xff]  ;;  %v503_v61 = vld [vmem:[%s6713_s8 + $0x1d8] sm:$0xff] }
 0x583   : > { %v501_v55 = vld [vmem:[%s6713_s8 + $0x1c0] sm:$0xff]  ;;  %v499_v23 = vld [vmem:[%s6713_s8 + $0x1a8] sm:$0xff] }
 0x584   : > { %2266 = vmatpush.bf16.xpose.msra.mxu3 %v2204_v5  ;;  %2279 = vmatpush.bf16.xpose.msra.mxu0 %v2212_v7  ;;  %v2202_v16 = vpack.c.bf16 %v2174_v25, %v2173_v48  ;;  %v2171_v5 = vmul.f32 %v5921_v46, %v436_v43  ;;  %v2209_v10 = vpack.c.bf16 %v2188_v20, %v2187_v11  ;;  %v465_v25 = vld [vmem:[%s6713_s8 + $0x10] sm:$0xff]  ;;  %v3842_v20 = vld [vmem:[%s6709_s4 + $0x2ac] sm:$0xf] }
 0x586   : > { %2390 = vmatpush.bf16.msra.mxu1 %v2251_v14  ;;  %2403 = vmatpush.bf16.msra.mxu2 %v2259_v13  ;;  %v2169_v14 = vmul.f32 %v5964_v44, %v434_v58  ;;  %v2208_v13 = vpack.c.bf16 %v2186_v42, %v2185_v17  ;;  %v495_v44 = vld [vmem:[%s6713_s8 + $0x178] sm:$0xff]  ;;  %v3834_v42 = vld [vmem:[%s6709_s4 + $0x1ac] sm:$0xf] }
 0x587   : > { %v471_v58 = vld [vmem:[%s6713_s8 + $0x58] sm:$0xff] }
 0x588   : > { %v2200_v6 = vpack.c.bf16 %v2170_v12, %v2169_v14  ;;  %v4240_v14 = vld [vmem:[%s6709_s4 + $0x1e8] sm:$0xf0] }
 0x58a   : > { %2391 = vmatpush.bf16.msra.mxu1 %v2250_v39  ;;  %2404 = vmatpush.bf16.msra.mxu2 %v2258_v47  ;;  %v479_v39 = vld [vmem:[%s6713_s8 + $0xb8] sm:$0xff] }
 0x58b   : > { %v511_v47 = vld [vmem:[%s6713_s8 + $0x238] sm:$0xff] }
 0x58c   : > { %2267 = vmatpush.bf16.xpose.msra.mxu3 %v2203_v31  ;;  %2280 = vmatpush.bf16.xpose.msra.mxu0 %v2211_v53  ;;  %v2216_v31 = vmul.f32 %v5960_v38, %v5754_v18  ;;  %v2232_v53 = vmul.f32 %v5960_v38, %v5759_v62  ;;  %v2172_v38 = vmul.f32 %v5910_v28, %v437_v56  ;;  %v4364_v28 = vld [vmem:[%s6711_s6 + $0xd] ss:$0 sm:$0xff]  ;;  %v481_v56 = vld [vmem:[%s6713_s8 + $0xd0] sm:$0xff] }
 0x58d   : > { %v2000_v46 = vadd.f32 %v4364_v28, %v6002_v22  ;;  %v519_v22 = vld [vmem:[%s6713_s8 + $0x298] sm:$0xff] }
 0x58e   : > { %2392 = vmatpush.bf16.msra.mxu1 %v2249_v40  ;;  %2405 = vmatpush.bf16.msra.mxu2 %v2257_v0  ;;  %v2247_v18 = vpack.c.bf16 %v2216_v31, %v2215_v15  ;;  %v2255_v62 = vpack.c.bf16 %v2232_v53, %v2231_v27  ;;  %v2201_v7 = vpack.c.bf16 %v2172_v38, %v2171_v5  ;;  %v473_v40 = vld [vmem:[%s6713_s8 + $0x70] sm:$0xff]  ;;  %v3846_v27 = vld [vmem:[%s6709_s4 + $0x32c] sm:$0xf] }
 0x58f   : > { %v2263_v57 = vpack.c.bf16 %v2000_v46, %v2000_v46  ;;  %v505_v0 = vld [vmem:[%s6713_s8 + $0x1f0] sm:$0xff]  ;;  %v4242_v5 = vld [vmem:[%s6709_s4 + $0x2e8] sm:$0xf0] }
 0x590   : > { %v3843_v11 = vor.u32 %v4242_v5, %v3842_v20 }
 0x592   : > { %2393 = vmatpush.bf16.msra.mxu1 %v2248_v50  ;;  %2406 = vmatpush.bf16.msra.mxu2 %v2256_v30 }
 0x594   : > { %2268 = vmatpush.bf16.xpose.msra.mxu3 %v2202_v16  ;;  %2281 = vmatpush.bf16.xpose.msra.mxu0 %v2210_v19  ;;  %v3850_v16 = vld [vmem:[%s6709_s4 + $0x3ac] sm:$0xf] }
 0x595   : > { %v4244_v19 = vld [vmem:[%s6709_s4 + $0x3e8] sm:$0xf0] }
 0x596   : > { %2394 = vmatpush.bf16.msra.mxu1 %v2247_v18  ;;  %2407 = vmatpush.bf16.msra.mxu2 %v2255_v62  ;;  %v3851_v18 = vor.u32 %v4244_v19, %v3850_v16  ;;  %v4243_v62 = vld [vmem:[%s6709_s4 + $0x368] sm:$0xf0] }
 0x597   : > { %v3847_v38 = vor.u32 %v4243_v62, %v3846_v27 }
 0x59c   : > { %2269 = vmatpush.bf16.xpose.msra.mxu3 %v2201_v7  ;;  %2282 = vmatpush.bf16.xpose.msra.mxu0 %v2209_v10  ;;  %v3838_v7 = vld [vmem:[%s6709_s4 + $0x22c] sm:$0xf] }
 0x59d   : > { %v4241_v10 = vld [vmem:[%s6709_s4 + $0x268] sm:$0xf0] }
 0x59e   : > { %v3839_v12 = vor.u32 %v4241_v10, %v3838_v7  ;;  %v3950_v7 = vld [vmem:[%s6709_s4 + $0x330] sm:$0xf] }
 0x59f   : > { %v4271_v10 = vld [vmem:[%s6709_s4 + $0x36c] sm:$0xf0] }
 0x5a4   : > { %2270 = vmatpush.bf16.xpose.msra.mxu3 %v2200_v6  ;;  %2283 = vmatpush.bf16.xpose.msra.mxu0 %v2208_v13  ;;  %v3835_v13 = vor.u32 %v4240_v14, %v3834_v42  ;;  %v3951_v42 = vor.u32 %v4271_v10, %v3950_v7  ;;  %v3952_v14 = vld [vmem:[%s6709_s4 + $0x370] sm:$0xf0] }
 0x5a5   : > { %v4249_v7 = vld [vmem:[%s6709_s4 + $0xb4] sm:$0xf] }
 0x5ac   : > { %2271 = vmatpush.bf16.xpose.msra.mxu3 %v2199_v54  ;;  %2284 = vmatpush.bf16.xpose.msra.mxu0 %v2207_v32  ;;  %v489_v54 = vld [vmem:[%s6713_s8 + $0x130] sm:$0xff] }
 0x5ad   : > { %v521_v32 = vld [vmem:[%s6713_s8 + $0x2b0] sm:$0xff] }
 0x5b3   : > { %2272 = vmatmul.bf16.vlgmr.msra.gmra.mxu3 %v2263_v57  ;;  %2285 = vmatmul.bf16.vlgmr.msra.gmra.mxu0 %v2263_v57 }
 0x5b4   : > { %2339 = vmatpush.msrb.mxu3 %v495_v44  ;;  %2359 = vmatpush.msrb.mxu0 %v527_v51 }
 0x5b6   : > { %2340 = vmatpush.msrb.mxu3 %v493_v8  ;;  %2360 = vmatpush.msrb.mxu0 %v525_v24 }
 0x5b8   : > { %2341 = vmatpush.msrb.mxu3 %v491_v3  ;;  %2361 = vmatpush.msrb.mxu0 %v523_v26 }
 0x5ba   : > { %2342 = vmatpush.msrb.mxu3 %v489_v54  ;;  %2362 = vmatpush.msrb.mxu0 %v521_v32 }
 0x5bc   : > { %2343 = vmatpush.msrb.mxu3 %v487_v49  ;;  %2363 = vmatpush.msrb.mxu0 %v519_v22  ;;  %v3830_v22 = vld [vmem:[%s6709_s4 + $0x12c] sm:$0xf] }
 0x5be   : > { %2344 = vmatpush.msrb.mxu3 %v485_v60  ;;  %2364 = vmatpush.msrb.mxu0 %v517_v29  ;;  %v4239_v60 = vld [vmem:[%s6709_s4 + $0x168] sm:$0xf0] }
 0x5bf   : > { %v3831_v29 = vor.u32 %v4239_v60, %v3830_v22  ;;  %v4266_v60 = vld [vmem:[%s6709_s4 + $0x2bc] sm:$0xf] }
 0x5c0   : > { %2345 = vmatpush.msrb.mxu3 %v483_v21  ;;  %2365 = vmatpush.msrb.mxu0 %v515_v63  ;;  %v3826_v21 = vld [vmem:[%s6709_s4 + $0xac] sm:$0xf] }
 0x5c1   : > { %v4238_v63 = vld [vmem:[%s6709_s4 + $0xe8] sm:$0xf0] }
 0x5c2   : > { %2346 = vmatpush.msrb.mxu3 %v481_v56  ;;  %2366 = vmatpush.msrb.mxu0 %v513_v35  ;;  %v3827_v56 = vor.u32 %v4238_v63, %v3826_v21  ;;  %v3822_v35 = vld [vmem:[%s6709_s4 + $0x2c] sm:$0xf]  ;;  %v3918_v63 = vld [vmem:[%s6709_s4 + $0x230] sm:$0xf] }
 0x5c4   : > { %2347 = vmatpush.msrb.mxu3 %v479_v39  ;;  %2367 = vmatpush.msrb.mxu0 %v511_v47  ;;  %v4237_v39 = vld [vmem:[%s6709_s4 + $0x68] sm:$0xf0] }
 0x5c5   : > { %v3823_v47 = vor.u32 %v4237_v39, %v3822_v35  ;;  %v4261_v35 = vld [vmem:[%s6709_s4 + $0x234] sm:$0xf] }
 0x5c6   : > { %2348 = vmatpush.msrb.mxu3 %v477_v34  ;;  %2368 = vmatpush.msrb.mxu0 %v509_v41 }
 0x5c8   : > { %2349 = vmatpush.msrb.mxu3 %v475_v52  ;;  %2369 = vmatpush.msrb.mxu0 %v507_v37 }
 0x5ca   : > { %2350 = vmatpush.msrb.mxu3 %v473_v40  ;;  %2370 = vmatpush.msrb.mxu0 %v505_v0  ;;  %v4419_v40 = vld [vmem:[%s4723_s12] sm:$0xff]  ;;  %s3167_s12 = scalar_lea.hbm %s6714_s9, %s4309_s21 }
 0x5cb   : > { %s3170_s18 = sshll.u32 %s3167_s12, 4  ;;  %s3171_s18 = int_to_ptr.hbm [resolvable:$true] %s3170_s18 }
 0x5cc   : > { %2351 = vmatpush.msrb.mxu3 %v471_v58  ;;  %2371 = vmatpush.msrb.mxu0 %v503_v61  ;;  %v4516_v61 = vmov 128.0   ;;  %s4434_s28 = sshra.s32 %s3171_s18, 4  ;;  %s4435_s28 = int_to_ptr.hbm [resolvable:$true] %s4434_s28 }
 0x5cd   : > { %s4436_s15 = scalar_lea.hbm %s4435_s28, 64  ;;  %p4441_p0 = scmp.lt.s32.totalorder %s4435_s28, %s6714_s9 }
 0x5ce   : > { %2352 = vmatpush.msrb.mxu3 %v469_v4  ;;  %2372 = vmatpush.msrb.mxu0 %v501_v55  ;;  %v3966_v4 = vld [vmem:[%s6709_s4 + $0x3b0] sm:$0xf]  ;;  %p4437_p11 = scmp.ne.s32.totalorder %s4435_s28, %s4436_s15  ;;  %p4442_p1 = scmp.lt.s32.totalorder %s4440_s19, %s4436_s15 }
 0x5cf   : > { %v4275_v55 = vld [vmem:[%s6709_s4 + $0x3ec] sm:$0xf0] }
 0x5d0   : > { %2353 = vmatpush.msrb.mxu3 %v467_v2  ;;  %2373 = vmatpush.msrb.mxu0 %v499_v23  ;;  %v4273_v2 = vld [vmem:[%s6709_s4 + $0x3b4] sm:$0xf]  ;;  %v3967_v23 = vor.u32 %v4275_v55, %v3966_v4  ;;  %v4260_v4 = vld [vmem:[%s6709_s4 + $0x1f4] sm:$0xf0]  ;;  %p4438_p12 = pnand %p4437_p11, %p4612_p5  ;;  %p4443_p2 = por %p4442_p1, %p4441_p0 }
 0x5d2   : > { %2354 = vmatpush.msrb.mxu3 %v465_v25  ;;  %2374 = vmatpush.msrb.mxu0 %v497_v9  ;;  %v3968_v25 = vld [vmem:[%s6709_s4 + $0x3f0] sm:$0xf0]  ;;  %v3974_v9 = vld [vmem:[%s6709_s4 + $0x3b8] sm:$0xf]  ;;  %p4439_p13 = pneg %p4438_p12 }
 0x5d4   : > { %2482 = vmatpush.bf16.msra.mxu3 %v3851_v18  ;;  %2801 = vmatpush.bf16.msra.mxu0 %v3967_v23  ;;  %v4258_v23 = vld [vmem:[%s6709_s4 + $0x1bc] sm:$0xf]  ;;  %p4444_p3 = pnand %p4443_p2, %p4439_p13 }
 0x5d8   : > { %2483 = vmatpush.bf16.msra.mxu3 %v3847_v38  ;;  %2802 = vmatpush.bf16.msra.mxu0 %v3951_v42  ;;  %v3878_v42 = vld [vmem:[%s6709_s4 + $0xb8] sm:$0xf] }
 0x5dc   : > { %2484 = vmatpush.bf16.msra.mxu3 %v3843_v11 }
 0x5e0   : > { %2485 = vmatpush.bf16.msra.mxu3 %v3839_v12  ;;  %v4269_v12 = vld [vmem:[%s6709_s4 + $0x334] sm:$0xf] }
 0x5e4   : > { %2486 = vmatpush.bf16.msra.mxu3 %v3835_v13  ;;  %v3955_v13 = vor.u32 %v4269_v12, %v3952_v14  ;;  %v3872_v12 = vld [vmem:[%s6709_s4 + $0xf0] sm:$0xf0]  ;;  %v4252_v14 = vld [vmem:[%s6709_s4 + $0xf4] sm:$0xf0] }
 0x5e8   : > { %2487 = vmatpush.bf16.msra.mxu3 %v3831_v29  ;;  %v3944_v29 = vld [vmem:[%s6709_s4 + $0x2f8] sm:$0xf0] }
 0x5e9   : > { %v3947_v21 = vor.u32 %v4266_v60, %v3944_v29 }
 0x5ec   : > { %2488 = vmatpush.bf16.msra.mxu3 %v3827_v56  ;;  %v4263_v56 = vld [vmem:[%s6709_s4 + $0x26c] sm:$0xf0] }
 0x5ed   : > { %v3919_v39 = vor.u32 %v4263_v56, %v3918_v63  ;;  %v4284_v63 = vld [vmem:[%s6710_s5 + $0x78] sm:$0xf0]  ;;  %v4042_v56 = vld [vmem:[%s6710_s5 + $0xf4] sm:$0xf] }
 0x5f0   : > { %2489 = vmatpush.bf16.msra.mxu3 %v3823_v47  ;;  %v3920_v47 = vld [vmem:[%s6709_s4 + $0x270] sm:$0xf0] }
 0x630   : > { %v2286_v43 = vpop.f32.mrf.mxu0 }
 0x636   : > { %v2273_v59 = vpop.f32.mrf.mxu3 }
 0x637   : > { %v2290_v45 = vmax.f32 %v2273_v59, %v2286_v43 }
 0x638   : > { %v2288_v33 = vpop.f32.mrf.mxu0 }
 0x639   : > { %2291 = vmax.xlane.f32.xlu2 %v2290_v45 }
 0x63e   : > { %v2275_v1 = vpop.f32.mrf.mxu3 }
 0x63f   : > { %v4365_v1 = vld [vmem:[%s6711_s6 + $0x10] ss:$0 sm:$0xff] }
 0x6ac   : > { %v2292_v31 = vpop.xlane.xlu2 %2291 }
 0x6ad   : > { %v2293_v53 = vsub.f32 %v2273_v59, %v2292_v31  ;;  %v2294_v50 = vsub.f32 %v2286_v43, %v2292_v31  ;;  %v4276_v31 = vld [vmem:[%s6709_s4 + $0x3f4] sm:$0xf0] }
 0x6af   : > { %v2295_v30 = vmul.f32 1.442695, %v2293_v53  ;;  %v2297_v48 = vmul.f32 1.442695, %v2294_v50  ;;  %v3971_v53 = vor.u32 %v4273_v2, %v3968_v25  ;;  %v3975_v50 = vor.u32 %v4276_v31, %v3974_v9  ;;  %v3912_v25 = vld [vmem:[%s6709_s4 + $0x1f8] sm:$0xf0] }
 0x6b0   : > { %v3915_v9 = vor.u32 %v4258_v23, %v3912_v25  ;;  %v3886_v31 = vld [vmem:[%s6709_s4 + $0x130] sm:$0xf]  ;;  %v4034_v23 = vld [vmem:[%s6710_s5 + $0xd4] sm:$0xf]  ;;  %v4290_v25 = vld [vmem:[%s6710_s5 + $0xd8] sm:$0xf0] }
 0x6b1   : > { %4403 = vpow2.f32 %v2295_v30  ;;  %v4274_v30 = vld [vmem:[%s6709_s4 + $0x3bc] sm:$0xf] }
 0x6b2   : > { %4405 = vpow2.f32 %v2297_v48  ;;  %v3976_v48 = vld [vmem:[%s6709_s4 + $0x3f8] sm:$0xf0] }
 0x6b7   : > { %v4404_v36 = vpop.eup %4403 }
 0x6b8   : > { %v4406_v15 = vpop.eup %4405  ;;  %2315 = vmatmul.f32.vlgmr.msrb.gmra.mxu1 %v4404_v36  ;;  %2355 = vmatmul.f32.vlgmr.msrb.gmra.mxu3 %v4404_v36 }
 0x6b9   : > { %2335 = vmatmul.f32.vlgmr.msrb.gmra.mxu2 %v4406_v15  ;;  %2375 = vmatmul.f32.vlgmr.msrb.gmra.mxu0 %v4406_v15 }
 0x6ba   : > { %2814 = vmatpush.bf16.msrb.mxu1 %v3971_v53  ;;  %2827 = vmatpush.bf16.msrb.mxu2 %v3975_v50  ;;  %v4255_v53 = vld [vmem:[%s6709_s4 + $0x16c] sm:$0xf0]  ;;  %v4253_v50 = vld [vmem:[%s6709_s4 + $0x134] sm:$0xf] }
 0x6be   : > { %2815 = vmatpush.bf16.msrb.mxu1 %v3955_v13  ;;  %v4250_v13 = vld [vmem:[%s6709_s4 + $0xbc] sm:$0xf] }
 0x735   : > { %v2316_v28 = vpop.f32.mrf.mxu1 }
 0x736   : > { %v2376_v17 = vpop.f32.mrf.mxu0 }
 0x73b   : > { %v2356_v6 = vpop.f32.mrf.mxu3 }
 0x73c   : > { %v2336_v46 = vpop.f32.mrf.mxu2  ;;  %v2377_v57 = vadd.f32 %v2376_v17, %v2356_v6  ;;  %v3958_v17 = vld [vmem:[%s6709_s4 + $0x338] sm:$0xf] }
 0x73d   : > { %v2337_v44 = vadd.f32 %v2336_v46, %v2316_v28  ;;  %v4272_v6 = vld [vmem:[%s6709_s4 + $0x374] sm:$0xf0]  ;;  %v4270_v46 = vld [vmem:[%s6709_s4 + $0x33c] sm:$0xf] }
 0x73e   : > { %v2380_v51 = vmax.f32 %v2377_v57, 1e-20  ;;  %v3959_v28 = vor.u32 %v4272_v6, %v3958_v17  ;;  %v3960_v57 = vld [vmem:[%s6709_s4 + $0x378] sm:$0xf0]  ;;  %v3875_v17 = vor.u32 %v4249_v7, %v3872_v12  ;;  %v3879_v6 = vor.u32 %v4252_v14, %v3878_v42 }
 0x73f   : > { %v2379_v8 = vmax.f32 %v2337_v44, 1e-20  ;;  %v3963_v44 = vor.u32 %v4270_v46, %v3960_v57  ;;  %v3854_v57 = vld [vmem:[%s6709_s4 + $0x30] sm:$0xf]  ;;  %v4306_v7 = vld [vmem:[%s6710_s5 + $0x1d8] sm:$0xf0] }
 0x740   : > { %4407 = vrcp.f32 %v2380_v51  ;;  %2828 = vmatpush.bf16.msrb.mxu2 %v3959_v28  ;;  %v3934_v51 = vld [vmem:[%s6709_s4 + $0x2b0] sm:$0xf]  ;;  %v3880_v28 = vld [vmem:[%s6709_s4 + $0xf8] sm:$0xf0] }
 0x741   : > { %4409 = vrcp.f32 %v2379_v8  ;;  %v4267_v8 = vld [vmem:[%s6709_s4 + $0x2ec] sm:$0xf0]  ;;  %v3883_v46 = vor.u32 %v4250_v13, %v3880_v28  ;;  %v4297_v13 = vld [vmem:[%s6710_s5 + $0x148] sm:$0xf0] }
 0x742   : > { %4411 = vrcp.f32 %v4516_v61  ;;  %v3910_v61 = vld [vmem:[%s6709_s4 + $0x1b8] sm:$0xf] }
 0x743   : > { %v3911_v2 = vor.u32 %v4260_v4, %v3910_v61  ;;  %v4308_v61 = vld [vmem:[%s6710_s5 + $0x1f8] sm:$0xf0]  ;;  %v4002_v4 = vld [vmem:[%s6710_s5 + $0x54] sm:$0xf] }
 0x746   : > { %v4408_v24 = vpop.eup %4407 }
 0x747   : > { %v4410_v3 = vpop.eup %4409  ;;  %v2384_v26 = vmul.f32 %v4408_v24, %v4406_v15  ;;  %v4265_v24 = vld [vmem:[%s6709_s4 + $0x2b4] sm:$0xf] }
 0x748   : > { %v2383_v54 = vmul.f32 %v4410_v3, %v4404_v36  ;;  %v3979_v36 = vor.u32 %v4274_v30, %v3976_v48  ;;  %v4412_v15 = vpop.eup %4411  ;;  %v3935_v3 = vor.u32 %v4267_v8, %v3934_v51  ;;  %v3887_v30 = vor.u32 %v4255_v53, %v3886_v31  ;;  %v3888_v48 = vld [vmem:[%s6709_s4 + $0x170] sm:$0xf0]  ;;  %v4299_v31 = vld [vmem:[%s6710_s5 + $0x168] sm:$0xf0]  ;;  %v4102_v53 = vld [vmem:[%s6710_s5 + $0x1e4] sm:$0xf] }
 0x749   : > { %v2386_v32 = vpack.c.bf16 %v2384_v26, %v2384_v26  ;;  %v2501_v16 = vmul.f32 128.0, %v4412_v15  ;;  %vm2505_vm1 = vweird.f32 %v4412_v15  ;;  %v3936_v26 = vld [vmem:[%s6709_s4 + $0x2f0] sm:$0xf0] }
 0x74a   : > { %v2385_v49 = vpack.c.bf16 %v2383_v54, %v2383_v54  ;;  %2840 = vmatpush.bf16.msrb.mxu3 %v3979_v36  ;;  %v3942_v54 = vld [vmem:[%s6709_s4 + $0x2b8] sm:$0xf]  ;;  %2803 = vmatpush.bf16.msra.mxu0 %v3935_v3  ;;  %v4245_v51 = vld [vmem:[%s6709_s4 + $0x34] sm:$0xf] }
 0x74b   : > { %2408 = vmatmul.bf16.vlgmr.msra.gmra.mxu2 %v2386_v32  ;;  %v2502_v19 = vsub.f32 1.0, %v2501_v16  ;;  %v4268_v32 = vld [vmem:[%s6709_s4 + $0x2f4] sm:$0xf0]  ;;  %v3891_v16 = vor.u32 %v4253_v50, %v3888_v48  ;;  %v4307_v50 = vld [vmem:[%s6710_s5 + $0x1e8] sm:$0xf0] }
 0x74c   : > { %2395 = vmatmul.bf16.vlgmr.msra.gmra.mxu1 %v2385_v49  ;;  %v3939_v49 = vor.u32 %v4265_v24, %v3936_v26  ;;  %v3943_v22 = vor.u32 %v4268_v32, %v3942_v54  ;;  %v3894_v36 = vld [vmem:[%s6709_s4 + $0x138] sm:$0xf]  ;;  %v3856_v24 = vld [vmem:[%s6709_s4 + $0x70] sm:$0xf0] }
 0x74d   : > { %v2503_v27 = vmul.f32 %v4412_v15, %v2502_v19  ;;  %v3862_v3 = vld [vmem:[%s6709_s4 + $0x38] sm:$0xf]  ;;  %v3859_v54 = vor.u32 %v4245_v51, %v3856_v24  ;;  %v4305_v51 = vld [vmem:[%s6710_s5 + $0x1c8] sm:$0xf0]  ;;  %v4288_v24 = vld [vmem:[%s6710_s5 + $0xb8] sm:$0xf0] }
 0x74e   : > { %2841 = vmatpush.bf16.msrb.mxu3 %v3963_v44  ;;  %2816 = vmatpush.bf16.msrb.mxu1 %v3939_v49  ;;  %v4247_v44 = vld [vmem:[%s6709_s4 + $0x6c] sm:$0xf0]  ;;  %v4248_v26 = vld [vmem:[%s6709_s4 + $0x74] sm:$0xf0]  ;;  %v4246_v49 = vld [vmem:[%s6709_s4 + $0x3c] sm:$0xf] }
 0x74f   : > { %v2504_v18 = vadd.f32 %v4412_v15, %v2503_v27  ;;  %2829 = vmatpush.bf16.msrb.mxu2 %v3943_v22  ;;  %2804 = vmatpush.bf16.msra.mxu0 %v3919_v39  ;;  %v4254_v27 = vld [vmem:[%s6709_s4 + $0x13c] sm:$0xf]  ;;  %v3855_v8 = vor.u32 %v4247_v44, %v3854_v57  ;;  %v3863_v32 = vor.u32 %v4248_v26, %v3862_v3  ;;  %v4094_v44 = vld [vmem:[%s6710_s5 + $0x1c4] sm:$0xf] }
 0x750   : > { %v3864_v22 = vld [vmem:[%s6709_s4 + $0x78] sm:$0xf0] }
 0x751   : > { %v6252_v62 = vsel %vm2505_vm1, %v4412_v15, %v2504_v18  ;;  %v4256_v15 = vld [vmem:[%s6709_s4 + $0x174] sm:$0xf0]  ;;  %v3896_v18 = vld [vmem:[%s6709_s4 + $0x178] sm:$0xf0]  ;;  %v3867_v60 = vor.u32 %v4246_v49, %v3864_v22  ;;  %v4095_v49 = vor.u32 %v4305_v51, %v4094_v44  ;;  %v4279_v22 = vld [vmem:[%s6710_s5 + $0x28] sm:$0xf0] }
 0x752   : > { %2842 = vmatpush.bf16.msrb.mxu3 %v3947_v21  ;;  %v3895_v19 = vor.u32 %v4256_v15, %v3894_v36  ;;  %v4010_v21 = vld [vmem:[%s6710_s5 + $0x74] sm:$0xf]  ;;  %v4103_v36 = vor.u32 %v4307_v50, %v4102_v53  ;;  %v3998_v15 = vld [vmem:[%s6710_s5 + $0x44] sm:$0xf]  ;;  %v4280_v57 = vld [vmem:[%s6710_s5 + $0x38] sm:$0xf0] }
 0x753   : > { %v4011_v39 = vor.u32 %v4284_v63, %v4010_v21  ;;  %v4086_v50 = vld [vmem:[%s6710_s5 + $0x1a4] sm:$0xf] }
 0x7c9   : > { %v2396_v34 = vpop.f32.mrf.mxu1 }
 0x7ce   : > { %v2409_v41 = vpop.f32.mrf.mxu2 }
 0x7cf   : > { %v2410_v43 = vadd.f32 %v2409_v41, %v2396_v34  ;;  %v3926_v34 = vld [vmem:[%s6709_s4 + $0x238] sm:$0xf] }
 0x7d0   : > { %v4264_v41 = vld [vmem:[%s6709_s4 + $0x274] sm:$0xf0] }
 0x7d1   : > { %v2413_v59 = vpack.c.bf16 %v2410_v43, %v2410_v43  ;;  %v2398_v45 = vpop.f32.mrf.mxu1  ;;  %v3923_v43 = vor.u32 %v4261_v35, %v3920_v47  ;;  %v4292_v47 = vld [vmem:[%s6710_s5 + $0xf8] sm:$0xf0] }
 0x7d2   : > { %v4262_v45 = vld [vmem:[%s6709_s4 + $0x23c] sm:$0xf] }
 0x7d3   : > { %2490 = vmatmul.bf16.vlgmr.msra.gmra.mxu3 %v2413_v59  ;;  %v3927_v59 = vor.u32 %v4264_v41, %v3926_v34  ;;  %2817 = vmatpush.bf16.msrb.mxu1 %v3923_v43  ;;  %v4006_v34 = vld [vmem:[%s6710_s5 + $0x64] sm:$0xf]  ;;  %v4283_v41 = vld [vmem:[%s6710_s5 + $0x68] sm:$0xf0]  ;;  %v4043_v43 = vor.u32 %v4292_v47, %v4042_v56  ;;  %v4090_v56 = vld [vmem:[%s6710_s5 + $0x1b4] sm:$0xf] }
 0x7d4   : > { %v4287_v47 = vld [vmem:[%s6710_s5 + $0xa8] sm:$0xf0] }
 0x7d5   : > { %2830 = vmatpush.bf16.msrb.mxu2 %v3927_v59  ;;  %v4038_v59 = vld [vmem:[%s6710_s5 + $0xe4] sm:$0xf] }
 0x7d6   : > { %v2411_v33 = vpop.f32.mrf.mxu2 }
 0x7d7   : > { %v3928_v33 = vld [vmem:[%s6709_s4 + $0x278] sm:$0xf0] }
 0x7d9   : > { %2831 = vmatpush.bf16.msrb.mxu2 %v3911_v2 }
 0x7dd   : > { %2832 = vmatpush.bf16.msrb.mxu2 %v3895_v19  ;;  %v4035_v19 = vor.u32 %v4290_v25, %v4034_v23  ;;  %v4286_v23 = vld [vmem:[%s6710_s5 + $0x98] sm:$0xf0] }
 0x7e1   : > { %2833 = vmatpush.bf16.msrb.mxu2 %v3879_v6  ;;  %v4062_v6 = vld [vmem:[%s6710_s5 + $0x144] sm:$0xf] }
 0x7e2   : > { %v4063_v26 = vor.u32 %v4297_v13, %v4062_v6  ;;  %v4301_v13 = vld [vmem:[%s6710_s5 + $0x188] sm:$0xf0] }
 0x7e5   : > { %2834 = vmatpush.bf16.msrb.mxu2 %v3863_v32 }
 0x856   : > { %v2491_v52 = vpop.f32.mrf.mxu3 }
 0x857   : > { %v2492_v37 = vadd.f32 %v4365_v1, %v2491_v52  ;;  %v3931_v1 = vor.u32 %v4262_v45, %v3928_v33  ;;  %v3902_v52 = vld [vmem:[%s6709_s4 + $0x1b0] sm:$0xf]  ;;  %v4291_v45 = vld [vmem:[%s6710_s5 + $0xe8] sm:$0xf0]  ;;  %v4074_v33 = vld [vmem:[%s6710_s5 + $0x174] sm:$0xf] }
 0x859   : > { %v2495_v0 = vadd.f32 %v4419_v40, %v2492_v37  ;;  %v4259_v37 = vld [vmem:[%s6709_s4 + $0x1ec] sm:$0xf0]  ;;  %v4257_v40 = vld [vmem:[%s6709_s4 + $0x1b4] sm:$0xf]  ;;  %2843 = vmatpush.bf16.msrb.mxu3 %v3931_v1 }
 0x85b   : > { %2498 = vadd.xlane.f32.xlu0 %v2495_v0 }
 0x85d   : > { %2844 = vmatpush.bf16.msrb.mxu3 %v3915_v9  ;;  %v4070_v9 = vld [vmem:[%s6710_s5 + $0x164] sm:$0xf] }
 0x85e   : > { %v2493_v58 = vpop.f32.mrf.mxu3  ;;  %v4071_v48 = vor.u32 %v4299_v31, %v4070_v9  ;;  %v4054_v9 = vld [vmem:[%s6710_s5 + $0x124] sm:$0xf]  ;;  %v4295_v31 = vld [vmem:[%s6710_s5 + $0x128] sm:$0xf0] }
 0x85f   : > { %v3904_v58 = vld [vmem:[%s6709_s4 + $0x1f0] sm:$0xf0]  ;;  %v4055_v53 = vor.u32 %v4295_v31, %v4054_v9 }
 0x860   : > { %v3907_v55 = vor.u32 %v4257_v40, %v3904_v58  ;;  %v4106_v40 = vld [vmem:[%s6710_s5 + $0x1f4] sm:$0xf] }
 0x861   : > { %v4107_v2 = vor.u32 %v4308_v61, %v4106_v40  ;;  %v4367_v40 = vld [vmem:[%s6711_s6 + $0x12] ss:$0 sm:$0xff] }
 0x862   : > { %2818 = vmatpush.bf16.msrb.mxu1 %v3907_v55  ;;  %v4282_v55 = vld [vmem:[%s6710_s5 + $0x58] sm:$0xf0] }
 0x866   : > { %2819 = vmatpush.bf16.msrb.mxu1 %v3891_v16  ;;  %v4281_v16 = vld [vmem:[%s6710_s5 + $0x48] sm:$0xf0] }
 0x867   : > { %v3999_v42 = vor.u32 %v4281_v16, %v3998_v15  ;;  %v4277_v15 = vld [vmem:[%s6710_s5 + $0x8] sm:$0xf0]  ;;  %v4014_v16 = vld [vmem:[%s6710_s5 + $0x84] sm:$0xf] }
 0x86a   : > { %2820 = vmatpush.bf16.msrb.mxu1 %v3875_v17  ;;  %v3994_v17 = vld [vmem:[%s6710_s5 + $0x34] sm:$0xf] }
 0x86b   : > { %v3995_v32 = vor.u32 %v4280_v57, %v3994_v17  ;;  %v4078_v17 = vld [vmem:[%s6710_s5 + $0x184] sm:$0xf] }
 0x86e   : > { %2821 = vmatpush.bf16.msrb.mxu1 %v3859_v54  ;;  %v3990_v54 = vld [vmem:[%s6710_s5 + $0x24] sm:$0xf] }
 0x872   : > { %3069 = vmatpush.bf16.msra.mxu1 %v4043_v43  ;;  %v3991_v43 = vor.u32 %v4279_v22, %v3990_v54 }
 0x8ce   : > { %v2499_v38 = vpop.xlane.xlu0 %2498 }
 0x8cf   : > { %v2507_v20 = vmul.f32 %v6252_v62, %v2499_v38  ;;  %v3899_v38 = vor.u32 %v4254_v27, %v3896_v18  ;;  %v4030_v27 = vld [vmem:[%s6710_s5 + $0xc4] sm:$0xf]  ;;  %v4066_v18 = vld [vmem:[%s6710_s5 + $0x154] sm:$0xf] }
 0x8d1   : > { %v6255_v5 = vsub.f32 %v2495_v0, %v2507_v20  ;;  %v3903_v0 = vor.u32 %v4259_v37, %v3902_v52  ;;  %v3870_v20 = vld [vmem:[%s6709_s4 + $0xb0] sm:$0xf]  ;;  %2845 = vmatpush.bf16.msrb.mxu3 %v3899_v38  ;;  %v4007_v52 = vor.u32 %v4283_v41, %v4006_v34  ;;  %v4300_v37 = vld [vmem:[%s6710_s5 + $0x178] sm:$0xf0] }
 0x8d2   : > { %v4075_v58 = vor.u32 %v4300_v37, %v4074_v33  ;;  %v4298_v38 = vld [vmem:[%s6710_s5 + $0x158] sm:$0xf0] }
 0x8d3   : > { %v2509_v11 = vmul.f32 %v6255_v5, %v6255_v5  ;;  %2805 = vmatpush.bf16.msra.mxu0 %v3903_v0  ;;  %v4039_v0 = vor.u32 %v4291_v45, %v4038_v59 }
 0x8d4   : > { %3082 = vmatpush.bf16.msra.mxu2 %v4075_v58 }
 0x8d5   : > { %2510 = vadd.xlane.f32.xlu1 %v2509_v11  ;;  %v4251_v11 = vld [vmem:[%s6709_s4 + $0xec] sm:$0xf0]  ;;  %2846 = vmatpush.bf16.msrb.mxu3 %v3883_v46 }
 0x8d6   : > { %v3871_v10 = vor.u32 %v4251_v11, %v3870_v20  ;;  %3070 = vmatpush.bf16.msra.mxu1 %v4039_v0  ;;  %v4289_v20 = vld [vmem:[%s6710_s5 + $0xc8] sm:$0xf0]  ;;  %v4098_v11 = vld [vmem:[%s6710_s5 + $0x1d4] sm:$0xf] }
 0x8d7   : > { %2806 = vmatpush.bf16.msra.mxu0 %v3887_v30  ;;  %v4003_v30 = vor.u32 %v4282_v55, %v4002_v4  ;;  %v4099_v14 = vor.u32 %v4306_v7, %v4098_v11  ;;  %v4031_v46 = vor.u32 %v4289_v20, %v4030_v27  ;;  %v3986_v4 = vld [vmem:[%s6710_s5 + $0x14] sm:$0xf]  ;;  %v4285_v27 = vld [vmem:[%s6710_s5 + $0x88] sm:$0xf0]  ;;  %v4294_v20 = vld [vmem:[%s6710_s5 + $0x118] sm:$0xf0] }
 0x8d8   : > { %3083 = vmatpush.bf16.msra.mxu2 %v4071_v48  ;;  %v4018_v55 = vld [vmem:[%s6710_s5 + $0x94] sm:$0xf] }
 0x8d9   : > { %2847 = vmatpush.bf16.msrb.mxu3 %v3867_v60  ;;  %v4058_v60 = vld [vmem:[%s6710_s5 + $0x134] sm:$0xf]  ;;  %v4019_v25 = vor.u32 %v4286_v23, %v4018_v55 }
 0x8da   : > { %3071 = vmatpush.bf16.msra.mxu1 %v4035_v19  ;;  %v4082_v11 = vld [vmem:[%s6710_s5 + $0x194] sm:$0xf] }
 0x8db   : > { %2807 = vmatpush.bf16.msra.mxu0 %v3871_v10  ;;  %v4067_v10 = vor.u32 %v4298_v38, %v4066_v18  ;;  %v4015_v18 = vor.u32 %v4285_v27, %v4014_v16  ;;  %v4050_v38 = vld [vmem:[%s6710_s5 + $0x114] sm:$0xf] }
 0x8dc   : > { %v4051_v7 = vor.u32 %v4294_v20, %v4050_v38 }
 0x8dd   : > { %3095 = vmatpush.bf16.msra.mxu3 %v4107_v2  ;;  %3084 = vmatpush.bf16.msra.mxu2 %v4067_v10  ;;  %v4302_v10 = vld [vmem:[%s6710_s5 + $0x198] sm:$0xf0] }
 0x8de   : > { %3072 = vmatpush.bf16.msra.mxu1 %v4031_v46  ;;  %v2565_v46 = vld [vmem:[%s6711_s6 + $0x13] sm:$0xf] }
 0x8df   : > { %2808 = vmatpush.bf16.msra.mxu0 %v3855_v8  ;;  %v4026_v8 = vld [vmem:[%s6710_s5 + $0xb4] sm:$0xf]  ;;  %v2633_v57 = vperm.slane %v2565_v46, 0  ;;  %v2634_v44 = vperm.slane %v2565_v46, 1 }
 0x8e0   : > { %v4027_v63 = vor.u32 %v4288_v24, %v4026_v8 }
 0x8e1   : > { %3096 = vmatpush.bf16.msra.mxu3 %v4103_v36  ;;  %3085 = vmatpush.bf16.msra.mxu2 %v4063_v26  ;;  %v3982_v36 = vld [vmem:[%s6710_s5 + $0x4] sm:$0xf] }
 0x8e2   : > { %3073 = vmatpush.bf16.msra.mxu1 %v4027_v63  ;;  %v3983_v19 = vor.u32 %v4277_v15, %v3982_v36 }
 0x8e3   : > { %3056 = vmatpush.bf16.msrb.mxu0 %v4011_v39  ;;  %v4022_v39 = vld [vmem:[%s6710_s5 + $0xa4] sm:$0xf] }
 0x8e4   : > { %v4023_v33 = vor.u32 %v4287_v47, %v4022_v39 }
 0x8e5   : > { %3097 = vmatpush.bf16.msra.mxu3 %v4099_v14  ;;  %v4293_v14 = vld [vmem:[%s6710_s5 + $0x108] sm:$0xf0] }
 0x8e6   : > { %3074 = vmatpush.bf16.msra.mxu1 %v4023_v33 }
 0x8e7   : > { %3057 = vmatpush.bf16.msrb.mxu0 %v4007_v52  ;;  %v4366_v52 = vld [vmem:[%s6711_s6 + $0x11] ss:$0 sm:$0xff] }
 0x8e9   : > { %3098 = vmatpush.bf16.msra.mxu3 %v4095_v49  ;;  %v2636_v49 = vperm.slane %v2565_v46, 3 }
 0x8ea   : > { %3075 = vmatpush.bf16.msra.mxu1 %v4019_v25 }
 0x8eb   : > { %3058 = vmatpush.bf16.msrb.mxu0 %v4003_v30  ;;  %v4303_v30 = vld [vmem:[%s6710_s5 + $0x1a8] sm:$0xf0] }
 0x8ec   : > { %v4087_v48 = vor.u32 %v4303_v30, %v4086_v50 }
 0x8ee   : > { %3076 = vmatpush.bf16.msra.mxu1 %v4015_v18 }
 0x8ef   : > { %3059 = vmatpush.bf16.msrb.mxu0 %v3999_v42  ;;  %v4046_v42 = vld [vmem:[%s6710_s5 + $0x104] sm:$0xf] }
 0x8f0   : > { %v4047_v6 = vor.u32 %v4293_v14, %v4046_v42 }
 0x8f3   : > { %3060 = vmatpush.bf16.msrb.mxu0 %v3995_v32  ;;  %v2635_v32 = vperm.slane %v2565_v46, 2 }
 0x8f7   : > { %3061 = vmatpush.bf16.msrb.mxu0 %v3991_v43 }
 0x948   : > { %v2511_v29 = vpop.xlane.xlu1 %2510 }
 0x949   : > { %v2512_v35 = vmul.f32 %v2511_v29, %v6252_v62  ;;  %v4296_v29 = vld [vmem:[%s6710_s5 + $0x138] sm:$0xf0] }
 0x94a   : > { %v4059_v41 = vor.u32 %v4296_v29, %v4058_v60 }
 0x94b   : > { %v6455_v1 = vadd.f32 1e-05, %v2512_v35  ;;  %v4304_v35 = vld [vmem:[%s6710_s5 + $0x1b8] sm:$0xf0] }
 0x94c   : > { %v4091_v59 = vor.u32 %v4304_v35, %v4090_v56  ;;  %3086 = vmatpush.bf16.msra.mxu2 %v4059_v41 }
 0x94d   : > { %4413 = vrsqrt.f32 %v6455_v1  ;;  %vm2520_vm3 = vweird.f32 %v6455_v1 }
 0x94e   : > { %3099 = vmatpush.bf16.msra.mxu3 %v4091_v59 }
 0x950   : > { %3087 = vmatpush.bf16.msra.mxu2 %v4055_v53 }
 0x952   : > { %3100 = vmatpush.bf16.msra.mxu3 %v4087_v48 }
 0x953   : > { %v4414_v12 = vpop.eup %4413 }
 0x954   : > { %v2515_v28 = vmul.f32 %v4414_v12, %v6455_v1  ;;  %vm2521_vm2 = vweird.f32 %v4414_v12  ;;  %3088 = vmatpush.bf16.msra.mxu2 %v4051_v7 }
 0x955   : > { %vm2522_vm4 = vmor %vm2520_vm3, %vm2521_vm2 }
 0x956   : > { %v2516_v3 = vmul.f32 %v4414_v12, %v2515_v28  ;;  %v4079_v28 = vor.u32 %v4301_v13, %v4078_v17 }
 0x958   : > { %v2517_v21 = vmul.f32 0.5, %v2516_v3  ;;  %3089 = vmatpush.bf16.msra.mxu2 %v4047_v6 }
 0x95a   : > { %v2518_v34 = vsub.f32 1.5, %v2517_v21 }
 0x95c   : > { %v2519_v45 = vmul.f32 %v4414_v12, %v2518_v34 }
 0x95e   : > { %v2523_v37 = vsel %vm2522_vm4, %v4414_v12, %v2519_v45  ;;  %v4083_v12 = vor.u32 %v4302_v10, %v4082_v11 }
 0x95f   : > { %v2524_v0 = vmul.f32 %v2523_v37, %v6255_v5  ;;  %v4278_v5 = vld [vmem:[%s6710_s5 + $0x18] sm:$0xf0]  ;;  %v4368_v37 = vld [vmem:[%s6711_s6 + $0x17] ss:$0 sm:$0xff] }
 0x960   : > { %v3987_v2 = vor.u32 %v4278_v5, %v3986_v4  ;;  %3101 = vmatpush.bf16.msra.mxu3 %v4083_v12 }
 0x961   : > { %v2528_v58 = vmul.f32 %v4366_v52, %v2524_v0 }
 0x962   : > { %3062 = vmatpush.bf16.msrb.mxu0 %v3987_v2 }
 0x963   : > { %v6572_v1 = vadd.f32 %v4367_v40, %v2528_v58 }
 0x964   : > { %3102 = vmatpush.bf16.msra.mxu3 %v4079_v28 }
 0x965   : > { %v2631_v61 = vpack.c.bf16 %v6572_v1, %v6572_v1 }
 0x966   : > { %3063 = vmatpush.bf16.msrb.mxu0 %v3983_v19 }
 0x967   : > { %2809 = vmatmul.bf16.vlgmr.msra.gmra.mxu0 %v2631_v61  ;;  %2822 = vmatmul.bf16.vlgmr.msrb.gmra.mxu1 %v2631_v61 }
 0x968   : > { %2835 = vmatmul.bf16.vlgmr.msrb.gmra.mxu2 %v2631_v61  ;;  %2848 = vmatmul.bf16.vlgmr.msrb.gmra.mxu3 %v2631_v61 }
 0x9e4   : > { %v2810_v51 = vpop.f32.mrf.mxu0  ;;  %v2823_v8 = vpop.f32.mrf.mxu1 }
 0x9e5   : > { %v2811_v24 = vadd.f32 %v2810_v51, %v2633_v57  ;;  %v2824_v3 = vadd.f32 %v2823_v8, %v2634_v44 }
 0x9e7   : > { %v2853_v26 = vmax.f32 %v2811_v24, 0.0  ;;  %v2854_v54 = vmax.f32 %v2824_v3, 0.0 }
 0x9e9   : > { %v2857_v22 = vpack.c.bf16 %v2853_v26, %v2853_v26  ;;  %v2858_v60 = vpack.c.bf16 %v2854_v54, %v2854_v54 }
 0x9eb   : > { %v2836_v29 = vpop.f32.mrf.mxu2  ;;  %v2849_v21 = vpop.f32.mrf.mxu3  ;;  %3064 = vmatmul.bf16.vlgmr.msrb.gmra.mxu0 %v2857_v22  ;;  %3077 = vmatmul.bf16.vlgmr.msra.gmra.mxu1 %v2858_v60 }
 0x9ec   : > { %v2837_v63 = vadd.f32 %v2836_v29, %v2635_v32  ;;  %v2850_v56 = vadd.f32 %v2849_v21, %v2636_v49  ;;  %v2812_v35 = vpop.f32.mrf.mxu0  ;;  %v2825_v39 = vpop.f32.mrf.mxu1 }
 0x9ee   : > { %v2855_v47 = vmax.f32 %v2837_v63, 0.0  ;;  %v2856_v34 = vmax.f32 %v2850_v56, 0.0 }
 0x9f0   : > { %v2859_v41 = vpack.c.bf16 %v2855_v47, %v2855_v47  ;;  %v2860_v43 = vpack.c.bf16 %v2856_v34, %v2856_v34 }
 0x9f2   : > { %3090 = vmatmul.bf16.vlgmr.msra.gmra.mxu2 %v2859_v41  ;;  %3103 = vmatmul.bf16.vlgmr.msra.gmra.mxu3 %v2860_v43 }
 0x9f3   : > { %v2838_v59 = vpop.f32.mrf.mxu2  ;;  %v2851_v45 = vpop.f32.mrf.mxu3 }
 0xa68   : > { %v3065_v33 = vpop.f32.mrf.mxu0  ;;  %v3078_v52 = vpop.f32.mrf.mxu1 }
 0xa69   : > { %v3066_v40 = vadd.f32 %v4368_v37, %v3065_v33 }
 0xa6b   : > { %v3079_v61 = vadd.f32 %v3078_v52, %v3066_v40 }
 0xa70   : > { %v3067_v0 = vpop.f32.mrf.mxu0  ;;  %v3080_v58 = vpop.f32.mrf.mxu1 }
 0xa75   : > { %v3091_v4 = vpop.f32.mrf.mxu2  ;;  %v3104_v5 = vpop.f32.mrf.mxu3 }
 0xa76   : > { %v3092_v55 = vadd.f32 %v3091_v4, %v3079_v61 }
 0xa78   : > { %v3105_v2 = vadd.f32 %v3104_v5, %v3092_v55 }
 0xa7a   : > { %v3108_v23 = vadd.f32 %v3105_v2, %v6572_v1 }
 0xa7c   : > { %3111 = vadd.xlane.f32.xlu2 %v3108_v23 }
 0xa7d   : > { %v3093_v25 = vpop.f32.mrf.mxu2  ;;  %v3106_v9 = vpop.f32.mrf.mxu3 }
 0xaef   : > { %v3112_v31 = vpop.xlane.xlu2 %3111 }
 0xaf0   : > { %v3113_v53 = vmul.f32 %v3112_v31, %v6252_v62 }
 0xaf2   : > { %v3114_v50 = vsub.f32 %v3108_v23, %v3113_v53 }
 0xaf4   : > { %v3115_v30 = vmul.f32 %v3114_v50, %v3114_v50 }
 0xaf6   : > { %3116 = vadd.xlane.f32.xlu0 %v3115_v30 }
 0xaf7   : > { %4447 = shalt.err (!%p4444_p3)
}
 0xaf8   : > { %s4517_s21 = smov 128   ;;  %s4518_s22 = smov 8   ;;  %v4369_v20 = vld [vmem:[%s6711_s6 + $0x18] ss:$0 sm:$0xff]  ;;  %v4370_v7 = vld [vmem:[%s6711_s6 + $0x19] ss:$0 sm:$0xff] }
 0xaf9   : > { %4310 = dma.vmem_to_hbm [thread:$0]  (%p4612_p5), %s3169_s30, 1024, %s3171_s18, %s3151_s26, %s4517_s21, %s4517_s21, %s4518_s22  }
 0xafa   : > { %s3321_s1 = sshll.u32 %s5586_s20, 3  ;;  %s4112_s11 = sshll.u32 %s4595_s17, 3 }
 0xafb   : > { %s6731_s30 = sshll.u32 %s4696_s27, 3  ;;  %s3183_s17 = scalar_lea.hbm %s6715_s10, %s4112_s11 }
 0xafc   : > { %s417_s15 = scalar_lea.vmem %s6707_s2, %s6731_s30  ;;  %s404_s21 = scalar_lea.vmem [#allocation4], %s3321_s1 }
 0xafd   : > { %v3139_v12 = vld [vmem:[%s417_s15] sm:$0xff]  ;;  %s3185_s22 = sshll.u32 %s404_s21, 4  ;;  %s3187_s12 = sshll.u32 %s3183_s17, 4  ;;  %s3186_s22 = int_to_ptr.vmem [resolvable:$true] %s3185_s22  ;;  %s3188_s12 = int_to_ptr.hbm [resolvable:$true] %s3187_s12 }
 0xafe   : > { %s3156_s27 = scalar_lea.sflag [#allocation5], %s5586_s20  ;;  %s4462_s28 = sshra.s32 %s3188_s12, 4  ;;  %s4463_s28 = int_to_ptr.hbm [resolvable:$true] %s4462_s28 }
 0xaff   : > { %s4464_s30 = scalar_lea.hbm %s4463_s28, 8  ;;  %s4468_s26 = scalar_lea.hbm %s6715_s10, 16 }
 0xb00   : > { %p4465_p4 = scmp.ne.s32.totalorder %s4463_s28, %s4464_s30  ;;  %p4469_p9 = scmp.lt.s32.totalorder %s4463_s28, %s6715_s10 }
 0xb01   : > { %p4470_p10 = scmp.lt.s32.totalorder %s4468_s26, %s4464_s30 }
 0xb02   : > { %p4466_p7 = pnand %p4465_p4, %p4612_p5 }
 0xb03   : > { %p4471_p11 = por %p4470_p10, %p4469_p9 }
 0xb04   : > { %p4467_p8 = pneg %p4466_p7 }
 0xb06   : > { %p4472_p12 = pnand %p4471_p11, %p4467_p8 }
 0xb69   : > { %v3117_v1 = vpop.xlane.xlu0 %3116 }
 0xb6a   : > { %v3118_v48 = vmul.f32 %v3117_v1, %v6252_v62 }
 0xb6c   : > { %v3119_v36 = vadd.f32 1e-05, %v3118_v48 }
 0xb6e   : > { %4415 = vrsqrt.f32 %v3119_v36  ;;  %vm3126_vm6 = vweird.f32 %v3119_v36 }
 0xb74   : > { %v4416_v15 = vpop.eup %4415 }
 0xb75   : > { %v3121_v16 = vmul.f32 %v4416_v15, %v3119_v36  ;;  %vm3127_vm5 = vweird.f32 %v4416_v15 }
 0xb76   : > { %vm3128_vm7 = vmor %vm3126_vm6, %vm3127_vm5 }
 0xb77   : > { %v3122_v19 = vmul.f32 %v4416_v15, %v3121_v16 }
 0xb79   : > { %v3123_v27 = vmul.f32 0.5, %v3122_v19 }
 0xb7b   : > { %v3124_v18 = vsub.f32 1.5, %v3123_v27 }
 0xb7d   : > { %v3125_v38 = vmul.f32 %v4416_v15, %v3124_v18 }
 0xb7f   : > { %v3129_v62 = vsel %vm3128_vm7, %v4416_v15, %v3125_v38 }
 0xb80   : > { %v3130_v11 = vmul.f32 %v3129_v62, %v3114_v50 }
 0xb82   : > { %v3134_v10 = vmul.f32 %v4369_v20, %v3130_v11 }
 0xb84   : > { %v3138_v42 = vadd.f32 %v4370_v7, %v3134_v10 }
 0xb86   : > { %v3140_v14 = vadd.f32 %v3139_v12, %v3138_v42 }
 0xb88   : > { %3149 = vst [vmem:[%s404_s21] sm:$0xff] %v3140_v14 }
 0xb89   : > { %4475 = shalt.err (!%p4472_p12)
}
 0xb8a   : > { %4311 = dma.vmem_to_hbm [thread:$0]  (%p4612_p5), %s3186_s22, 128, %s3188_s12, %s3156_s27  }
 0xb8b PF: > { %p4321_p13 = scmp.ge.s32.totalorder %s4514_s16, 2  ;;  %s3199_s20 = sand.u32 1, %s4502_s13  }
 0xb8c   : > { %s3200_s25 = scalar_lea.sflag [#allocation3], %s3199_s20 }
 0xb8d   : > { %p4315_p0 = pnand %p4321_p13, %p4616_p6 }
 0xb8f   : > { %p4316_p1 = pneg %p4315_p0 }
 0xb91   : > { %4493 = dma.done.wait (%p4316_p1), %s3200_s25, 1024  }
 0xb92   : > { %4495 = vsyncadd (%p4316_p1), %s3200_s25, 4294966272  ;;  %s3210_s0 = scalar_lea.sflag [#allocation5], %s3199_s20 }
 0xb93   : > { %4497 = dma.done.wait (%p4316_p1), %s3210_s0, 128  }
 0xb94   : > { %4499 = vsyncadd (%p4316_p1), %s3210_s0, 4294967168  ;;  %s6732_s16 = sld [smem:[#allocation9_spill]]  ;;  %s6735_s13 = smov %s4506_s14 }
 0xb95   : > { %s6733_s19 = sld [smem:[#allocation8_spill]] }
 0xb96   : > { %s6734_s15 = sld [smem:[#allocation10_spill]] }
 0xb9a   : > { %p24_p5 = scmp.ge.s32.totalorder %s6732_s16, 4  }
 0xb9b   : > { %s6736_s14 = smov %s6733_s19 }
 0xb9c   :  { %26 = sbr.rel (!%p24_p5) target bundleno = 8 (0x8), region = 117 }
 0xba1   :  { %3216 = vsyncpa [#allocation3], 1 }
 0xba2   :  { %3218 = vsyncpa [#allocation3 + $0x1], 1 }
 0xba3   :  { %3219 = vsyncpa [#allocation5], 1 }
 0xba4   :  { %3221 = vsyncpa [#allocation5 + $0x1], 1 }

</bundles_post_ra>
